<compile_context>
chip_gen: v7x
topology: tpu7x:2x2x1
jax: 0.10.0
libtpu: 0.0.40
codegen_flags: <defaults>
</compile_context>

<pallas_src>
import functools
from typing import NamedTuple

import jax
import jax.numpy as jnp
from jax.experimental import pallas as pl
from jax.experimental.pallas import tpu as pltpu


# ----------------------------------------------------------------------------------
# Small helpers
# ----------------------------------------------------------------------------------
def _round_up(x, m):
    return ((x + m - 1) // m) * m


def _cdiv(a, b):
    return (a + b - 1) // b


def _tpu_generation():
    """Best-effort TPU generation (5 / 6 / 7) from device_kind; None if unknown."""
    try:
        kind = jax.devices()[0].device_kind.lower()
    except Exception:
        return None
    for gen in (7, 6, 5):
        if str(gen) in kind:
            return gen
    return None


def _hw_config():
    gen = _tpu_generation()
    if gen == 7:
        # v7x: 64 MiB physical VMEM per TC -> cap tile_m at 512; bf16 EUP available.
        return dict(tile_m_max=512, vmem_limit=48 << 20, bf16_act=True)
    if gen == 6:
        # v6e: 128 MiB VMEM, bf16 EUP/VPU.
        return dict(tile_m_max=1024, vmem_limit=80 << 20, bf16_act=True)
    if gen == 5:
        # v5e: 128 MiB VMEM, but no bf16 EUP/VPU -> keep activations f32.
        return dict(tile_m_max=1024, vmem_limit=80 << 20, bf16_act=False)
    # Unknown chip: conservative defaults.
    return dict(tile_m_max=512, vmem_limit=48 << 20, bf16_act=False)


# ----------------------------------------------------------------------------------
# Kernel
# ----------------------------------------------------------------------------------
def _fc_mlp_kernel(x_ref, w1_ref, b1_ref, w2_ref, b2_ref, o_ref, *, bf16_act):
    # Linear 1 on the MXU: bf16 inputs, f32 accumulation.
    h = jnp.dot(x_ref[...], w1_ref[...], preferred_element_type=jnp.float32)
    h = h + b1_ref[...]                                   # (1, H) f32 bias broadcast
    # Sigmoid via a single transcendental: sigmoid(x) = 0.5 * tanh(0.5*x) + 0.5
    # (one EUP push per element instead of exp + reciprocal; muls/adds land on VALU slack).
    if bf16_act:
        # v6e/v7x: bf16 EUP/VPU ~2x throughput; s feeds the bf16 MXU anyway.
        hb = h.astype(jnp.bfloat16)
        s = jnp.tanh(hb * 0.5) * 0.5 + 0.5                # stays bf16 (weak scalars)
    else:
        s = (jnp.tanh(h * 0.5) * 0.5 + 0.5).astype(w2_ref.dtype)
    # Linear 2 on the MXU: (tile_m, H) @ (H, N_pad) -> f32.
    out = jnp.dot(s, w2_ref[...], preferred_element_type=jnp.float32)
    out = out + b2_ref[...]                               # (1, N_pad) f32 bias
    o_ref[...] = out.astype(o_ref.dtype)                  # lane-dense unmasked store


# ----------------------------------------------------------------------------------
# Parameter preparation (one-time; hoisted out of the forward pass)
# ----------------------------------------------------------------------------------
class PreparedParams(NamedTuple):
    w1: jax.Array      # (K_pad, H)   bf16
    b1: jax.Array      # (1, H)       f32
    w2: jax.Array      # (H, N_pad)   bf16
    b2: jax.Array      # (1, N_pad)   f32
    in_dim: int        # K (unpadded)
    n_features: int    # N (unpadded)


def prepare_params(w1, b1, w2, b2):
    """Pad to lane multiples and cast weights to bf16 ONCE (not per forward call).

    w1: (in_dim, hidden), b1: (hidden,), w2: (hidden, n_features), b2: (n_features,).
    Weights are stored as (in, out) == PyTorch weight.T, so forward is y = x @ W + b.
    """
    K, H = w1.shape
    H2, N = w2.shape
    assert H == H2, "hidden dims of the two linears must match"
    K_pad = _round_up(K, 128)
    N_pad = _round_up(N, 128)
    w1_p = jnp.pad(w1, ((0, K_pad - K), (0, 0))) if K_pad != K else w1
    w2_p = jnp.pad(w2, ((0, 0), (0, N_pad - N))) if N_pad != N else w2
    b2_p = jnp.pad(b2, (0, N_pad - N)) if N_pad != N else b2
    # TODO(synk): on v7x, fp8 weights with per-channel scales folded into biases would
    # halve weight HBM traffic for tiny batches; skipped pending precision validation.
    return PreparedParams(
        w1=w1_p.astype(jnp.bfloat16),
        b1=b1.reshape(1, H).astype(jnp.float32),
        w2=w2_p.astype(jnp.bfloat16),
        b2=b2_p.reshape(1, N_pad).astype(jnp.float32),
        in_dim=int(K),
        n_features=int(N),
    )


# ----------------------------------------------------------------------------------
# Forward pass
# ----------------------------------------------------------------------------------
def fc_layer_multiframe(x, params: PreparedParams):
    """x: (M, in_dim) f32 -> (M, n_features) in x.dtype.

    NOTE: matmuls run in bf16 with f32 accumulation (inference-precision choice);
    results will not match an f32 PyTorch Linear bit-for-bit.
    """
    M, K = x.shape
    assert K == params.in_dim, "x feature dim must equal n_features * input_frames"
    K_pad, H = params.w1.shape
    _, N_pad = params.w2.shape
    N = params.n_features

    cfg = _hw_config()

    # Balanced row tiling: padding never exceeds one 16-row sublane group per tile.
    n_tiles = _cdiv(M, cfg["tile_m_max"])
    tile_m = _round_up(_cdiv(M, n_tiles), 16)
    M_pad = n_tiles * tile_m

    # Per-call activation prep only (weights were prepared once).
    if (M_pad, K_pad) != (M, K):
        x = jnp.pad(x, ((0, M_pad - M), (0, K_pad - K)))
    x_bf = x.astype(jnp.bfloat16)

    kernel = functools.partial(_fc_mlp_kernel, bf16_act=cfg["bf16_act"])

    cost = pl.CostEstimate(
        flops=2 * M_pad * K_pad * H + 2 * M_pad * H * N_pad,
        transcendentals=M_pad * H,  # one tanh per hidden activation
        bytes_accessed=(x_bf.size * 2 + params.w1.size * 2 + params.w2.size * 2
                        + params.b1.size * 4 + params.b2.size * 4 + M_pad * N_pad * 4),
    )

    def _call(single_buffer_weights):
        # Resident operands (constant index_map) don't need double-buffering.
        w_kw = dict(pipeline_mode=pl.Buffered(1)) if single_buffer_weights else {}
        grid_spec = pltpu.PrefetchScalarGridSpec(
            num_scalar_prefetch=0,
            grid=(M_pad // tile_m,),
            in_specs=[
                pl.BlockSpec((tile_m, K_pad), lambda i: (i, 0)),        # x tile (bf16)
                pl.BlockSpec((K_pad, H), lambda i: (0, 0), **w_kw),     # W1 resident (bf16)
                pl.BlockSpec((1, H), lambda i: (0, 0), **w_kw),         # b1 (f32)
                pl.BlockSpec((H, N_pad), lambda i: (0, 0), **w_kw),     # W2 resident (bf16)
                pl.BlockSpec((1, N_pad), lambda i: (0, 0), **w_kw),     # b2 (f32, lane-padded)
            ],
            out_specs=pl.BlockSpec((tile_m, N_pad), lambda i: (i, 0)),
        )
        return pl.pallas_call(
            kernel,
            out_shape=jax.ShapeDtypeStruct((M_pad, N_pad), jnp.float32),
            grid_spec=grid_spec,
            compiler_params=pltpu.CompilerParams(
                dimension_semantics=("parallel",),       # M axis shards across TCs on v7x
                vmem_limit_bytes=cfg["vmem_limit"],
            ),
            cost_estimate=cost,
        )(x_bf, params.w1, params.b1, params.w2, params.b2)

    try:
        out_pad = _call(single_buffer_weights=True)
    except Exception:
        # Fallback if this JAX version rejects pipeline_mode=pl.Buffered(1) on inputs.
        out_pad = _call(single_buffer_weights=False)

    # Strip row/lane padding, return in the caller's dtype.
    return out_pad[:M, :N].astype(x.dtype)


# ----------------------------------------------------------------------------------
# Deterministic init (mimics nn.Linear's U(-1/sqrt(fan_in), 1/sqrt(fan_in)))
# ----------------------------------------------------------------------------------
def init_params(key, input_frames, n_features, hidden=2048, dtype=jnp.float32):
    in_dim = n_features * input_frames
    k1, k2, k3, k4 = jax.random.split(key, 4)
    lim1 = 1.0 / jnp.sqrt(in_dim)
    lim2 = 1.0 / jnp.sqrt(hidden)
    # Stored as (in, out) == PyTorch weight.T, so forward is x @ W + b.
    w1 = jax.random.uniform(k1, (in_dim, hidden), dtype, -lim1, lim1)
    b1 = jax.random.uniform(k2, (hidden,), dtype, -lim1, lim1)
    w2 = jax.random.uniform(k3, (hidden, n_features), dtype, -lim2, lim2)
    b2 = jax.random.uniform(k4, (n_features,), dtype, -lim2, lim2)
    return w1, b1, w2, b2


if __name__ == "__main__":
    # Small shapes consistent with the module: input_frames=4, n_features=64
    # -> in_dim = 256, hidden = 2048 (fixed by the module), output = 64.
    input_frames = 4
    n_features = 64
    batch = 8

    key = jax.random.PRNGKey(0)
    kx, kp = jax.random.split(key)
    x = jax.random.normal(kx, (batch, n_features * input_frames), dtype=jnp.float32)
    w1, b1, w2, b2 = init_params(kp, input_frames, n_features)

    # One-time weight prep (padding + bf16 cast) hoisted out of the forward call.
    params = prepare_params(w1, b1, w2, b2)

    out = fc_layer_multiframe(x, params)
    out = jax.block_until_ready(out)

    # Pure-JAX f32 reference; tolerance loosened for the bf16 MXU path.
    h_ref = jax.nn.sigmoid(x @ w1 + b1)
    ref = h_ref @ w2 + b2
    assert out.shape == (batch, n_features)
    err = jnp.max(jnp.abs(out - ref))
    tol = 2e-2 + 2e-2 * jnp.max(jnp.abs(ref))
    assert err < tol, f"mismatch vs reference: max_abs_err={err}"

    print("KERNEL_OK")
</pallas_src>

<mosaic_0001>
module attributes {stable_mosaic.version = 11 : i64} {
  func.func @_fc_mlp_kernel(%arg0: i32, %arg1: memref<16x256xbf16, #tpu.memory_space<vmem>>, %arg2: memref<256x2048xbf16, #tpu.memory_space<vmem>>, %arg3: memref<1x2048xf32, #tpu.memory_space<vmem>>, %arg4: memref<2048x128xbf16, #tpu.memory_space<vmem>>, %arg5: memref<1x128xf32, #tpu.memory_space<vmem>>, %arg6: memref<16x128xf32, #tpu.memory_space<vmem>>) attributes {dimension_semantics = [#tpu.dimension_semantics<parallel>], iteration_bounds = array<i64: 1>, scalar_prefetch = 0 : i64, scratch_operands = 0 : i64, tpu.core_type = #tpu.core_type<tc>, window_params = [{transform_indices = @transform_0, window_bounds = array<i64: 16, 256>}, {pipeline_mode = #tpu.pipeline_mode<synchronous>, transform_indices = @transform_1, window_bounds = array<i64: 256, 2048>}, {pipeline_mode = #tpu.pipeline_mode<synchronous>, transform_indices = @transform_2, window_bounds = array<i64: 1, 2048>}, {pipeline_mode = #tpu.pipeline_mode<synchronous>, transform_indices = @transform_3, window_bounds = array<i64: 2048, 128>}, {pipeline_mode = #tpu.pipeline_mode<synchronous>, transform_indices = @transform_4, window_bounds = array<i64: 1, 128>}, {transform_indices = @transform_5, window_bounds = array<i64: 16, 128>}]} {
    %c0 = arith.constant 0 : index
    %c0_0 = arith.constant 0 : index
    %0 = vector.load %arg1[%c0, %c0_0] : memref<16x256xbf16, #tpu.memory_space<vmem>>, vector<16x256xbf16>
    %c0_1 = arith.constant 0 : index
    %c0_2 = arith.constant 0 : index
    %1 = vector.load %arg2[%c0_1, %c0_2] : memref<256x2048xbf16, #tpu.memory_space<vmem>>, vector<256x2048xbf16>
    %cst = arith.constant dense<0.000000e+00> : vector<16x2048xf32>
    %2 = tpu.matmul %0, %1, %cst {dimension_numbers = #tpu.dot_dimension_numbers<[1], [0], [0], [1], [0, 0, 1, 1], [], []>} : vector<16x256xbf16>, vector<256x2048xbf16>, vector<16x2048xf32> -> vector<16x2048xf32>
    %c0_3 = arith.constant 0 : index
    %c0_4 = arith.constant 0 : index
    %3 = vector.load %arg3[%c0_3, %c0_4] : memref<1x2048xf32, #tpu.memory_space<vmem>>, vector<1x2048xf32>
    %4 = vector.broadcast %3 : vector<1x2048xf32> to vector<16x2048xf32>
    %5 = arith.addf %2, %4 : vector<16x2048xf32>
    %cst_5 = arith.constant 5.000000e-01 : f32
    %6 = vector.broadcast %cst_5 : f32 to vector<16x2048xf32>
    %7 = arith.mulf %5, %6 : vector<16x2048xf32>
    %8 = math.tanh %7 : vector<16x2048xf32>
    %cst_6 = arith.constant 5.000000e-01 : f32
    %9 = vector.broadcast %cst_6 : f32 to vector<16x2048xf32>
    %10 = arith.mulf %8, %9 : vector<16x2048xf32>
    %cst_7 = arith.constant 5.000000e-01 : f32
    %11 = vector.broadcast %cst_7 : f32 to vector<16x2048xf32>
    %12 = arith.addf %10, %11 : vector<16x2048xf32>
    %13 = arith.truncf %12 : vector<16x2048xf32> to vector<16x2048xbf16>
    %c0_8 = arith.constant 0 : index
    %c0_9 = arith.constant 0 : index
    %14 = vector.load %arg4[%c0_8, %c0_9] : memref<2048x128xbf16, #tpu.memory_space<vmem>>, vector<2048x128xbf16>
    %cst_10 = arith.constant dense<0.000000e+00> : vector<16x128xf32>
    %15 = tpu.matmul %13, %14, %cst_10 {dimension_numbers = #tpu.dot_dimension_numbers<[1], [0], [0], [1], [0, 0, 1, 1], [], []>} : vector<16x2048xbf16>, vector<2048x128xbf16>, vector<16x128xf32> -> vector<16x128xf32>
    %c0_11 = arith.constant 0 : index
    %c0_12 = arith.constant 0 : index
    %16 = vector.load %arg5[%c0_11, %c0_12] : memref<1x128xf32, #tpu.memory_space<vmem>>, vector<1x128xf32>
    %17 = vector.broadcast %16 : vector<1x128xf32> to vector<16x128xf32>
    %18 = arith.addf %15, %17 : vector<16x128xf32>
    %c0_13 = arith.constant 0 : index
    %c0_14 = arith.constant 0 : index
    %19 = vector.load %arg6[%c0_13, %c0_14] : memref<16x128xf32, #tpu.memory_space<vmem>>, vector<16x128xf32>
    tpu.vector_store %arg6[%c0_13, %c0_14], %18 {strides = array<i32>} : memref<16x128xf32, #tpu.memory_space<vmem>>, vector<16x128xf32>,
    return
  }
  func.func @transform_0(%arg0: i32) -> (i32, i32) {
    %c0_i32 = arith.constant 0 : i32
    %c0_i32_0 = arith.constant 0 : i32
    return %arg0, %c0_i32 : i32, i32
  }
  func.func @transform_1(%arg0: i32) -> (i32, i32) {
    %c0_i32 = arith.constant 0 : i32
    %c0_i32_0 = arith.constant 0 : i32
    %c0_i32_1 = arith.constant 0 : i32
    return %c0_i32, %c0_i32_0 : i32, i32
  }
  func.func @transform_2(%arg0: i32) -> (i32, i32) {
    %c0_i32 = arith.constant 0 : i32
    %c0_i32_0 = arith.constant 0 : i32
    %c0_i32_1 = arith.constant 0 : i32
    return %c0_i32, %c0_i32_0 : i32, i32
  }
  func.func @transform_3(%arg0: i32) -> (i32, i32) {
    %c0_i32 = arith.constant 0 : i32
    %c0_i32_0 = arith.constant 0 : i32
    %c0_i32_1 = arith.constant 0 : i32
    return %c0_i32, %c0_i32_0 : i32, i32
  }
  func.func @transform_4(%arg0: i32) -> (i32, i32) {
    %c0_i32 = arith.constant 0 : i32
    %c0_i32_0 = arith.constant 0 : i32
    %c0_i32_1 = arith.constant 0 : i32
    return %c0_i32, %c0_i32_0 : i32, i32
  }
  func.func @transform_5(%arg0: i32) -> (i32, i32) {
    %c0_i32 = arith.constant 0 : i32
    %c0_i32_0 = arith.constant 0 : i32
    return %arg0, %c0_i32 : i32, i32
  }
}

module attributes {stable_mosaic.version = 11 : i64} {
  func.func @_fc_mlp_kernel(%arg0: i32, %arg1: memref<16x256xbf16, #tpu.memory_space<vmem>>, %arg2: memref<256x2048xbf16, #tpu.memory_space<vmem>>, %arg3: memref<1x2048xf32, #tpu.memory_space<vmem>>, %arg4: memref<2048x128xbf16, #tpu.memory_space<vmem>>, %arg5: memref<1x128xf32, #tpu.memory_space<vmem>>, %arg6: memref<16x128xf32, #tpu.memory_space<vmem>>) attributes {dimension_semantics = [#tpu.dimension_semantics<parallel>], iteration_bounds = array<i64: 1>, scalar_prefetch = 0 : i64, scratch_operands = 0 : i64, tpu.core_type = #tpu.core_type<tc>, window_params = [{transform_indices = @transform_0, window_bounds = array<i64: 16, 256>}, {pipeline_mode = #tpu.pipeline_mode<synchronous>, transform_indices = @transform_1, window_bounds = array<i64: 256, 2048>}, {pipeline_mode = #tpu.pipeline_mode<synchronous>, transform_indices = @transform_2, window_bounds = array<i64: 1, 2048>}, {pipeline_mode = #tpu.pipeline_mode<synchronous>, transform_indices = @transform_3, window_bounds = array<i64: 2048, 128>}, {pipeline_mode = #tpu.pipeline_mode<synchronous>, transform_indices = @transform_4, window_bounds = array<i64: 1, 128>}, {transform_indices = @transform_5, window_bounds = array<i64: 16, 128>}]} {
    %c0 = arith.constant 0 : index
    %c0_0 = arith.constant 0 : index
    %0 = vector.load %arg1[%c0, %c0_0] : memref<16x256xbf16, #tpu.memory_space<vmem>>, vector<16x256xbf16>
    %c0_1 = arith.constant 0 : index
    %c0_2 = arith.constant 0 : index
    %1 = vector.load %arg2[%c0_1, %c0_2] : memref<256x2048xbf16, #tpu.memory_space<vmem>>, vector<256x2048xbf16>
    %cst = arith.constant dense<0.000000e+00> : vector<16x2048xf32>
    %2 = tpu.matmul %0, %1, %cst {dimension_numbers = #tpu.dot_dimension_numbers<[1], [0], [0], [1], [0, 0, 1, 1], [], []>} : vector<16x256xbf16>, vector<256x2048xbf16>, vector<16x2048xf32> -> vector<16x2048xf32>
    %c0_3 = arith.constant 0 : index
    %c0_4 = arith.constant 0 : index
    %3 = vector.load %arg3[%c0_3, %c0_4] : memref<1x2048xf32, #tpu.memory_space<vmem>>, vector<1x2048xf32>
    %4 = vector.broadcast %3 : vector<1x2048xf32> to vector<16x2048xf32>
    %5 = arith.addf %2, %4 : vector<16x2048xf32>
    %cst_5 = arith.constant 5.000000e-01 : f32
    %6 = vector.broadcast %cst_5 : f32 to vector<16x2048xf32>
    %7 = arith.mulf %5, %6 : vector<16x2048xf32>
    %8 = math.tanh %7 : vector<16x2048xf32>
    %cst_6 = arith.constant 5.000000e-01 : f32
    %9 = vector.broadcast %cst_6 : f32 to vector<16x2048xf32>
    %10 = arith.mulf %8, %9 : vector<16x2048xf32>
    %cst_7 = arith.constant 5.000000e-01 : f32
    %11 = vector.broadcast %cst_7 : f32 to vector<16x2048xf32>
    %12 = arith.addf %10, %11 : vector<16x2048xf32>
    %13 = arith.truncf %12 : vector<16x2048xf32> to vector<16x2048xbf16>
    %c0_8 = arith.constant 0 : index
    %c0_9 = arith.constant 0 : index
    %14 = vector.load %arg4[%c0_8, %c0_9] : memref<2048x128xbf16, #tpu.memory_space<vmem>>, vector<2048x128xbf16>
    %cst_10 = arith.constant dense<0.000000e+00> : vector<16x128xf32>
    %15 = tpu.matmul %13, %14, %cst_10 {dimension_numbers = #tpu.dot_dimension_numbers<[1], [0], [0], [1], [0, 0, 1, 1], [], []>} : vector<16x2048xbf16>, vector<2048x128xbf16>, vector<16x128xf32> -> vector<16x128xf32>
    %c0_11 = arith.constant 0 : index
    %c0_12 = arith.constant 0 : index
    %16 = vector.load %arg5[%c0_11, %c0_12] : memref<1x128xf32, #tpu.memory_space<vmem>>, vector<1x128xf32>
    %17 = vector.broadcast %16 : vector<1x128xf32> to vector<16x128xf32>
    %18 = arith.addf %15, %17 : vector<16x128xf32>
    %c0_13 = arith.constant 0 : index
    %c0_14 = arith.constant 0 : index
    %19 = vector.load %arg6[%c0_13, %c0_14] : memref<16x128xf32, #tpu.memory_space<vmem>>, vector<16x128xf32>
    tpu.vector_store %arg6[%c0_13, %c0_14], %18 {strides = array<i32>} : memref<16x128xf32, #tpu.memory_space<vmem>>, vector<16x128xf32>,
    return
  }
  func.func @transform_0(%arg0: i32) -> (i32, i32) {
    %c0_i32 = arith.constant 0 : i32
    %c0_i32_0 = arith.constant 0 : i32
    return %arg0, %c0_i32 : i32, i32
  }
  func.func @transform_1(%arg0: i32) -> (i32, i32) {
    %c0_i32 = arith.constant 0 : i32
    %c0_i32_0 = arith.constant 0 : i32
    %c0_i32_1 = arith.constant 0 : i32
    return %c0_i32, %c0_i32_0 : i32, i32
  }
  func.func @transform_2(%arg0: i32) -> (i32, i32) {
    %c0_i32 = arith.constant 0 : i32
    %c0_i32_0 = arith.constant 0 : i32
    %c0_i32_1 = arith.constant 0 : i32
    return %c0_i32, %c0_i32_0 : i32, i32
  }
  func.func @transform_3(%arg0: i32) -> (i32, i32) {
    %c0_i32 = arith.constant 0 : i32
    %c0_i32_0 = arith.constant 0 : i32
    %c0_i32_1 = arith.constant 0 : i32
    return %c0_i32, %c0_i32_0 : i32, i32
  }
  func.func @transform_4(%arg0: i32) -> (i32, i32) {
    %c0_i32 = arith.constant 0 : i32
    %c0_i32_0 = arith.constant 0 : i32
    %c0_i32_1 = arith.constant 0 : i32
    return %c0_i32, %c0_i32_0 : i32, i32
  }
  func.func @transform_5(%arg0: i32) -> (i32, i32) {
    %c0_i32 = arith.constant 0 : i32
    %c0_i32_0 = arith.constant 0 : i32
    return %arg0, %c0_i32 : i32, i32
  }
}

</mosaic_0001>

<bundles_post_ra>
// kernel: tpu_custom_call.1
= control target key start
LH: loop header
LB: loop body
LE: loop exit
PB: predicated region body
PF: predicated region fallthrough
CT: control target
= control target key end

     0   :  { %10 = vsyncpa [#allocation3], 0  ;;  %s4664_s0 = inlined_call_operand.hbm [shape: bf16[16,256], index: 0, kind: input, shape index: {}]   ;;  %s4665_s1 = inlined_call_operand.hbm [shape: bf16[256,2048], index: 1, kind: input, shape index: {}]   ;;  %s4666_s2 = inlined_call_operand.hbm [shape: f32[1,2048], index: 2, kind: input, shape index: {}]   ;;  %s4667_s3 = inlined_call_operand.hbm [shape: bf16[2048,128], index: 3, kind: input, shape index: {}]   ;;  %s4668_s4 = inlined_call_operand.vmem [shape: f32[1,128], index: 4, kind: input, shape index: {}]   ;;  %s4669_s5 = inlined_call_operand.hbm [shape: f32[16,128], index: 5, kind: output, shape index: {}]  }
   0x1   :  { %11 = vsyncpa [#allocation6], 0 }
   0x2   :  { %12 = vsyncpa [#allocation9], 0 }
   0x3   :  { %13 = vsyncpa [#allocation4], 0  ;;  %s4463_s18 = smov [#allocation5]   ;;  %s4345_s22 = scalar_lea.hbm %s4665_s1, 32768 }
   0x4   :  { %s31_s19 = sshll.u32 %s4463_s18, 4  ;;  %p4346_p0 = scmp.ne.s32.totalorder %s4665_s1, %s4345_s22  ;;  %s32_s19 = int_to_ptr.vmem [resolvable:$true] %s31_s19 }
   0x5   :  { %p4349_p1 = scmp.lt.u32.totalorder %s4345_s22, %s4665_s1 }
   0x7   :  { %p4351_p2 = pnand %p4349_p1, %p4346_p0 }
   0x9   :  { %4354 = shalt.err (!%p4351_p2)
}
   0xa   :  { %s4355_s27 = scalar_lea.vmem %s32_s19, 32768  ;;  %p4360_p4 = scmp.lt.s32.totalorder %s32_s19, %s32_s19 }
   0xb   :  { %p4356_p3 = scmp.ne.s32.totalorder %s32_s19, %s4355_s27  ;;  %p4361_p5 = scmp.lt.s32.totalorder %s4355_s27, %s4355_s27 }
   0xd   :  { %p4362_p6 = por %p4361_p5, %p4360_p4 }
   0xf   :  { %p4363_p7 = pnand %p4362_p6, %p4356_p3 }
  0x11   :  { %4366 = shalt.err (!%p4363_p7)
}
  0x12   :  { %s4464_s28 = smov 1024   ;;  %s4465_s29 = smov 64  }
  0x13   :  { %37 = dma.hbm_to_vmem [thread:$0]  %s4665_s1, 32768, %s32_s19, [#allocation6], %s4464_s28, %s4464_s28, %s4465_s29  }
  0x14   :  { %s4466_s7 = smov [#allocation2]   ;;  %s4367_s11 = scalar_lea.hbm %s4664_s0, 256 }
  0x15   :  { %s19_s8 = sshll.u32 %s4466_s7, 4  ;;  %p4368_p8 = scmp.ne.s32.totalorder %s4664_s0, %s4367_s11  ;;  %s20_s8 = int_to_ptr.vmem [resolvable:$true] %s19_s8 }
  0x16   :  { %p4371_p9 = scmp.lt.u32.totalorder %s4367_s11, %s4664_s0 }
  0x18   :  { %p4373_p10 = pnand %p4371_p9, %p4368_p8 }
  0x1a   :  { %4376 = shalt.err (!%p4373_p10)
}
  0x1b   :  { %s4377_s16 = scalar_lea.vmem %s20_s8, 256  ;;  %p4382_p12 = scmp.lt.s32.totalorder %s20_s8, %s20_s8 }
  0x1c   :  { %p4378_p11 = scmp.ne.s32.totalorder %s20_s8, %s4377_s16  ;;  %p4383_p13 = scmp.lt.s32.totalorder %s4377_s16, %s4377_s16 }
  0x1e   :  { %p4384_p0 = por %p4383_p13, %p4382_p12 }
  0x20   :  { %p4385_p1 = pnand %p4384_p0, %p4378_p11 }
  0x22   :  { %4388 = shalt.err (!%p4385_p1)
}
  0x23   :  { %s4467_s1 = smov 128   ;;  %s4468_s17 = smov 8  }
  0x24   :  { %25 = dma.hbm_to_vmem [thread:$0]  %s4664_s0, 256, %s20_s8, [#allocation3], %s4467_s1, %s4467_s1, %s4468_s17  }
  0x25   :  { %s4469_s20 = smov [#allocation7]   ;;  %s4470_s22 = smov [#allocation8]  }
  0x26   :  { %s44_s21 = sshll.u32 %s4469_s20, 4  ;;  %s53_s23 = sshll.u32 %s4470_s22, 4  ;;  %s45_s21 = int_to_ptr.vmem [resolvable:$true] %s44_s21  ;;  %s4531_s23 = int_to_ptr.vmem [resolvable:$true] %s53_s23 }
  0x27   :  { %s4389_s26 = scalar_lea.hbm %s4666_s2, 256 }
  0x28   :  { %p4390_p2 = scmp.ne.s32.totalorder %s4666_s2, %s4389_s26  ;;  %p4393_p3 = scmp.lt.u32.totalorder %s4389_s26, %s4666_s2 }
  0x2a   :  { %p4395_p4 = pnand %p4393_p3, %p4390_p2 }
  0x2c   :  { %4398 = shalt.err (!%p4395_p4)
}
  0x2d   :  { %s4399_s0 = scalar_lea.vmem %s45_s21, 256  ;;  %p4404_p6 = scmp.lt.s32.totalorder %s45_s21, %s45_s21 }
  0x2e   :  { %p4400_p5 = scmp.ne.s32.totalorder %s45_s21, %s4399_s0  ;;  %p4405_p7 = scmp.lt.s32.totalorder %s4399_s0, %s4399_s0 }
  0x30   :  { %p4406_p8 = por %p4405_p7, %p4404_p6 }
  0x32   :  { %p4407_p9 = pnand %p4406_p8, %p4400_p5 }
  0x34   :  { %4410 = shalt.err (!%p4407_p9)
}
  0x35   :  { %47 = dma.hbm_to_vmem [thread:$0]  %s4666_s2, 256, %s45_s21, [#allocation6]  }
  0x36   :  { %s4411_s11 = scalar_lea.hbm %s4667_s3, 16384 }
  0x37   :  { %p4412_p10 = scmp.ne.s32.totalorder %s4667_s3, %s4411_s11  ;;  %p4415_p11 = scmp.lt.u32.totalorder %s4411_s11, %s4667_s3 }
  0x39   :  { %p4417_p12 = pnand %p4415_p11, %p4412_p10 }
  0x3b   :  { %4420 = shalt.err (!%p4417_p12)
}
  0x3c   :  { %s4421_s16 = scalar_lea.vmem %s4531_s23, 16384  ;;  %p4426_p0 = scmp.lt.s32.totalorder %s4531_s23, %s4531_s23 }
  0x3d   :  { %p4422_p13 = scmp.ne.s32.totalorder %s4531_s23, %s4421_s16  ;;  %p4427_p1 = scmp.lt.s32.totalorder %s4421_s16, %s4421_s16 }
  0x3f   :  { %p4428_p2 = por %p4427_p1, %p4426_p0 }
  0x41   :  { %p4429_p3 = pnand %p4428_p2, %p4422_p13 }
  0x43   :  { %4432 = shalt.err (!%p4429_p3)
}
  0x44   :  { %s4471_s2 = smov 4  }
  0x45   :  { %59 = dma.hbm_to_vmem [thread:$0]  %s4667_s3, 16384, %s4531_s23, [#allocation9], %s4465_s29, %s4465_s29, %s4471_s2  }
  0x46   :  { %4455 = dma.done.wait [#allocation3], 256  }
  0x47   :  { %4456 = vsyncadd [#allocation3], 4294967040 }
  0x48   :  { %4457 = dma.done.wait [#allocation6], 33024  }
  0x49   :  { %4458 = vsyncadd [#allocation6], 4294934272 }
  0x4a   :  { %4459 = dma.done.wait [#allocation9], 16384  }
  0x4b   :  { %4460 = vsyncadd [#allocation9], 4294950912  ;;  %v77_v0 = vld [vmem:[#allocation5] sm:$0xff]  ;;  %v78_v2 = vld [vmem:[#allocation5 + $0x8] sm:$0xff] }
  0x4c   :  { %v85_v1 = vld [vmem:[#allocation5 + $0x40] sm:$0xff]  ;;  %v86_v4 = vld [vmem:[#allocation5 + $0x48] sm:$0xff]  ;;  %v4564_v56 = vld [vmem:[#allocation2 + $0x4] ss:$8 sps:$4 sm:$0xff]  }
  0x4d   :  { %v3578_v3 = vcombine.high %v77_v0, %v85_v1  ;;  %v3577_v5 = vcombine.low %v77_v0, %v85_v1  ;;  %v93_v6 = vld [vmem:[#allocation5 + $0x80] sm:$0xff]  ;;  %v3580_v8 = vcombine.high %v78_v2, %v86_v4  ;;  %v3579_v9 = vcombine.low %v78_v2, %v86_v4  ;;  %v94_v11 = vld [vmem:[#allocation5 + $0x88] sm:$0xff]  ;;  %1739 = vmatprep.mubr.bf16.mxu0 %v4564_v56 }
  0x4e   :  { %v101_v7 = vld [vmem:[#allocation5 + $0xc0] sm:$0xff]  ;;  %v102_v12 = vld [vmem:[#allocation5 + $0xc8] sm:$0xff]  ;;  %1782 = vmatprep.mubr.bf16.mxu1 %v4564_v56 }
  0x4f   :  { %v3594_v10 = vcombine.high %v93_v6, %v101_v7  ;;  %v109_v13 = vld [vmem:[#allocation5 + $0x100] sm:$0xff]  ;;  %1707 = vmatprep.subr.bf16.mxu0 %v3578_v3  ;;  %v3596_v14 = vcombine.high %v94_v11, %v102_v12  ;;  %v110_v16 = vld [vmem:[#allocation5 + $0x108] sm:$0xff]  ;;  %1750 = vmatprep.subr.bf16.mxu1 %v3580_v8  ;;  %v3593_v18 = vcombine.low %v93_v6, %v101_v7 }
  0x50   :  { %v117_v15 = vld [vmem:[#allocation5 + $0x140] sm:$0xff]  ;;  %v118_v17 = vld [vmem:[#allocation5 + $0x148] sm:$0xff]  ;;  %1708 = vmatpush1.bf16.msra.mxu0 %v3577_v5  ;;  %1751 = vmatpush1.bf16.msra.mxu1 %v3579_v9  ;;  %v3595_v19 = vcombine.low %v94_v11, %v102_v12 }
  0x51   :  { %1709 = vmatprep.subr.bf16.mxu0 %v3594_v10  ;;  %v3610_v20 = vcombine.high %v109_v13, %v117_v15  ;;  %1752 = vmatprep.subr.bf16.mxu1 %v3596_v14  ;;  %v3612_v21 = vcombine.high %v110_v16, %v118_v17  ;;  %v125_v22 = vld [vmem:[#allocation5 + $0x180] sm:$0xff]  ;;  %v126_v24 = vld [vmem:[#allocation5 + $0x188] sm:$0xff]  ;;  %v3609_v26 = vcombine.low %v109_v13, %v117_v15 }
  0x52   :  { %v133_v23 = vld [vmem:[#allocation5 + $0x1c0] sm:$0xff]  ;;  %v134_v25 = vld [vmem:[#allocation5 + $0x1c8] sm:$0xff]  ;;  %v3611_v27 = vcombine.low %v110_v16, %v118_v17 }
  0x53   :  { %v3626_v28 = vcombine.high %v125_v22, %v133_v23  ;;  %v3628_v29 = vcombine.high %v126_v24, %v134_v25  ;;  %v141_v30 = vld [vmem:[#allocation5 + $0x200] sm:$0xff]  ;;  %v142_v32 = vld [vmem:[#allocation5 + $0x208] sm:$0xff]  ;;  %v3625_v34 = vcombine.low %v125_v22, %v133_v23  ;;  %v3627_v35 = vcombine.low %v126_v24, %v134_v25 }
  0x54   :  { %1710 = vmatpush1.bf16.msra.mxu0 %v3593_v18  ;;  %1753 = vmatpush1.bf16.msra.mxu1 %v3595_v19  ;;  %v149_v31 = vld [vmem:[#allocation5 + $0x240] sm:$0xff]  ;;  %v150_v33 = vld [vmem:[#allocation5 + $0x248] sm:$0xff] }
  0x55   :  { %1711 = vmatprep.subr.bf16.mxu0 %v3610_v20  ;;  %1754 = vmatprep.subr.bf16.mxu1 %v3612_v21  ;;  %v3642_v36 = vcombine.high %v141_v30, %v149_v31  ;;  %v3644_v37 = vcombine.high %v142_v32, %v150_v33  ;;  %v157_v38 = vld [vmem:[#allocation5 + $0x280] sm:$0xff]  ;;  %v158_v40 = vld [vmem:[#allocation5 + $0x288] sm:$0xff]  ;;  %v3641_v42 = vcombine.low %v141_v30, %v149_v31 }
  0x56   :  { %v165_v39 = vld [vmem:[#allocation5 + $0x2c0] sm:$0xff]  ;;  %v166_v41 = vld [vmem:[#allocation5 + $0x2c8] sm:$0xff]  ;;  %v3643_v43 = vcombine.low %v142_v32, %v150_v33 }
  0x57   :  { %v3658_v44 = vcombine.high %v157_v38, %v165_v39  ;;  %v3660_v45 = vcombine.high %v158_v40, %v166_v41  ;;  %v173_v46 = vld [vmem:[#allocation5 + $0x300] sm:$0xff]  ;;  %v174_v48 = vld [vmem:[#allocation5 + $0x308] sm:$0xff]  ;;  %v3657_v50 = vcombine.low %v157_v38, %v165_v39  ;;  %v3659_v51 = vcombine.low %v158_v40, %v166_v41 }
  0x58   :  { %1712 = vmatpush1.bf16.msra.mxu0 %v3609_v26  ;;  %1755 = vmatpush1.bf16.msra.mxu1 %v3611_v27  ;;  %v181_v47 = vld [vmem:[#allocation5 + $0x340] sm:$0xff]  ;;  %v182_v49 = vld [vmem:[#allocation5 + $0x348] sm:$0xff] }
  0x59   :  { %1713 = vmatprep.subr.bf16.mxu0 %v3626_v28  ;;  %1756 = vmatprep.subr.bf16.mxu1 %v3628_v29  ;;  %v3674_v52 = vcombine.high %v173_v46, %v181_v47  ;;  %v3676_v53 = vcombine.high %v174_v48, %v182_v49  ;;  %v189_v54 = vld [vmem:[#allocation5 + $0x380] sm:$0xff]  ;;  %v190_v57 = vld [vmem:[#allocation5 + $0x388] sm:$0xff]  ;;  %v3673_v59 = vcombine.low %v173_v46, %v181_v47 }
  0x5a   :  { %v197_v55 = vld [vmem:[#allocation5 + $0x3c0] sm:$0xff]  ;;  %v198_v58 = vld [vmem:[#allocation5 + $0x3c8] sm:$0xff]  ;;  %v3675_v60 = vcombine.low %v174_v48, %v182_v49 }
  0x5b   :  { %v3690_v61 = vcombine.high %v189_v54, %v197_v55  ;;  %v3692_v62 = vcombine.high %v190_v57, %v198_v58  ;;  %v205_v63 = vld [vmem:[#allocation5 + $0x400] sm:$0xff]  ;;  %v206_v1 = vld [vmem:[#allocation5 + $0x408] sm:$0xff]  ;;  %v3689_v3 = vcombine.low %v189_v54, %v197_v55  ;;  %v3691_v4 = vcombine.low %v190_v57, %v198_v58 }
  0x5c   :  { %1714 = vmatpush1.bf16.msra.mxu0 %v3625_v34  ;;  %1757 = vmatpush1.bf16.msra.mxu1 %v3627_v35  ;;  %v213_v0 = vld [vmem:[#allocation5 + $0x440] sm:$0xff]  ;;  %v214_v2 = vld [vmem:[#allocation5 + $0x448] sm:$0xff] }
  0x5d   :  { %1715 = vmatprep.subr.bf16.mxu0 %v3642_v36  ;;  %1758 = vmatprep.subr.bf16.mxu1 %v3644_v37  ;;  %v3706_v5 = vcombine.high %v205_v63, %v213_v0  ;;  %v3708_v6 = vcombine.high %v206_v1, %v214_v2  ;;  %v221_v7 = vld [vmem:[#allocation5 + $0x480] sm:$0xff]  ;;  %v222_v9 = vld [vmem:[#allocation5 + $0x488] sm:$0xff]  ;;  %v3705_v11 = vcombine.low %v205_v63, %v213_v0  ;;  %v79_v0 = vld [vmem:[#allocation5 + $0x10] sm:$0xff] }
  0x5e   :  { %v229_v8 = vld [vmem:[#allocation5 + $0x4c0] sm:$0xff]  ;;  %v230_v10 = vld [vmem:[#allocation5 + $0x4c8] sm:$0xff]  ;;  %v3707_v12 = vcombine.low %v206_v1, %v214_v2  ;;  %v87_v1 = vld [vmem:[#allocation5 + $0x50] sm:$0xff] }
  0x5f   :  { %v3722_v13 = vcombine.high %v221_v7, %v229_v8  ;;  %v3724_v14 = vcombine.high %v222_v9, %v230_v10  ;;  %v237_v15 = vld [vmem:[#allocation5 + $0x500] sm:$0xff]  ;;  %v238_v17 = vld [vmem:[#allocation5 + $0x508] sm:$0xff]  ;;  %v3721_v19 = vcombine.low %v221_v7, %v229_v8  ;;  %v3723_v20 = vcombine.low %v222_v9, %v230_v10  ;;  %v80_v2 = vld [vmem:[#allocation5 + $0x18] sm:$0xff] }
  0x60   :  { %1716 = vmatpush1.bf16.msra.mxu0 %v3641_v42  ;;  %1759 = vmatpush1.bf16.msra.mxu1 %v3643_v43  ;;  %v245_v16 = vld [vmem:[#allocation5 + $0x540] sm:$0xff]  ;;  %v246_v18 = vld [vmem:[#allocation5 + $0x548] sm:$0xff]  ;;  %v95_v8 = vld [vmem:[#allocation5 + $0x90] sm:$0xff] }
  0x61   :  { %1717 = vmatprep.subr.bf16.mxu0 %v3658_v44  ;;  %1760 = vmatprep.subr.bf16.mxu1 %v3660_v45  ;;  %v3738_v21 = vcombine.high %v237_v15, %v245_v16  ;;  %v3740_v22 = vcombine.high %v238_v17, %v246_v18  ;;  %v253_v23 = vld [vmem:[#allocation5 + $0x580] sm:$0xff]  ;;  %v254_v25 = vld [vmem:[#allocation5 + $0x588] sm:$0xff]  ;;  %v3737_v27 = vcombine.low %v237_v15, %v245_v16  ;;  %v103_v9 = vld [vmem:[#allocation5 + $0xd0] sm:$0xff] }
  0x62   :  { %v261_v24 = vld [vmem:[#allocation5 + $0x5c0] sm:$0xff]  ;;  %v262_v26 = vld [vmem:[#allocation5 + $0x5c8] sm:$0xff]  ;;  %v3739_v28 = vcombine.low %v238_v17, %v246_v18  ;;  %v4568_v10 = vld [vmem:[#allocation2] ss:$8 sps:$4 sm:$0xff]   ;;  %v3598_v15 = vcombine.high %v95_v8, %v103_v9 }
  0x63   :  { %v3754_v29 = vcombine.high %v253_v23, %v261_v24  ;;  %v3756_v30 = vcombine.high %v254_v25, %v262_v26  ;;  %v269_v31 = vld [vmem:[#allocation5 + $0x600] sm:$0xff]  ;;  %v270_v33 = vld [vmem:[#allocation5 + $0x608] sm:$0xff]  ;;  %v3753_v35 = vcombine.low %v253_v23, %v261_v24  ;;  %v3755_v36 = vcombine.low %v254_v25, %v262_v26  ;;  %v111_v16 = vld [vmem:[#allocation5 + $0x110] sm:$0xff] }
  0x64   :  { %1718 = vmatpush1.bf16.msra.mxu0 %v3657_v50  ;;  %1761 = vmatpush1.bf16.msra.mxu1 %v3659_v51  ;;  %v277_v32 = vld [vmem:[#allocation5 + $0x640] sm:$0xff]  ;;  %v278_v34 = vld [vmem:[#allocation5 + $0x648] sm:$0xff]  ;;  %v119_v17 = vld [vmem:[#allocation5 + $0x150] sm:$0xff] }
  0x65   :  { %1719 = vmatprep.subr.bf16.mxu0 %v3674_v52  ;;  %1762 = vmatprep.subr.bf16.mxu1 %v3676_v53  ;;  %v3770_v37 = vcombine.high %v269_v31, %v277_v32  ;;  %v3772_v38 = vcombine.high %v270_v33, %v278_v34  ;;  %v285_v39 = vld [vmem:[#allocation5 + $0x680] sm:$0xff]  ;;  %v286_v41 = vld [vmem:[#allocation5 + $0x688] sm:$0xff]  ;;  %v3769_v43 = vcombine.low %v269_v31, %v277_v32  ;;  %v127_v24 = vld [vmem:[#allocation5 + $0x190] sm:$0xff] }
  0x66   :  { %v293_v40 = vld [vmem:[#allocation5 + $0x6c0] sm:$0xff]  ;;  %v294_v42 = vld [vmem:[#allocation5 + $0x6c8] sm:$0xff]  ;;  %v3771_v44 = vcombine.low %v270_v33, %v278_v34  ;;  %v3614_v23 = vcombine.high %v111_v16, %v119_v17  ;;  %v135_v25 = vld [vmem:[#allocation5 + $0x1d0] sm:$0xff] }
  0x67   :  { %v3786_v45 = vcombine.high %v285_v39, %v293_v40  ;;  %v3788_v46 = vcombine.high %v286_v41, %v294_v42  ;;  %v301_v47 = vld [vmem:[#allocation5 + $0x700] sm:$0xff]  ;;  %v302_v49 = vld [vmem:[#allocation5 + $0x708] sm:$0xff]  ;;  %v3785_v51 = vcombine.low %v285_v39, %v293_v40  ;;  %v3787_v52 = vcombine.low %v286_v41, %v294_v42  ;;  %v128_v26 = vld [vmem:[#allocation5 + $0x198] sm:$0xff] }
  0x68   :  { %1720 = vmatpush1.bf16.msra.mxu0 %v3673_v59  ;;  %1763 = vmatpush1.bf16.msra.mxu1 %v3675_v60  ;;  %v309_v48 = vld [vmem:[#allocation5 + $0x740] sm:$0xff]  ;;  %v310_v50 = vld [vmem:[#allocation5 + $0x748] sm:$0xff]  ;;  %v3630_v31 = vcombine.high %v127_v24, %v135_v25  ;;  %v143_v32 = vld [vmem:[#allocation5 + $0x210] sm:$0xff] }
  0x69   :  { %1721 = vmatprep.subr.bf16.mxu0 %v3690_v61  ;;  %1764 = vmatprep.subr.bf16.mxu1 %v3692_v62  ;;  %v3802_v53 = vcombine.high %v301_v47, %v309_v48  ;;  %v3804_v54 = vcombine.high %v302_v49, %v310_v50  ;;  %v317_v55 = vld [vmem:[#allocation5 + $0x780] sm:$0xff]  ;;  %v318_v58 = vld [vmem:[#allocation5 + $0x788] sm:$0xff]  ;;  %v3801_v60 = vcombine.low %v301_v47, %v309_v48  ;;  %v151_v33 = vld [vmem:[#allocation5 + $0x250] sm:$0xff] }
  0x6a   :  { %v325_v57 = vld [vmem:[#allocation5 + $0x7c0] sm:$0xff]  ;;  %v326_v59 = vld [vmem:[#allocation5 + $0x7c8] sm:$0xff]  ;;  %v3803_v61 = vcombine.low %v302_v49, %v310_v50  ;;  %v144_v34 = vld [vmem:[#allocation5 + $0x218] sm:$0xff]  ;;  %v3646_v39 = vcombine.high %v143_v32, %v151_v33 }
  0x6b   :  { %v3818_v62 = vcombine.high %v317_v55, %v325_v57  ;;  %v3820_v63 = vcombine.high %v318_v58, %v326_v59  ;;  %v159_v40 = vld [vmem:[#allocation5 + $0x290] sm:$0xff]  ;;  %v160_v42 = vld [vmem:[#allocation5 + $0x298] sm:$0xff] }
  0x6c   :  { %1722 = vmatpush1.bf16.msra.mxu0 %v3689_v3  ;;  %1765 = vmatpush1.bf16.msra.mxu1 %v3691_v4  ;;  %v88_v3 = vld [vmem:[#allocation5 + $0x58] sm:$0xff]  ;;  %v3817_v4 = vcombine.low %v317_v55, %v325_v57  ;;  %v167_v41 = vld [vmem:[#allocation5 + $0x2d0] sm:$0xff] }
  0x6d   :  { %1723 = vmatprep.subr.bf16.mxu0 %v3706_v5  ;;  %1766 = vmatprep.subr.bf16.mxu1 %v3708_v6  ;;  %v3819_v5 = vcombine.low %v318_v58, %v326_v59  ;;  %v3582_v6 = vcombine.high %v79_v0, %v87_v1  ;;  %v3584_v7 = vcombine.high %v80_v2, %v88_v3  ;;  %v175_v48 = vld [vmem:[#allocation5 + $0x310] sm:$0xff]  ;;  %v176_v50 = vld [vmem:[#allocation5 + $0x318] sm:$0xff] }
  0x6e   :  { %v3662_v47 = vcombine.high %v159_v40, %v167_v41  ;;  %v183_v49 = vld [vmem:[#allocation5 + $0x350] sm:$0xff]  ;;  %v192_v59 = vld [vmem:[#allocation5 + $0x398] sm:$0xff] }
  0x6f   :  { %v3678_v55 = vcombine.high %v175_v48, %v183_v49  ;;  %v191_v57 = vld [vmem:[#allocation5 + $0x390] sm:$0xff] }
  0x70   :  { %1724 = vmatpush1.bf16.msra.mxu0 %v3705_v11  ;;  %1767 = vmatpush1.bf16.msra.mxu1 %v3707_v12  ;;  %v96_v11 = vld [vmem:[#allocation5 + $0x98] sm:$0xff]  ;;  %v199_v58 = vld [vmem:[#allocation5 + $0x3d0] sm:$0xff] }
  0x71   :  { %1725 = vmatprep.subr.bf16.mxu0 %v3722_v13  ;;  %1768 = vmatprep.subr.bf16.mxu1 %v3724_v14  ;;  %v104_v12 = vld [vmem:[#allocation5 + $0xd8] sm:$0xff]  ;;  %v3581_v13 = vcombine.low %v79_v0, %v87_v1  ;;  %v3583_v14 = vcombine.low %v80_v2, %v88_v3  ;;  %v3694_v0 = vcombine.high %v191_v57, %v199_v58  ;;  %v207_v1 = vld [vmem:[#allocation5 + $0x410] sm:$0xff] }
  0x72   :  { %v3600_v18 = vcombine.high %v96_v11, %v104_v12  ;;  %v215_v2 = vld [vmem:[#allocation5 + $0x450] sm:$0xff]  ;;  %v208_v3 = vld [vmem:[#allocation5 + $0x418] sm:$0xff] }
  0x74   :  { %1726 = vmatpush1.bf16.msra.mxu0 %v3721_v19  ;;  %1769 = vmatpush1.bf16.msra.mxu1 %v3723_v20  ;;  %v112_v19 = vld [vmem:[#allocation5 + $0x118] sm:$0xff] }
  0x75   :  { %1727 = vmatprep.subr.bf16.mxu0 %v3738_v21  ;;  %1770 = vmatprep.subr.bf16.mxu1 %v3740_v22  ;;  %v120_v20 = vld [vmem:[#allocation5 + $0x158] sm:$0xff]  ;;  %v3597_v21 = vcombine.low %v95_v8, %v103_v9  ;;  %v3599_v22 = vcombine.low %v96_v11, %v104_v12  ;;  %v3710_v8 = vcombine.high %v207_v1, %v215_v2  ;;  %v223_v9 = vld [vmem:[#allocation5 + $0x490] sm:$0xff] }
  0x76   :  { %v231_v11 = vld [vmem:[#allocation5 + $0x4d0] sm:$0xff]  ;;  %v224_v12 = vld [vmem:[#allocation5 + $0x498] sm:$0xff] }
  0x78   :  { %1728 = vmatpush1.bf16.msra.mxu0 %v3737_v27  ;;  %1771 = vmatpush1.bf16.msra.mxu1 %v3739_v28  ;;  %v3616_v27 = vcombine.high %v112_v19, %v120_v20  ;;  %v136_v28 = vld [vmem:[#allocation5 + $0x1d8] sm:$0xff] }
  0x79   :  { %1729 = vmatprep.subr.bf16.mxu0 %v3754_v29  ;;  %1772 = vmatprep.subr.bf16.mxu1 %v3756_v30  ;;  %v3613_v29 = vcombine.low %v111_v16, %v119_v17  ;;  %v3615_v30 = vcombine.low %v112_v19, %v120_v20  ;;  %v3726_v17 = vcombine.high %v223_v9, %v231_v11  ;;  %v247_v19 = vld [vmem:[#allocation5 + $0x550] sm:$0xff]  ;;  %v240_v20 = vld [vmem:[#allocation5 + $0x518] sm:$0xff] }
  0x7c   :  { %1730 = vmatpush1.bf16.msra.mxu0 %v3753_v35  ;;  %1773 = vmatpush1.bf16.msra.mxu1 %v3755_v36  ;;  %v3632_v35 = vcombine.high %v128_v26, %v136_v28  ;;  %v152_v36 = vld [vmem:[#allocation5 + $0x258] sm:$0xff] }
  0x7d   :  { %1731 = vmatprep.subr.bf16.mxu0 %v3770_v37  ;;  %1774 = vmatprep.subr.bf16.mxu1 %v3772_v38  ;;  %v3629_v37 = vcombine.low %v127_v24, %v135_v25  ;;  %v3631_v38 = vcombine.low %v128_v26, %v136_v28  ;;  %v255_v26 = vld [vmem:[#allocation5 + $0x590] sm:$0xff]  ;;  %v256_v28 = vld [vmem:[#allocation5 + $0x598] sm:$0xff] }
  0x80   :  { %1732 = vmatpush1.bf16.msra.mxu0 %v3769_v43  ;;  %1775 = vmatpush1.bf16.msra.mxu1 %v3771_v44  ;;  %v3648_v43 = vcombine.high %v144_v34, %v152_v36  ;;  %v168_v44 = vld [vmem:[#allocation5 + $0x2d8] sm:$0xff] }
  0x81   :  { %1733 = vmatprep.subr.bf16.mxu0 %v3786_v45  ;;  %1776 = vmatprep.subr.bf16.mxu1 %v3788_v46  ;;  %v3645_v45 = vcombine.low %v143_v32, %v151_v33  ;;  %v3647_v46 = vcombine.low %v144_v34, %v152_v36  ;;  %v271_v34 = vld [vmem:[#allocation5 + $0x610] sm:$0xff]  ;;  %v272_v36 = vld [vmem:[#allocation5 + $0x618] sm:$0xff] }
  0x84   :  { %1734 = vmatpush1.bf16.msra.mxu0 %v3785_v51  ;;  %1777 = vmatpush1.bf16.msra.mxu1 %v3787_v52  ;;  %v3664_v51 = vcombine.high %v160_v42, %v168_v44  ;;  %v184_v52 = vld [vmem:[#allocation5 + $0x358] sm:$0xff] }
  0x85   :  { %1735 = vmatprep.subr.bf16.mxu0 %v3802_v53  ;;  %1778 = vmatprep.subr.bf16.mxu1 %v3804_v54  ;;  %v3661_v53 = vcombine.low %v159_v40, %v167_v41  ;;  %v3663_v54 = vcombine.low %v160_v42, %v168_v44  ;;  %v287_v42 = vld [vmem:[#allocation5 + $0x690] sm:$0xff]  ;;  %v288_v44 = vld [vmem:[#allocation5 + $0x698] sm:$0xff] }
  0x88   :  { %1736 = vmatpush1.bf16.msra.mxu0 %v3801_v60  ;;  %1779 = vmatpush1.bf16.msra.mxu1 %v3803_v61  ;;  %v3680_v60 = vcombine.high %v176_v50, %v184_v52  ;;  %v200_v61 = vld [vmem:[#allocation5 + $0x3d8] sm:$0xff] }
  0x89   :  { %1737 = vmatprep.subr.bf16.mxu0 %v3818_v62  ;;  %1780 = vmatprep.subr.bf16.mxu1 %v3820_v63  ;;  %v3677_v62 = vcombine.low %v175_v48, %v183_v49  ;;  %v3679_v63 = vcombine.low %v176_v50, %v184_v52  ;;  %v303_v50 = vld [vmem:[#allocation5 + $0x710] sm:$0xff]  ;;  %v304_v52 = vld [vmem:[#allocation5 + $0x718] sm:$0xff] }
  0x8c   :  { %1738 = vmatpush1.bf16.msra.mxu0 %v3817_v4  ;;  %1781 = vmatpush1.bf16.msra.mxu1 %v3819_v5  ;;  %v3696_v4 = vcombine.high %v192_v59, %v200_v61  ;;  %v216_v5 = vld [vmem:[#allocation5 + $0x458] sm:$0xff] }
  0x8d   :  { %1793 = vmatprep.subr.bf16.mxu0 %v3582_v6  ;;  %1836 = vmatprep.subr.bf16.mxu1 %v3584_v7  ;;  %v3693_v6 = vcombine.low %v191_v57, %v199_v58  ;;  %v3695_v7 = vcombine.low %v192_v59, %v200_v61  ;;  %v3711_v16 = vcombine.low %v208_v3, %v216_v5  ;;  %v319_v59 = vld [vmem:[#allocation5 + $0x790] sm:$0xff]  ;;  %v320_v61 = vld [vmem:[#allocation5 + $0x798] sm:$0xff] }
  0x8f   :  { %1740 = vmatmul.mubr.bf16.vlgmr.msra.gmra.mrb[0].mxu0 %v4568_v10  ;;  %1783 = vmatmul.mubr.bf16.vlgmr.msra.gmra.mrb[0].mxu1 %v4568_v10 }
  0x90   :  { %1794 = vmatpush1.bf16.msra.mxu0 %v3581_v13  ;;  %1837 = vmatpush1.bf16.msra.mxu1 %v3583_v14  ;;  %v3712_v13 = vcombine.high %v208_v3, %v216_v5  ;;  %v232_v14 = vld [vmem:[#allocation5 + $0x4d8] sm:$0xff]  ;;  %v81_v3 = vld [vmem:[#allocation5 + $0x20] sm:$0xff]  ;;  %v82_v5 = vld [vmem:[#allocation5 + $0x28] sm:$0xff] }
  0x91   :  { %1795 = vmatprep.subr.bf16.mxu0 %v3598_v15  ;;  %1838 = vmatprep.subr.bf16.mxu1 %v3600_v18  ;;  %v3709_v15 = vcombine.low %v207_v1, %v215_v2  ;;  %v239_v18 = vld [vmem:[#allocation5 + $0x510] sm:$0xff]  ;;  %v3727_v24 = vcombine.low %v224_v12, %v232_v14 }
  0x92   :  { %1825 = vmatprep.mubr.bf16.mxu0 %v4564_v56  ;;  %1868 = vmatprep.mubr.bf16.mxu1 %v4564_v56  ;;  %v3742_v25 = vcombine.high %v239_v18, %v247_v19 }
  0x94   :  { %1796 = vmatpush1.bf16.msra.mxu0 %v3597_v21  ;;  %1839 = vmatpush1.bf16.msra.mxu1 %v3599_v22  ;;  %v3728_v21 = vcombine.high %v224_v12, %v232_v14  ;;  %v248_v22 = vld [vmem:[#allocation5 + $0x558] sm:$0xff]  ;;  %v97_v12 = vld [vmem:[#allocation5 + $0xa0] sm:$0xff]  ;;  %v98_v14 = vld [vmem:[#allocation5 + $0xa8] sm:$0xff] }
  0x95   :  { %1797 = vmatprep.subr.bf16.mxu0 %v3614_v23  ;;  %1840 = vmatprep.subr.bf16.mxu1 %v3616_v27  ;;  %v3725_v23 = vcombine.low %v223_v9, %v231_v11  ;;  %v263_v27 = vld [vmem:[#allocation5 + $0x5d0] sm:$0xff]  ;;  %v3743_v32 = vcombine.low %v240_v20, %v248_v22 }
  0x96   :  { %v3758_v33 = vcombine.high %v255_v26, %v263_v27 }
  0x98   :  { %1798 = vmatpush1.bf16.msra.mxu0 %v3613_v29  ;;  %1841 = vmatpush1.bf16.msra.mxu1 %v3615_v30  ;;  %v3744_v29 = vcombine.high %v240_v20, %v248_v22  ;;  %v264_v30 = vld [vmem:[#allocation5 + $0x5d8] sm:$0xff]  ;;  %v114_v22 = vld [vmem:[#allocation5 + $0x128] sm:$0xff] }
  0x99   :  { %1799 = vmatprep.subr.bf16.mxu0 %v3630_v31  ;;  %1842 = vmatprep.subr.bf16.mxu1 %v3632_v35  ;;  %v3741_v31 = vcombine.low %v239_v18, %v247_v19  ;;  %v279_v35 = vld [vmem:[#allocation5 + $0x650] sm:$0xff]  ;;  %v3759_v40 = vcombine.low %v256_v28, %v264_v30  ;;  %v113_v18 = vld [vmem:[#allocation5 + $0x120] sm:$0xff] }
  0x9a   :  { %v3774_v41 = vcombine.high %v271_v34, %v279_v35  ;;  %v121_v19 = vld [vmem:[#allocation5 + $0x160] sm:$0xff] }
  0x9c   :  { %1800 = vmatpush1.bf16.msra.mxu0 %v3629_v37  ;;  %1843 = vmatpush1.bf16.msra.mxu1 %v3631_v38  ;;  %v3760_v37 = vcombine.high %v256_v28, %v264_v30  ;;  %v280_v38 = vld [vmem:[#allocation5 + $0x658] sm:$0xff]  ;;  %v129_v28 = vld [vmem:[#allocation5 + $0x1a0] sm:$0xff]  ;;  %v130_v30 = vld [vmem:[#allocation5 + $0x1a8] sm:$0xff] }
  0x9d   :  { %1801 = vmatprep.subr.bf16.mxu0 %v3646_v39  ;;  %1844 = vmatprep.subr.bf16.mxu1 %v3648_v43  ;;  %v3757_v39 = vcombine.low %v255_v26, %v263_v27  ;;  %v295_v43 = vld [vmem:[#allocation5 + $0x6d0] sm:$0xff]  ;;  %v3775_v48 = vcombine.low %v272_v36, %v280_v38  ;;  %v3618_v27 = vcombine.high %v113_v18, %v121_v19 }
  0x9e   :  { %v3790_v49 = vcombine.high %v287_v42, %v295_v43 }
  0xa0   :  { %1802 = vmatpush1.bf16.msra.mxu0 %v3645_v45  ;;  %1845 = vmatpush1.bf16.msra.mxu1 %v3647_v46  ;;  %v3776_v45 = vcombine.high %v272_v36, %v280_v38  ;;  %v296_v46 = vld [vmem:[#allocation5 + $0x6d8] sm:$0xff] }
  0xa1   :  { %1803 = vmatprep.subr.bf16.mxu0 %v3662_v47  ;;  %1846 = vmatprep.subr.bf16.mxu1 %v3664_v51  ;;  %v3773_v47 = vcombine.low %v271_v34, %v279_v35  ;;  %v311_v51 = vld [vmem:[#allocation5 + $0x750] sm:$0xff]  ;;  %v3791_v57 = vcombine.low %v288_v44, %v296_v46  ;;  %v145_v34 = vld [vmem:[#allocation5 + $0x220] sm:$0xff] }
  0xa2   :  { %v3806_v58 = vcombine.high %v303_v50, %v311_v51 }
  0xa4   :  { %1804 = vmatpush1.bf16.msra.mxu0 %v3661_v53  ;;  %1847 = vmatpush1.bf16.msra.mxu1 %v3663_v54  ;;  %v3792_v53 = vcombine.high %v288_v44, %v296_v46  ;;  %v312_v54 = vld [vmem:[#allocation5 + $0x758] sm:$0xff]  ;;  %v162_v44 = vld [vmem:[#allocation5 + $0x2a8] sm:$0xff] }
  0xa5   :  { %1805 = vmatprep.subr.bf16.mxu0 %v3678_v55  ;;  %1848 = vmatprep.subr.bf16.mxu1 %v3680_v60  ;;  %v3789_v55 = vcombine.low %v287_v42, %v295_v43  ;;  %v327_v60 = vld [vmem:[#allocation5 + $0x7d0] sm:$0xff]  ;;  %v3807_v1 = vcombine.low %v304_v52, %v312_v54  ;;  %v169_v42 = vld [vmem:[#allocation5 + $0x2e0] sm:$0xff] }
  0xa6   :  { %v3822_v2 = vcombine.high %v319_v59, %v327_v60 }
  0xa8   :  { %1806 = vmatpush1.bf16.msra.mxu0 %v3677_v62  ;;  %1849 = vmatpush1.bf16.msra.mxu1 %v3679_v63  ;;  %v3808_v62 = vcombine.high %v304_v52, %v312_v54  ;;  %v328_v63 = vld [vmem:[#allocation5 + $0x7d8] sm:$0xff]  ;;  %v178_v52 = vld [vmem:[#allocation5 + $0x328] sm:$0xff] }
  0xa9   :  { %1807 = vmatprep.subr.bf16.mxu0 %v3694_v0  ;;  %1850 = vmatprep.subr.bf16.mxu1 %v3696_v4  ;;  %v3805_v0 = vcombine.low %v303_v50, %v311_v51  ;;  %v89_v4 = vld [vmem:[#allocation5 + $0x60] sm:$0xff]  ;;  %v3823_v9 = vcombine.low %v320_v61, %v328_v63 }
  0xaa   :  { %v3586_v11 = vcombine.high %v81_v3, %v89_v4 }
  0xac   :  { %1808 = vmatpush1.bf16.msra.mxu0 %v3693_v6  ;;  %1851 = vmatpush1.bf16.msra.mxu1 %v3695_v7  ;;  %v3824_v6 = vcombine.high %v320_v61, %v328_v63  ;;  %v90_v7 = vld [vmem:[#allocation5 + $0x68] sm:$0xff] }
  0xad   :  { %1809 = vmatprep.subr.bf16.mxu0 %v3710_v8  ;;  %1852 = vmatprep.subr.bf16.mxu1 %v3712_v13  ;;  %v3821_v8 = vcombine.low %v319_v59, %v327_v60  ;;  %v105_v13 = vld [vmem:[#allocation5 + $0xe0] sm:$0xff]  ;;  %v3587_v20 = vcombine.low %v82_v5, %v90_v7  ;;  %v194_v61 = vld [vmem:[#allocation5 + $0x3a8] sm:$0xff] }
  0xae   :  { %v202_v63 = vld [vmem:[#allocation5 + $0x3e8] sm:$0xff] }
  0xb0   :  { %1810 = vmatpush1.bf16.msra.mxu0 %v3709_v15  ;;  %1853 = vmatpush1.bf16.msra.mxu1 %v3711_v16  ;;  %v3588_v15 = vcombine.high %v82_v5, %v90_v7  ;;  %v106_v16 = vld [vmem:[#allocation5 + $0xe8] sm:$0xff]  ;;  %v3700_v5 = vcombine.high %v194_v61, %v202_v63 }
  0xb1   :  { %1811 = vmatprep.subr.bf16.mxu0 %v3726_v17  ;;  %1854 = vmatprep.subr.bf16.mxu1 %v3728_v21  ;;  %v3585_v17 = vcombine.low %v81_v3, %v89_v4  ;;  %v3602_v21 = vcombine.high %v97_v12, %v105_v13  ;;  %v3603_v26 = vcombine.low %v98_v14, %v106_v16  ;;  %v218_v7 = vld [vmem:[#allocation5 + $0x468] sm:$0xff] }
  0xb4   :  { %1812 = vmatpush1.bf16.msra.mxu0 %v3725_v23  ;;  %1855 = vmatpush1.bf16.msra.mxu1 %v3727_v24  ;;  %v122_v23 = vld [vmem:[#allocation5 + $0x168] sm:$0xff]  ;;  %v3604_v24 = vcombine.high %v98_v14, %v106_v16  ;;  %v233_v14 = vld [vmem:[#allocation5 + $0x4e0] sm:$0xff] }
  0xb5   :  { %1813 = vmatprep.subr.bf16.mxu0 %v3742_v25  ;;  %1856 = vmatprep.subr.bf16.mxu1 %v3744_v29  ;;  %v3601_v25 = vcombine.low %v97_v12, %v105_v13  ;;  %v137_v29 = vld [vmem:[#allocation5 + $0x1e0] sm:$0xff]  ;;  %v3619_v35 = vcombine.low %v114_v22, %v122_v23  ;;  %v234_v16 = vld [vmem:[#allocation5 + $0x4e8] sm:$0xff] }
  0xb6   :  { %v3634_v36 = vcombine.high %v129_v28, %v137_v29  ;;  %v225_v13 = vld [vmem:[#allocation5 + $0x4a0] sm:$0xff] }
  0xb8   :  { %1814 = vmatpush1.bf16.msra.mxu0 %v3741_v31  ;;  %1857 = vmatpush1.bf16.msra.mxu1 %v3743_v32  ;;  %v3620_v31 = vcombine.high %v114_v22, %v122_v23  ;;  %v138_v32 = vld [vmem:[#allocation5 + $0x1e8] sm:$0xff]  ;;  %v249_v22 = vld [vmem:[#allocation5 + $0x560] sm:$0xff] }
  0xb9   :  { %1815 = vmatprep.subr.bf16.mxu0 %v3758_v33  ;;  %1858 = vmatprep.subr.bf16.mxu1 %v3760_v37  ;;  %v3617_v33 = vcombine.low %v113_v18, %v121_v19  ;;  %v146_v37 = vld [vmem:[#allocation5 + $0x228] sm:$0xff]  ;;  %v3636_v38 = vcombine.high %v130_v30, %v138_v32  ;;  %v3635_v43 = vcombine.low %v130_v30, %v138_v32  ;;  %v265_v30 = vld [vmem:[#allocation5 + $0x5e0] sm:$0xff] }
  0xba   :  { %v3730_v19 = vcombine.high %v225_v13, %v233_v14  ;;  %v242_v23 = vld [vmem:[#allocation5 + $0x528] sm:$0xff] }
  0xbb   :  { %v266_v32 = vld [vmem:[#allocation5 + $0x5e8] sm:$0xff] }
  0xbc   :  { %1816 = vmatpush1.bf16.msra.mxu0 %v3757_v39  ;;  %1859 = vmatpush1.bf16.msra.mxu1 %v3759_v40  ;;  %v154_v39 = vld [vmem:[#allocation5 + $0x268] sm:$0xff]  ;;  %v3633_v40 = vcombine.low %v129_v28, %v137_v29  ;;  %v257_v29 = vld [vmem:[#allocation5 + $0x5a0] sm:$0xff] }
  0xbd   :  { %1817 = vmatprep.subr.bf16.mxu0 %v3774_v41  ;;  %1860 = vmatprep.subr.bf16.mxu1 %v3776_v45  ;;  %v161_v41 = vld [vmem:[#allocation5 + $0x2a0] sm:$0xff]  ;;  %v170_v45 = vld [vmem:[#allocation5 + $0x2e8] sm:$0xff]  ;;  %v3652_v46 = vcombine.high %v146_v37, %v154_v39  ;;  %v3651_v50 = vcombine.low %v146_v37, %v154_v39 }
  0xbe   :  { %v3666_v51 = vcombine.high %v161_v41, %v169_v42  ;;  %v3668_v54 = vcombine.high %v162_v44, %v170_v45  ;;  %v3667_v59 = vcombine.low %v162_v44, %v170_v45  ;;  %v281_v37 = vld [vmem:[#allocation5 + $0x660] sm:$0xff]  ;;  %v282_v39 = vld [vmem:[#allocation5 + $0x668] sm:$0xff] }
  0xbf   :  { %v297_v44 = vld [vmem:[#allocation5 + $0x6e0] sm:$0xff]  ;;  %v290_v45 = vld [vmem:[#allocation5 + $0x6a8] sm:$0xff] }
  0xc0   :  { %1818 = vmatpush1.bf16.msra.mxu0 %v3773_v47  ;;  %1861 = vmatpush1.bf16.msra.mxu1 %v3775_v48  ;;  %v177_v48 = vld [vmem:[#allocation5 + $0x320] sm:$0xff] }
  0xc1   :  { %1819 = vmatprep.subr.bf16.mxu0 %v3790_v49  ;;  %1862 = vmatprep.subr.bf16.mxu1 %v3792_v53  ;;  %v185_v49 = vld [vmem:[#allocation5 + $0x360] sm:$0xff]  ;;  %v186_v53 = vld [vmem:[#allocation5 + $0x368] sm:$0xff] }
  0xc2   :  { %v3682_v60 = vcombine.high %v177_v48, %v185_v49  ;;  %v3683_v3 = vcombine.low %v178_v52, %v186_v53 }
  0xc4   :  { %1820 = vmatpush1.bf16.msra.mxu0 %v3789_v55  ;;  %1863 = vmatpush1.bf16.msra.mxu1 %v3791_v57  ;;  %v3665_v55 = vcombine.low %v161_v41, %v169_v42  ;;  %v193_v57 = vld [vmem:[#allocation5 + $0x3a0] sm:$0xff] }
  0xc5   :  { %1821 = vmatprep.subr.bf16.mxu0 %v3806_v58  ;;  %1864 = vmatprep.subr.bf16.mxu1 %v3808_v62  ;;  %v201_v58 = vld [vmem:[#allocation5 + $0x3e0] sm:$0xff]  ;;  %v3684_v62 = vcombine.high %v178_v52, %v186_v53  ;;  %v306_v52 = vld [vmem:[#allocation5 + $0x728] sm:$0xff] }
  0xc6   :  { %v3698_v4 = vcombine.high %v193_v57, %v201_v58  ;;  %v314_v53 = vld [vmem:[#allocation5 + $0x768] sm:$0xff] }
  0xc8   :  { %1822 = vmatpush1.bf16.msra.mxu0 %v3805_v0  ;;  %1865 = vmatpush1.bf16.msra.mxu1 %v3807_v1  ;;  %v3681_v0 = vcombine.low %v177_v48, %v185_v49  ;;  %v209_v1 = vld [vmem:[#allocation5 + $0x420] sm:$0xff] }
  0xc9   :  { %1823 = vmatprep.subr.bf16.mxu0 %v3822_v2  ;;  %1866 = vmatprep.subr.bf16.mxu1 %v3824_v6  ;;  %v217_v2 = vld [vmem:[#allocation5 + $0x460] sm:$0xff]  ;;  %v210_v6 = vld [vmem:[#allocation5 + $0x428] sm:$0xff] }
  0xca   :  { %v3716_v12 = vcombine.high %v210_v6, %v218_v7  ;;  %v3715_v18 = vcombine.low %v210_v6, %v218_v7  ;;  %v305_v48 = vld [vmem:[#allocation5 + $0x720] sm:$0xff]  ;;  %v84_v6 = vld [vmem:[#allocation5 + $0x38] sm:$0xff] }
  0xcb   :  { %v313_v49 = vld [vmem:[#allocation5 + $0x760] sm:$0xff]  ;;  %v92_v7 = vld [vmem:[#allocation5 + $0x78] sm:$0xff] }
  0xcc   :  { %1824 = vmatpush1.bf16.msra.mxu0 %v3821_v8  ;;  %1867 = vmatpush1.bf16.msra.mxu1 %v3823_v9  ;;  %v3697_v8 = vcombine.low %v193_v57, %v201_v58  ;;  %v3699_v9 = vcombine.low %v194_v61, %v202_v63  ;;  %v3810_v58 = vcombine.high %v305_v48, %v313_v49  ;;  %v322_v61 = vld [vmem:[#allocation5 + $0x7a8] sm:$0xff] }
  0xcd   :  { %1879 = vmatprep.subr.bf16.mxu0 %v3586_v11  ;;  %1922 = vmatprep.subr.bf16.mxu1 %v3588_v15  ;;  %v3714_v11 = vcombine.high %v209_v1, %v217_v2  ;;  %v226_v15 = vld [vmem:[#allocation5 + $0x4a8] sm:$0xff] }
  0xce   :  { %v330_v63 = vld [vmem:[#allocation5 + $0x7e8] sm:$0xff] }
  0xcf   :  { %1826 = vmatmul.mubr.bf16.vlgmr.msra.gmra.mrb[4].mxu0 %v4568_v10  ;;  %1869 = vmatmul.mubr.bf16.vlgmr.msra.gmra.mrb[4].mxu1 %v4568_v10  ;;  %v153_v10 = vld [vmem:[#allocation5 + $0x260] sm:$0xff] }
  0xd0   :  { %1880 = vmatpush1.bf16.msra.mxu0 %v3585_v17  ;;  %1923 = vmatpush1.bf16.msra.mxu1 %v3587_v20  ;;  %v3649_v47 = vcombine.low %v145_v34, %v153_v10  ;;  %v3713_v17 = vcombine.low %v209_v1, %v217_v2  ;;  %v3732_v20 = vcombine.high %v226_v15, %v234_v16  ;;  %v83_v1 = vld [vmem:[#allocation5 + $0x30] sm:$0xff] }
  0xd1   :  { %1881 = vmatprep.subr.bf16.mxu0 %v3602_v21  ;;  %1924 = vmatprep.subr.bf16.mxu1 %v3604_v24  ;;  %v241_v21 = vld [vmem:[#allocation5 + $0x520] sm:$0xff]  ;;  %v250_v24 = vld [vmem:[#allocation5 + $0x568] sm:$0xff]  ;;  %v3811_v2 = vcombine.low %v306_v52, %v314_v53 }
  0xd2   :  { %1911 = vmatprep.mubr.bf16.mxu0 %v4564_v56  ;;  %1954 = vmatprep.mubr.bf16.mxu1 %v4564_v56  ;;  %v3650_v56 = vcombine.high %v145_v34, %v153_v10  ;;  %v3748_v28 = vcombine.high %v242_v23, %v250_v24  ;;  %v3747_v34 = vcombine.low %v242_v23, %v250_v24  ;;  %v4578_v23 = vld [vmem:[#allocation2] ss:$8 sps:$4 sm:$0xff]  }
  0xd3   :  { %v3762_v10 = vcombine.high %v257_v29, %v265_v30  ;;  %v116_v24 = vld [vmem:[#allocation5 + $0x138] sm:$0xff] }
  0xd4   :  { %1882 = vmatpush1.bf16.msra.mxu0 %v3601_v25  ;;  %1925 = vmatpush1.bf16.msra.mxu1 %v3603_v26  ;;  %v3729_v25 = vcombine.low %v225_v13, %v233_v14  ;;  %v3731_v26 = vcombine.low %v226_v15, %v234_v16  ;;  %v99_v13 = vld [vmem:[#allocation5 + $0xb0] sm:$0xff]  ;;  %v100_v15 = vld [vmem:[#allocation5 + $0xb8] sm:$0xff] }
  0xd5   :  { %1883 = vmatprep.subr.bf16.mxu0 %v3618_v27  ;;  %1926 = vmatprep.subr.bf16.mxu1 %v3620_v31  ;;  %v3746_v27 = vcombine.high %v241_v21, %v249_v22  ;;  %v258_v31 = vld [vmem:[#allocation5 + $0x5a8] sm:$0xff]  ;;  %v107_v14 = vld [vmem:[#allocation5 + $0xf0] sm:$0xff]  ;;  %v108_v16 = vld [vmem:[#allocation5 + $0xf8] sm:$0xff] }
  0xd6   :  { %v3763_v41 = vcombine.low %v258_v31, %v266_v32 }
  0xd8   :  { %1884 = vmatpush1.bf16.msra.mxu0 %v3617_v33  ;;  %1927 = vmatpush1.bf16.msra.mxu1 %v3619_v35  ;;  %v3745_v33 = vcombine.low %v241_v21, %v249_v22  ;;  %v3764_v35 = vcombine.high %v258_v31, %v266_v32  ;;  %v115_v21 = vld [vmem:[#allocation5 + $0x130] sm:$0xff] }
  0xd9   :  { %1885 = vmatprep.subr.bf16.mxu0 %v3634_v36  ;;  %1928 = vmatprep.subr.bf16.mxu1 %v3636_v38  ;;  %v273_v36 = vld [vmem:[#allocation5 + $0x620] sm:$0xff]  ;;  %v274_v38 = vld [vmem:[#allocation5 + $0x628] sm:$0xff]  ;;  %v123_v22 = vld [vmem:[#allocation5 + $0x170] sm:$0xff] }
  0xda   :  { %v3778_v42 = vcombine.high %v273_v36, %v281_v37  ;;  %v139_v31 = vld [vmem:[#allocation5 + $0x1f0] sm:$0xff] }
  0xdb   :  { %v4344_v32 = vld [vmem:[#allocation2 + $0x4] ss:$8 sps:$4 sm:$0xff]  }
  0xdc   :  { %1886 = vmatpush1.bf16.msra.mxu0 %v3633_v40  ;;  %1929 = vmatpush1.bf16.msra.mxu1 %v3635_v43  ;;  %v3761_v40 = vcombine.low %v257_v29, %v265_v30  ;;  %v3780_v43 = vcombine.high %v274_v38, %v282_v39  ;;  %v131_v30 = vld [vmem:[#allocation5 + $0x1b0] sm:$0xff] }
  0xdd   :  { %1887 = vmatprep.subr.bf16.mxu0 %v3650_v56  ;;  %1930 = vmatprep.subr.bf16.mxu1 %v3652_v46  ;;  %v289_v56 = vld [vmem:[#allocation5 + $0x6a0] sm:$0xff]  ;;  %v298_v46 = vld [vmem:[#allocation5 + $0x6e8] sm:$0xff] }
  0xde   :  { %v3795_v57 = vcombine.low %v290_v45, %v298_v46 }
  0xe0   :  { %1888 = vmatpush1.bf16.msra.mxu0 %v3649_v47  ;;  %1931 = vmatpush1.bf16.msra.mxu1 %v3651_v50  ;;  %v3777_v47 = vcombine.low %v273_v36, %v281_v37  ;;  %v3779_v50 = vcombine.low %v274_v38, %v282_v39  ;;  %v3638_v36 = vcombine.high %v131_v30, %v139_v31  ;;  %v147_v38 = vld [vmem:[#allocation5 + $0x230] sm:$0xff] }
  0xe1   :  { %1889 = vmatprep.subr.bf16.mxu0 %v3666_v51  ;;  %1932 = vmatprep.subr.bf16.mxu1 %v3668_v54  ;;  %v3794_v51 = vcombine.high %v289_v56, %v297_v44  ;;  %v3796_v54 = vcombine.high %v290_v45, %v298_v46  ;;  %v155_v39 = vld [vmem:[#allocation5 + $0x270] sm:$0xff] }
  0xe2   :  { %v163_v45 = vld [vmem:[#allocation5 + $0x2b0] sm:$0xff] }
  0xe3   :  { %v171_v46 = vld [vmem:[#allocation5 + $0x2f0] sm:$0xff] }
  0xe4   :  { %1890 = vmatpush1.bf16.msra.mxu0 %v3665_v55  ;;  %1933 = vmatpush1.bf16.msra.mxu1 %v3667_v59  ;;  %v3793_v55 = vcombine.low %v289_v56, %v297_v44  ;;  %v321_v59 = vld [vmem:[#allocation5 + $0x7a0] sm:$0xff]  ;;  %v3654_v56 = vcombine.high %v147_v38, %v155_v39 }
  0xe5   :  { %1891 = vmatprep.subr.bf16.mxu0 %v3682_v60  ;;  %1934 = vmatprep.subr.bf16.mxu1 %v3684_v62  ;;  %v329_v60 = vld [vmem:[#allocation5 + $0x7e0] sm:$0xff]  ;;  %v3812_v62 = vcombine.high %v306_v52, %v314_v53  ;;  %v179_v53 = vld [vmem:[#allocation5 + $0x330] sm:$0xff] }
  0xe8   :  { %1892 = vmatpush1.bf16.msra.mxu0 %v3681_v0  ;;  %1935 = vmatpush1.bf16.msra.mxu1 %v3683_v3  ;;  %v3809_v0 = vcombine.low %v305_v48, %v313_v49  ;;  %v3826_v3 = vcombine.high %v321_v59, %v329_v60  ;;  %v172_v48 = vld [vmem:[#allocation5 + $0x2f8] sm:$0xff]  ;;  %v3653_v49 = vcombine.low %v147_v38, %v155_v39  ;;  %v275_v39 = vld [vmem:[#allocation5 + $0x630] sm:$0xff] }
  0xe9   :  { %1893 = vmatprep.subr.bf16.mxu0 %v3698_v4  ;;  %1936 = vmatprep.subr.bf16.mxu1 %v3700_v5  ;;  %v91_v4 = vld [vmem:[#allocation5 + $0x70] sm:$0xff]  ;;  %v3828_v5 = vcombine.high %v322_v61, %v330_v63 }
  0xec   :  { %1894 = vmatpush1.bf16.msra.mxu0 %v3697_v8  ;;  %1937 = vmatpush1.bf16.msra.mxu1 %v3699_v9  ;;  %v3825_v8 = vcombine.low %v321_v59, %v329_v60  ;;  %v3827_v9 = vcombine.low %v322_v61, %v330_v63  ;;  %v203_v63 = vld [vmem:[#allocation5 + $0x3f0] sm:$0xff] }
  0xed   :  { %1895 = vmatprep.subr.bf16.mxu0 %v3714_v11  ;;  %1938 = vmatprep.subr.bf16.mxu1 %v3716_v12  ;;  %v3590_v11 = vcombine.high %v83_v1, %v91_v4  ;;  %v3592_v12 = vcombine.high %v84_v6, %v92_v7 }
  0xf0   :  { %1896 = vmatpush1.bf16.msra.mxu0 %v3713_v17  ;;  %1939 = vmatpush1.bf16.msra.mxu1 %v3715_v18  ;;  %v3589_v17 = vcombine.low %v83_v1, %v91_v4  ;;  %v3591_v18 = vcombine.low %v84_v6, %v92_v7  ;;  %v204_v1 = vld [vmem:[#allocation5 + $0x3f8] sm:$0xff]  ;;  %v211_v6 = vld [vmem:[#allocation5 + $0x430] sm:$0xff] }
  0xf1   :  { %1897 = vmatprep.subr.bf16.mxu0 %v3730_v19  ;;  %1940 = vmatprep.subr.bf16.mxu1 %v3732_v20  ;;  %v3606_v19 = vcombine.high %v99_v13, %v107_v14  ;;  %v3608_v20 = vcombine.high %v100_v15, %v108_v16  ;;  %v219_v7 = vld [vmem:[#allocation5 + $0x470] sm:$0xff] }
  0xf4   :  { %1898 = vmatpush1.bf16.msra.mxu0 %v3729_v25  ;;  %1941 = vmatpush1.bf16.msra.mxu1 %v3731_v26  ;;  %v124_v25 = vld [vmem:[#allocation5 + $0x178] sm:$0xff]  ;;  %v3605_v26 = vcombine.low %v99_v13, %v107_v14  ;;  %v3718_v13 = vcombine.high %v211_v6, %v219_v7 }
  0xf5   :  { %1899 = vmatprep.subr.bf16.mxu0 %v3746_v27  ;;  %1942 = vmatprep.subr.bf16.mxu1 %v3748_v28  ;;  %v3607_v27 = vcombine.low %v100_v15, %v108_v16  ;;  %v3622_v28 = vcombine.high %v115_v21, %v123_v22  ;;  %v3624_v29 = vcombine.high %v116_v24, %v124_v25  ;;  %v227_v15 = vld [vmem:[#allocation5 + $0x4b0] sm:$0xff] }
  0xf6   :  { %v235_v16 = vld [vmem:[#allocation5 + $0x4f0] sm:$0xff] }
  0xf8   :  { %1900 = vmatpush1.bf16.msra.mxu0 %v3745_v33  ;;  %1943 = vmatpush1.bf16.msra.mxu1 %v3747_v34  ;;  %v132_v33 = vld [vmem:[#allocation5 + $0x1b8] sm:$0xff] }
  0xf9   :  { %1901 = vmatprep.subr.bf16.mxu0 %v3762_v10  ;;  %1944 = vmatprep.subr.bf16.mxu1 %v3764_v35  ;;  %v140_v34 = vld [vmem:[#allocation5 + $0x1f8] sm:$0xff]  ;;  %v3621_v10 = vcombine.low %v115_v21, %v123_v22  ;;  %v3623_v35 = vcombine.low %v116_v24, %v124_v25  ;;  %v3734_v21 = vcombine.high %v227_v15, %v235_v16  ;;  %v243_v24 = vld [vmem:[#allocation5 + $0x530] sm:$0xff] }
  0xfa   :  { %v3640_v37 = vcombine.high %v132_v33, %v140_v34  ;;  %v251_v25 = vld [vmem:[#allocation5 + $0x570] sm:$0xff] }
  0xfc   :  { %1902 = vmatpush1.bf16.msra.mxu0 %v3761_v40  ;;  %1945 = vmatpush1.bf16.msra.mxu1 %v3763_v41  ;;  %v148_v40 = vld [vmem:[#allocation5 + $0x238] sm:$0xff] }
  0xfd   :  { %1903 = vmatprep.subr.bf16.mxu0 %v3778_v42  ;;  %1946 = vmatprep.subr.bf16.mxu1 %v3780_v43  ;;  %v156_v41 = vld [vmem:[#allocation5 + $0x278] sm:$0xff]  ;;  %v3637_v42 = vcombine.low %v131_v30, %v139_v31  ;;  %v3639_v43 = vcombine.low %v132_v33, %v140_v34  ;;  %v3750_v30 = vcombine.high %v243_v24, %v251_v25  ;;  %v267_v33 = vld [vmem:[#allocation5 + $0x5f0] sm:$0xff] }
  0xfe   :  { %v3656_v44 = vcombine.high %v148_v40, %v156_v41  ;;  %v260_v34 = vld [vmem:[#allocation5 + $0x5b8] sm:$0xff] }
 0x100   :  { %1904 = vmatpush1.bf16.msra.mxu0 %v3777_v47  ;;  %1947 = vmatpush1.bf16.msra.mxu1 %v3779_v50  ;;  %v164_v47 = vld [vmem:[#allocation5 + $0x2b8] sm:$0xff]  ;;  %v3655_v50 = vcombine.low %v148_v40, %v156_v41  ;;  %v283_v40 = vld [vmem:[#allocation5 + $0x670] sm:$0xff] }
 0x101   :  { %1905 = vmatprep.subr.bf16.mxu0 %v3794_v51  ;;  %1948 = vmatprep.subr.bf16.mxu1 %v3796_v54  ;;  %v3670_v51 = vcombine.high %v163_v45, %v171_v46  ;;  %v3672_v52 = vcombine.high %v164_v47, %v172_v48  ;;  %v187_v54 = vld [vmem:[#allocation5 + $0x370] sm:$0xff]  ;;  %v3671_v59 = vcombine.low %v164_v47, %v172_v48  ;;  %v276_v41 = vld [vmem:[#allocation5 + $0x638] sm:$0xff] }
 0x102   :  { %v3686_v60 = vcombine.high %v179_v53, %v187_v54  ;;  %v299_v47 = vld [vmem:[#allocation5 + $0x6f0] sm:$0xff]  ;;  %v292_v48 = vld [vmem:[#allocation5 + $0x6b8] sm:$0xff] }
 0x104   :  { %1906 = vmatpush1.bf16.msra.mxu0 %v3793_v55  ;;  %1949 = vmatpush1.bf16.msra.mxu1 %v3795_v57  ;;  %v180_v55 = vld [vmem:[#allocation5 + $0x338] sm:$0xff] }
 0x105   :  { %1907 = vmatprep.subr.bf16.mxu0 %v3810_v58  ;;  %1950 = vmatprep.subr.bf16.mxu1 %v3812_v62  ;;  %v188_v57 = vld [vmem:[#allocation5 + $0x378] sm:$0xff]  ;;  %v3669_v58 = vcombine.low %v163_v45, %v171_v46  ;;  %v195_v62 = vld [vmem:[#allocation5 + $0x3b0] sm:$0xff] }
 0x106   :  { %v3688_v61 = vcombine.high %v180_v55, %v188_v57  ;;  %v3702_v4 = vcombine.high %v195_v62, %v203_v63  ;;  %v291_v46 = vld [vmem:[#allocation5 + $0x6b0] sm:$0xff] }
 0x108   :  { %1908 = vmatpush1.bf16.msra.mxu0 %v3809_v0  ;;  %1951 = vmatpush1.bf16.msra.mxu1 %v3811_v2  ;;  %v196_v0 = vld [vmem:[#allocation5 + $0x3b8] sm:$0xff]  ;;  %v3685_v2 = vcombine.low %v179_v53, %v187_v54  ;;  %v307_v54 = vld [vmem:[#allocation5 + $0x730] sm:$0xff] }
 0x109   :  { %1909 = vmatprep.subr.bf16.mxu0 %v3826_v3  ;;  %1952 = vmatprep.subr.bf16.mxu1 %v3828_v5  ;;  %v3687_v3 = vcombine.low %v180_v55, %v188_v57  ;;  %v3704_v5 = vcombine.high %v196_v0, %v204_v1  ;;  %v315_v55 = vld [vmem:[#allocation5 + $0x770] sm:$0xff]  ;;  %v308_v57 = vld [vmem:[#allocation5 + $0x738] sm:$0xff] }
 0x10c   :  { %1910 = vmatpush1.bf16.msra.mxu0 %v3825_v8  ;;  %1953 = vmatpush1.bf16.msra.mxu1 %v3827_v9  ;;  %v212_v8 = vld [vmem:[#allocation5 + $0x438] sm:$0xff] }
 0x10d   :  { %1965 = vmatprep.subr.bf16.mxu0 %v3590_v11  ;;  %2008 = vmatprep.subr.bf16.mxu1 %v3592_v12  ;;  %v220_v9 = vld [vmem:[#allocation5 + $0x478] sm:$0xff]  ;;  %v3701_v11 = vcombine.low %v195_v62, %v203_v63  ;;  %v3703_v12 = vcombine.low %v196_v0, %v204_v1  ;;  %v323_v63 = vld [vmem:[#allocation5 + $0x7b0] sm:$0xff] }
 0x10e   :  { %v3720_v14 = vcombine.high %v212_v8, %v220_v9  ;;  %v331_v0 = vld [vmem:[#allocation5 + $0x7f0] sm:$0xff]  ;;  %v324_v1 = vld [vmem:[#allocation5 + $0x7b8] sm:$0xff] }
 0x10f   :  { %1912 = vmatmul.mubr.bf16.vlgmr.msra.gmra.mrb[8].mxu0 %v4578_v23  ;;  %1955 = vmatmul.mubr.bf16.vlgmr.msra.gmra.mrb[8].mxu1 %v4578_v23 }
 0x110   :  { %1966 = vmatpush1.bf16.msra.mxu0 %v3589_v17  ;;  %2009 = vmatpush1.bf16.msra.mxu1 %v3591_v18  ;;  %v228_v17 = vld [vmem:[#allocation5 + $0x4b8] sm:$0xff] }
 0x111   :  { %1967 = vmatprep.subr.bf16.mxu0 %v3606_v19  ;;  %2010 = vmatprep.subr.bf16.mxu1 %v3608_v20  ;;  %v236_v18 = vld [vmem:[#allocation5 + $0x4f8] sm:$0xff]  ;;  %v3717_v19 = vcombine.low %v211_v6, %v219_v7  ;;  %v3719_v20 = vcombine.low %v212_v8, %v220_v9  ;;  %v3829_v7 = vcombine.low %v323_v63, %v331_v0  ;;  %v4151_v9 = vld [vmem:[#allocation8 + $0x40] sm:$0xff]  }
 0x112   :  { %1997 = vmatprep.mubr.bf16.mxu0 %v4344_v32  ;;  %2040 = vmatprep.mubr.bf16.mxu1 %v4344_v32  ;;  %v3736_v22 = vcombine.high %v228_v17, %v236_v18  ;;  %v259_v32 = vld [vmem:[#allocation5 + $0x5b0] sm:$0xff] }
 0x114   :  { %1968 = vmatpush1.bf16.msra.mxu0 %v3605_v26  ;;  %2011 = vmatpush1.bf16.msra.mxu1 %v3607_v27  ;;  %v244_v26 = vld [vmem:[#allocation5 + $0x538] sm:$0xff] }
 0x115   :  { %1969 = vmatprep.subr.bf16.mxu0 %v3622_v28  ;;  %2012 = vmatprep.subr.bf16.mxu1 %v3624_v29  ;;  %v252_v27 = vld [vmem:[#allocation5 + $0x578] sm:$0xff]  ;;  %v3733_v28 = vcombine.low %v227_v15, %v235_v16  ;;  %v3735_v29 = vcombine.low %v228_v17, %v236_v18  ;;  %v4159_v18 = vld [vmem:[#allocation8 + $0x50] sm:$0xff]  }
 0x116   :  { %v3752_v31 = vcombine.high %v244_v26, %v252_v27  ;;  %v4156_v15 = vld [vmem:[#allocation8 + $0xc8] sm:$0xff]  }
 0x117   :  { %v4157_v16 = vld [vmem:[#allocation8 + $0x8] sm:$0xff]  }
 0x118   :  { %1970 = vmatpush1.bf16.msra.mxu0 %v3621_v10  ;;  %2013 = vmatpush1.bf16.msra.mxu1 %v3623_v35  ;;  %v268_v10 = vld [vmem:[#allocation5 + $0x5f8] sm:$0xff]  ;;  %v3749_v35 = vcombine.low %v243_v24, %v251_v25  ;;  %v4163_v24 = vld [vmem:[#allocation8 + $0x58] sm:$0xff]  }
 0x119   :  { %1971 = vmatprep.subr.bf16.mxu0 %v3638_v36  ;;  %2014 = vmatprep.subr.bf16.mxu1 %v3640_v37  ;;  %v3751_v36 = vcombine.low %v244_v26, %v252_v27  ;;  %v3766_v37 = vcombine.high %v259_v32, %v267_v33  ;;  %v3768_v38 = vcombine.high %v260_v34, %v268_v10  ;;  %v4158_v17 = vld [vmem:[#allocation8 + $0x88] sm:$0xff]   ;;  %v4164_v25 = vld [vmem:[#allocation8 + $0xd8] sm:$0xff]  }
 0x11a   :  { %v4166_v27 = vld [vmem:[#allocation8 + $0x98] sm:$0xff]  }
 0x11c   :  { %1972 = vmatpush1.bf16.msra.mxu0 %v3637_v42  ;;  %2015 = vmatpush1.bf16.msra.mxu1 %v3639_v43  ;;  %v284_v42 = vld [vmem:[#allocation5 + $0x678] sm:$0xff]  ;;  %v3765_v43 = vcombine.low %v259_v32, %v267_v33 }
 0x11d   :  { %1973 = vmatprep.subr.bf16.mxu0 %v3654_v56  ;;  %2016 = vmatprep.subr.bf16.mxu1 %v3656_v44  ;;  %v3767_v56 = vcombine.low %v260_v34, %v268_v10  ;;  %v3782_v44 = vcombine.high %v275_v39, %v283_v40  ;;  %v3784_v45 = vcombine.high %v276_v41, %v284_v42  ;;  %v4169_v34 = vld [vmem:[#allocation8 + $0x20] sm:$0xff]  }
 0x120   :  { %1974 = vmatpush1.bf16.msra.mxu0 %v3653_v49  ;;  %2017 = vmatpush1.bf16.msra.mxu1 %v3655_v50  ;;  %v300_v49 = vld [vmem:[#allocation5 + $0x6f8] sm:$0xff]  ;;  %v3781_v50 = vcombine.low %v275_v39, %v283_v40 }
 0x121   :  { %1975 = vmatprep.subr.bf16.mxu0 %v3670_v51  ;;  %2018 = vmatprep.subr.bf16.mxu1 %v3672_v52  ;;  %v3783_v51 = vcombine.low %v276_v41, %v284_v42  ;;  %v3798_v52 = vcombine.high %v291_v46, %v299_v47  ;;  %v3800_v53 = vcombine.high %v292_v48, %v300_v49  ;;  %v4173_v41 = vld [vmem:[#allocation8 + $0x28] sm:$0xff]  }
 0x124   :  { %1976 = vmatpush1.bf16.msra.mxu0 %v3669_v58  ;;  %2019 = vmatpush1.bf16.msra.mxu1 %v3671_v59  ;;  %v316_v58 = vld [vmem:[#allocation5 + $0x778] sm:$0xff]  ;;  %v3797_v59 = vcombine.low %v291_v46, %v299_v47 }
 0x125   :  { %1977 = vmatprep.subr.bf16.mxu0 %v3686_v60  ;;  %2020 = vmatprep.subr.bf16.mxu1 %v3688_v61  ;;  %v3799_v60 = vcombine.low %v292_v48, %v300_v49  ;;  %v3814_v61 = vcombine.high %v307_v54, %v315_v55  ;;  %v3816_v62 = vcombine.high %v308_v57, %v316_v58 }
 0x128   :  { %1978 = vmatpush1.bf16.msra.mxu0 %v3685_v2  ;;  %2021 = vmatpush1.bf16.msra.mxu1 %v3687_v3  ;;  %v332_v2 = vld [vmem:[#allocation5 + $0x7f8] sm:$0xff]  ;;  %v3813_v3 = vcombine.low %v307_v54, %v315_v55 }
 0x129   :  { %1979 = vmatprep.subr.bf16.mxu0 %v3702_v4  ;;  %2022 = vmatprep.subr.bf16.mxu1 %v3704_v5  ;;  %v3815_v4 = vcombine.low %v308_v57, %v316_v58  ;;  %v3830_v5 = vcombine.high %v323_v63, %v331_v0  ;;  %v3832_v6 = vcombine.high %v324_v1, %v332_v2 }
 0x12a   :  { %v3831_v8 = vcombine.low %v324_v1, %v332_v2 }
 0x12c   :  { %1980 = vmatpush1.bf16.msra.mxu0 %v3701_v11  ;;  %2023 = vmatpush1.bf16.msra.mxu1 %v3703_v12  ;;  %v4152_v11 = vld [vmem:[#allocation8 + $0xc0] sm:$0xff]  }
 0x12d   :  { %1981 = vmatprep.subr.bf16.mxu0 %v3718_v13  ;;  %2024 = vmatprep.subr.bf16.mxu1 %v3720_v14  ;;  %v4153_v12 = vld [vmem:[#allocation8] sm:$0xff]   ;;  %v4155_v14 = vld [vmem:[#allocation8 + $0x48] sm:$0xff]  }
 0x12e   :  { %v4154_v13 = vld [vmem:[#allocation8 + $0x80] sm:$0xff]  }
 0x130   :  { %1982 = vmatpush1.bf16.msra.mxu0 %v3717_v19  ;;  %2025 = vmatpush1.bf16.msra.mxu1 %v3719_v20  ;;  %v4160_v19 = vld [vmem:[#allocation8 + $0xd0] sm:$0xff]   ;;  %v337_v20 = vlaneseq }
 0x131   :  { %1983 = vmatprep.subr.bf16.mxu0 %v3734_v21  ;;  %2026 = vmatprep.subr.bf16.mxu1 %v3736_v22  ;;  %v4161_v21 = vld [vmem:[#allocation8 + $0x10] sm:$0xff]  }
 0x132   :  { %v4162_v22 = vld [vmem:[#allocation8 + $0x90] sm:$0xff]   ;;  %v4584_v26 = vshrl.u32 %v337_v20, 7 }
 0x134   :  { %1984 = vmatpush1.bf16.msra.mxu0 %v3733_v28  ;;  %2027 = vmatpush1.bf16.msra.mxu1 %v3735_v29  ;;  %v4167_v28 = vld [vmem:[#allocation8 + $0x60] sm:$0xff]   ;;  %v347_v32 = vsub.s32 2, %v4584_v26  ;;  %v343_v33 = vsub.s32 1, %v4584_v26  ;;  %v351_v10 = vsub.s32 3, %v4584_v26 }
 0x135   :  { %1985 = vmatprep.subr.bf16.mxu0 %v3750_v30  ;;  %2028 = vmatprep.subr.bf16.mxu1 %v3752_v31  ;;  %v4168_v29 = vld [vmem:[#allocation8 + $0xe0] sm:$0xff]   ;;  %v339_v30 = vsub.s32 0, %v4584_v26  ;;  %v4587_v31 = vld [vmem:[#allocation7] sm:$0xff] }
 0x136   :  { %v348_v39 = vrot.slane %v4587_v31, %v347_v32  ;;  %v344_v40 = vrot.slane %v4587_v31, %v343_v33  ;;  %v352_v42 = vrot.slane %v4587_v31, %v351_v10 }
 0x138   :  { %1986 = vmatpush1.bf16.msra.mxu0 %v3749_v35  ;;  %2029 = vmatpush1.bf16.msra.mxu1 %v3751_v36  ;;  %v4170_v35 = vld [vmem:[#allocation8 + $0xa0] sm:$0xff]   ;;  %v4171_v36 = vld [vmem:[#allocation8 + $0x68] sm:$0xff]  }
 0x139   :  { %1987 = vmatprep.subr.bf16.mxu0 %v3766_v37  ;;  %2030 = vmatprep.subr.bf16.mxu1 %v3768_v38  ;;  %v4172_v37 = vld [vmem:[#allocation8 + $0xe8] sm:$0xff]   ;;  %v340_v38 = vrot.slane %v4587_v31, %v339_v30 }
 0x13c   :  { %1988 = vmatpush1.bf16.msra.mxu0 %v3765_v43  ;;  %2031 = vmatpush1.bf16.msra.mxu1 %v3767_v56  ;;  %v4174_v43 = vld [vmem:[#allocation8 + $0xa8] sm:$0xff]   ;;  %v4175_v56 = vld [vmem:[#allocation8 + $0x70] sm:$0xff]  }
 0x13d   :  { %1989 = vmatprep.subr.bf16.mxu0 %v3782_v44  ;;  %2032 = vmatprep.subr.bf16.mxu1 %v3784_v45  ;;  %v4176_v45 = vld [vmem:[#allocation8 + $0xf0] sm:$0xff]  }
 0x140   :  { %1990 = vmatpush1.bf16.msra.mxu0 %v3781_v50  ;;  %2033 = vmatpush1.bf16.msra.mxu1 %v3783_v51 }
 0x141   :  { %1991 = vmatprep.subr.bf16.mxu0 %v3798_v52  ;;  %2034 = vmatprep.subr.bf16.mxu1 %v3800_v53  ;;  %v4177_v53 = vld [vmem:[#allocation8 + $0x30] sm:$0xff]  }
 0x144   :  { %1992 = vmatpush1.bf16.msra.mxu0 %v3797_v59  ;;  %2035 = vmatpush1.bf16.msra.mxu1 %v3799_v60  ;;  %v4178_v60 = vld [vmem:[#allocation8 + $0xb0] sm:$0xff]  }
 0x145   :  { %1993 = vmatprep.subr.bf16.mxu0 %v3814_v61  ;;  %2036 = vmatprep.subr.bf16.mxu1 %v3816_v62  ;;  %v4179_v61 = vld [vmem:[#allocation8 + $0x78] sm:$0xff]  }
 0x148   :  { %1994 = vmatpush1.bf16.msra.mxu0 %v3813_v3  ;;  %2037 = vmatpush1.bf16.msra.mxu1 %v3815_v4  ;;  %v4180_v3 = vld [vmem:[#allocation8 + $0xf8] sm:$0xff]  }
 0x149   :  { %1995 = vmatprep.subr.bf16.mxu0 %v3830_v5  ;;  %2038 = vmatprep.subr.bf16.mxu1 %v3832_v6 }
 0x14c   :  { %1996 = vmatpush1.bf16.msra.mxu0 %v3829_v7  ;;  %2039 = vmatpush1.bf16.msra.mxu1 %v3831_v8  ;;  %v4181_v8 = vld [vmem:[#allocation8 + $0x38] sm:$0xff]  }
 0x14d   :  { %3962 = vmatprep.subr.bf16.mxu0 %v4151_v9  ;;  %3984 = vmatprep.subr.bf16.mxu1 %v4152_v11  ;;  %v4182_v11 = vld [vmem:[#allocation8 + $0xb8] sm:$0xff]  }
 0x14f   :  { %1998 = vmatmul.mubr.bf16.vlgmr.msra.gmra.mrb[12].mxu0 %v4578_v23  ;;  %2041 = vmatmul.mubr.bf16.vlgmr.msra.gmra.mrb[12].mxu1 %v4578_v23  ;;  %v4165_v23 = vld [vmem:[#allocation8 + $0x18] sm:$0xff]  }
 0x150   :  { %3963 = vmatpush3.bf16.msra.mxu0 %v4153_v12  ;;  %3985 = vmatpush3.bf16.msra.mxu1 %v4154_v13  ;;  %v4183_v12 = vld [vmem:[#allocation8 + $0x140] sm:$0xff]  }
 0x151   :  { %3964 = vmatprep.subr.bf16.mxu0 %v4155_v14  ;;  %3986 = vmatprep.subr.bf16.mxu1 %v4156_v15  ;;  %v4184_v14 = vld [vmem:[#allocation8 + $0x1c0] sm:$0xff]  }
 0x154   :  { %3965 = vmatpush3.bf16.msra.mxu0 %v4157_v16  ;;  %3987 = vmatpush3.bf16.msra.mxu1 %v4158_v17 }
 0x155   :  { %3966 = vmatprep.subr.bf16.mxu0 %v4159_v18  ;;  %3988 = vmatprep.subr.bf16.mxu1 %v4160_v19 }
 0x158   :  { %3967 = vmatpush3.bf16.msra.mxu0 %v4161_v21  ;;  %3989 = vmatpush3.bf16.msra.mxu1 %v4162_v22 }
 0x159   :  { %3968 = vmatprep.subr.bf16.mxu0 %v4163_v24  ;;  %3990 = vmatprep.subr.bf16.mxu1 %v4164_v25 }
 0x15c   :  { %3969 = vmatpush3.bf16.msra.mxu0 %v4165_v23  ;;  %3991 = vmatpush3.bf16.msra.mxu1 %v4166_v27 }
 0x15d   :  { %3970 = vmatprep.subr.bf16.mxu0 %v4167_v28  ;;  %3992 = vmatprep.subr.bf16.mxu1 %v4168_v29 }
 0x160   :  { %3971 = vmatpush3.bf16.msra.mxu0 %v4169_v34  ;;  %3993 = vmatpush3.bf16.msra.mxu1 %v4170_v35 }
 0x161   :  { %3972 = vmatprep.subr.bf16.mxu0 %v4171_v36  ;;  %3994 = vmatprep.subr.bf16.mxu1 %v4172_v37 }
 0x162   :  { %v1741_v44 = vpop.f32.mrb[0].mxu0  ;;  %v1784_v47 = vpop.f32.mrb[0].mxu1 }
 0x163   :  { %v1742_v46 = vadd.f32 %v1741_v44, %v340_v38  ;;  %v1743_v48 = vpop.f32.mrb[1].mxu0  ;;  %v1785_v49 = vadd.f32 %v1784_v47, %v348_v39  ;;  %v1786_v51 = vpop.f32.mrb[1].mxu1 }
 0x164   :  { %v1744_v50 = vadd.f32 %v1743_v48, %v344_v40  ;;  %v1745_v52 = vpop.f32.mrb[2].mxu0  ;;  %3973 = vmatpush3.bf16.msra.mxu0 %v4173_v41  ;;  %v1787_v55 = vadd.f32 %v1786_v51, %v352_v42  ;;  %v1788_v58 = vpop.f32.mrb[2].mxu1  ;;  %3995 = vmatpush3.bf16.msra.mxu1 %v4174_v43  ;;  %v4186_v48 = vld [vmem:[#allocation8 + $0x180] sm:$0xff]   ;;  %v4189_v51 = vld [vmem:[#allocation8 + $0x108] sm:$0xff]  }
 0x165   :  { %v2051_v54 = vmul.f32 0.5, %v1742_v46  ;;  %v1746_v57 = vadd.f32 %v1745_v52, %v340_v38  ;;  %v1747_v59 = vpop.f32.mrb[3].mxu0  ;;  %3974 = vmatprep.subr.bf16.mxu0 %v4175_v56  ;;  %v2053_v62 = vmul.f32 0.5, %v1785_v49  ;;  %v1789_v0 = vadd.f32 %v1788_v58, %v348_v39  ;;  %v1790_v2 = vpop.f32.mrb[3].mxu1  ;;  %3996 = vmatprep.subr.bf16.mxu1 %v4176_v45  ;;  %v4185_v46 = vld [vmem:[#allocation8 + $0x100] sm:$0xff]   ;;  %v4187_v49 = vld [vmem:[#allocation8 + $0x148] sm:$0xff]  }
 0x166   :  { %v2052_v63 = vmul.f32 0.5, %v1744_v50  ;;  %v1748_v1 = vadd.f32 %v1747_v59, %v344_v40  ;;  %v2054_v4 = vmul.f32 0.5, %v1787_v55  ;;  %v1791_v6 = vadd.f32 %v1790_v2, %v352_v42  ;;  %v4188_v50 = vld [vmem:[#allocation8 + $0x1c8] sm:$0xff]   ;;  %v4193_v55 = vld [vmem:[#allocation8 + $0x110] sm:$0xff]   ;;  %v4195_v58 = vld [vmem:[#allocation8 + $0x158] sm:$0xff]  }
 0x167   :  { %4279 = vtanh.f32 %v2051_v54  ;;  %v2067_v5 = vmul.f32 0.5, %v1746_v57  ;;  %v2069_v7 = vmul.f32 0.5, %v1789_v0  ;;  %v4190_v52 = vld [vmem:[#allocation8 + $0x188] sm:$0xff]   ;;  %v4192_v54 = vld [vmem:[#allocation8 + $0x1d0] sm:$0xff]   ;;  %v4196_v59 = vld [vmem:[#allocation8 + $0x1d8] sm:$0xff]  }
 0x168   :  { %4281 = vtanh.f32 %v2053_v62  ;;  %3975 = vmatpush3.bf16.msra.mxu0 %v4177_v53  ;;  %v2068_v9 = vmul.f32 0.5, %v1748_v1  ;;  %3997 = vmatpush3.bf16.msra.mxu1 %v4178_v60  ;;  %v2070_v13 = vmul.f32 0.5, %v1791_v6  ;;  %v4191_v53 = vld [vmem:[#allocation8 + $0x150] sm:$0xff]   ;;  %v4197_v60 = vld [vmem:[#allocation8 + $0x118] sm:$0xff]   ;;  %v4199_v62 = vld [vmem:[#allocation8 + $0x160] sm:$0xff]  }
 0x169   :  { %4283 = vtanh.f32 %v2052_v63  ;;  %3976 = vmatprep.subr.bf16.mxu0 %v4179_v61  ;;  %3998 = vmatprep.subr.bf16.mxu1 %v4180_v3  ;;  %v4194_v57 = vld [vmem:[#allocation8 + $0x190] sm:$0xff]   ;;  %v4198_v61 = vld [vmem:[#allocation8 + $0x198] sm:$0xff]   ;;  %v4200_v63 = vld [vmem:[#allocation8 + $0x1e0] sm:$0xff]  }
 0x16a   :  { %4285 = vtanh.f32 %v2054_v4  ;;  %v4201_v0 = vld [vmem:[#allocation8 + $0x120] sm:$0xff]   ;;  %v4203_v2 = vld [vmem:[#allocation8 + $0x168] sm:$0xff]   ;;  %v4207_v6 = vld [vmem:[#allocation8 + $0x170] sm:$0xff]  }
 0x16b   :  { %4287 = vtanh.f32 %v2067_v5  ;;  %v4202_v1 = vld [vmem:[#allocation8 + $0x1a0] sm:$0xff]   ;;  %v4204_v3 = vld [vmem:[#allocation8 + $0x1e8] sm:$0xff]  }
 0x16c   :  { %4289 = vtanh.f32 %v2069_v7  ;;  %3977 = vmatpush3.bf16.msra.mxu0 %v4181_v8  ;;  %3999 = vmatpush3.bf16.msra.mxu1 %v4182_v11  ;;  %v4205_v4 = vld [vmem:[#allocation8 + $0x128] sm:$0xff]   ;;  %v4208_v7 = vld [vmem:[#allocation8 + $0x1f0] sm:$0xff]   ;;  %v4211_v11 = vld [vmem:[#allocation8 + $0x178] sm:$0xff]  }
 0x16d   :  { %4291 = vtanh.f32 %v2068_v9  ;;  %4006 = vmatprep.subr.bf16.mxu0 %v4183_v12  ;;  %4028 = vmatprep.subr.bf16.mxu1 %v4184_v14  ;;  %v4206_v5 = vld [vmem:[#allocation8 + $0x1a8] sm:$0xff]   ;;  %v4209_v8 = vld [vmem:[#allocation8 + $0x130] sm:$0xff]   ;;  %v4212_v12 = vld [vmem:[#allocation8 + $0x1f8] sm:$0xff]  }
 0x16e   :  { %4293 = vtanh.f32 %v2070_v13  ;;  %v4210_v9 = vld [vmem:[#allocation8 + $0x1b0] sm:$0xff]   ;;  %v4213_v13 = vld [vmem:[#allocation8 + $0x138] sm:$0xff]  }
 0x16f   :  { %v4214_v14 = vld [vmem:[#allocation8 + $0x1b8] sm:$0xff]  }
 0x171   :  { %v4280_v15 = vpop.eup %4279 }
 0x172   :  { %v4282_v16 = vpop.eup %4281  ;;  %v2115_v17 = vmul.f32 0.5, %v4280_v15  ;;  %v4215_v15 = vld [vmem:[#allocation8 + $0x240] sm:$0xff]  }
 0x173   :  { %v4284_v18 = vpop.eup %4283  ;;  %v2117_v19 = vmul.f32 0.5, %v4282_v16  ;;  %v4216_v16 = vld [vmem:[#allocation8 + $0x2c0] sm:$0xff]  }
 0x174   :  { %v4286_v20 = vpop.eup %4285  ;;  %v2147_v25 = vadd.f32 0.5, %v2115_v17  ;;  %v2116_v23 = vmul.f32 0.5, %v4284_v18  ;;  %v355_v17 = vsub.s32 4, %v4584_v26  ;;  %v363_v18 = vsub.s32 6, %v4584_v26 }
 0x175   :  { %v4288_v21 = vpop.eup %4287  ;;  %v2118_v22 = vmul.f32 0.5, %v4286_v20  ;;  %v2149_v29 = vadd.f32 0.5, %v2117_v19  ;;  %v359_v19 = vsub.s32 5, %v4584_v26  ;;  %v367_v20 = vsub.s32 7, %v4584_v26 }
 0x176   :  { %v4290_v24 = vpop.eup %4289  ;;  %v2131_v27 = vmul.f32 0.5, %v4288_v21  ;;  %v2148_v41 = vadd.f32 0.5, %v2116_v23  ;;  %v356_v21 = vrot.slane %v4587_v31, %v355_v17 }
 0x177   :  { %v4292_v28 = vpop.eup %4291  ;;  %v2133_v34 = vmul.f32 0.5, %v4290_v24  ;;  %v2150_v38 = vadd.f32 0.5, %v2118_v22  ;;  %v364_v22 = vrot.slane %v4587_v31, %v363_v18  ;;  %v360_v24 = vrot.slane %v4587_v31, %v359_v19 }
 0x178   :  { %v4294_v35 = vpop.eup %4293  ;;  %v2163_v36 = vadd.f32 0.5, %v2131_v27  ;;  %v2132_v37 = vmul.f32 0.5, %v4292_v28 }
 0x179   :  { %v2165_v39 = vadd.f32 0.5, %v2133_v34  ;;  %v2134_v40 = vmul.f32 0.5, %v4294_v35 }
 0x17a   :  { %v2179_v42 = vpack.c.bf16 %v2163_v36, %v2147_v25  ;;  %v2164_v43 = vadd.f32 0.5, %v2132_v37  ;;  %v368_v25 = vrot.slane %v4587_v31, %v367_v20 }
 0x17b   :  { %v2181_v56 = vpack.c.bf16 %v2165_v39, %v2149_v29  ;;  %v2166_v44 = vadd.f32 0.5, %v2134_v40 }
 0x17c   :  { %v2180_v45 = vpack.c.bf16 %v2164_v43, %v2148_v41 }
 0x17d   :  { %v2182_v47 = vpack.c.bf16 %v2166_v44, %v2150_v38 }
 0x17e   :  { %3258 = vmatprep.mubr.bf16.mxu0 %v2180_v45 }
 0x17f   :  { %3299 = vmatprep.mubr.bf16.mxu1 %v2182_v47  ;;  %3259 = vmatmul.mubr.bf16.vlgmr.msra.gmra.mrb[16].mxu0 %v2179_v42 }
 0x180   :  { %3300 = vmatmul.mubr.bf16.vlgmr.msra.gmra.mrb[16].mxu1 %v2181_v56  ;;  %4007 = vmatpush3.bf16.msra.mxu0 %v4185_v46 }
 0x181   :  { %4029 = vmatpush3.bf16.msra.mxu1 %v4186_v48  ;;  %4008 = vmatprep.subr.bf16.mxu0 %v4187_v49 }
 0x182   :  { %4030 = vmatprep.subr.bf16.mxu1 %v4188_v50 }
 0x184   :  { %4009 = vmatpush3.bf16.msra.mxu0 %v4189_v51 }
 0x185   :  { %4031 = vmatpush3.bf16.msra.mxu1 %v4190_v52  ;;  %4010 = vmatprep.subr.bf16.mxu0 %v4191_v53 }
 0x186   :  { %4032 = vmatprep.subr.bf16.mxu1 %v4192_v54 }
 0x188   :  { %4011 = vmatpush3.bf16.msra.mxu0 %v4193_v55 }
 0x189   :  { %4033 = vmatpush3.bf16.msra.mxu1 %v4194_v57  ;;  %4012 = vmatprep.subr.bf16.mxu0 %v4195_v58 }
 0x18a   :  { %4034 = vmatprep.subr.bf16.mxu1 %v4196_v59 }
 0x18c   :  { %4013 = vmatpush3.bf16.msra.mxu0 %v4197_v60 }
 0x18d   :  { %4035 = vmatpush3.bf16.msra.mxu1 %v4198_v61  ;;  %4014 = vmatprep.subr.bf16.mxu0 %v4199_v62 }
 0x18e   :  { %4036 = vmatprep.subr.bf16.mxu1 %v4200_v63 }
 0x190   :  { %4015 = vmatpush3.bf16.msra.mxu0 %v4201_v0 }
 0x191   :  { %4037 = vmatpush3.bf16.msra.mxu1 %v4202_v1  ;;  %4016 = vmatprep.subr.bf16.mxu0 %v4203_v2 }
 0x192   :  { %4038 = vmatprep.subr.bf16.mxu1 %v4204_v3 }
 0x194   :  { %4017 = vmatpush3.bf16.msra.mxu0 %v4205_v4 }
 0x195   :  { %4039 = vmatpush3.bf16.msra.mxu1 %v4206_v5  ;;  %4018 = vmatprep.subr.bf16.mxu0 %v4207_v6 }
 0x196   :  { %4040 = vmatprep.subr.bf16.mxu1 %v4208_v7 }
 0x198   :  { %4019 = vmatpush3.bf16.msra.mxu0 %v4209_v8 }
 0x199   :  { %4041 = vmatpush3.bf16.msra.mxu1 %v4210_v9  ;;  %4020 = vmatprep.subr.bf16.mxu0 %v4211_v11 }
 0x19a   :  { %4042 = vmatprep.subr.bf16.mxu1 %v4212_v12 }
 0x19c   :  { %4021 = vmatpush3.bf16.msra.mxu0 %v4213_v13 }
 0x19d   :  { %4043 = vmatpush3.bf16.msra.mxu1 %v4214_v14  ;;  %4050 = vmatprep.subr.bf16.mxu0 %v4215_v15 }
 0x19e   :  { %4072 = vmatprep.subr.bf16.mxu1 %v4216_v16 }
 0x1a2   :  { %v1827_v23 = vpop.f32.mrb[4].mxu0  ;;  %v1870_v28 = vpop.f32.mrb[4].mxu1 }
 0x1a3   :  { %v1828_v27 = vadd.f32 %v1827_v23, %v356_v21  ;;  %v1829_v29 = vpop.f32.mrb[5].mxu0  ;;  %v1871_v34 = vadd.f32 %v1870_v28, %v364_v22  ;;  %v1872_v36 = vpop.f32.mrb[5].mxu1  ;;  %v4220_v23 = vld [vmem:[#allocation8 + $0x2c8] sm:$0xff]  }
 0x1a4   :  { %v1830_v35 = vadd.f32 %v1829_v29, %v360_v24  ;;  %v1831_v37 = vpop.f32.mrb[6].mxu0  ;;  %v1873_v39 = vadd.f32 %v1872_v36, %v368_v25  ;;  %v1874_v41 = vpop.f32.mrb[6].mxu1  ;;  %v4222_v28 = vld [vmem:[#allocation8 + $0x288] sm:$0xff]   ;;  %v4223_v29 = vld [vmem:[#allocation8 + $0x250] sm:$0xff]  }
 0x1a5   :  { %v2055_v38 = vmul.f32 0.5, %v1828_v27  ;;  %v1832_v40 = vadd.f32 %v1831_v37, %v356_v21  ;;  %v1833_v42 = vpop.f32.mrb[7].mxu0  ;;  %v2057_v43 = vmul.f32 0.5, %v1871_v34  ;;  %v1875_v44 = vadd.f32 %v1874_v41, %v364_v22  ;;  %v1876_v46 = vpop.f32.mrb[7].mxu1  ;;  %v4217_v21 = vld [vmem:[#allocation8 + $0x200] sm:$0xff]   ;;  %v4221_v27 = vld [vmem:[#allocation8 + $0x208] sm:$0xff]  }
 0x1a6   :  { %v2056_v56 = vmul.f32 0.5, %v1830_v35  ;;  %v1834_v45 = vadd.f32 %v1833_v42, %v360_v24  ;;  %v2058_v31 = vmul.f32 0.5, %v1873_v39  ;;  %v1877_v48 = vadd.f32 %v1876_v46, %v368_v25  ;;  %v4218_v24 = vld [vmem:[#allocation8 + $0x280] sm:$0xff]   ;;  %v4219_v25 = vld [vmem:[#allocation8 + $0x248] sm:$0xff]   ;;  %v4224_v34 = vld [vmem:[#allocation8 + $0x2d0] sm:$0xff]  }
 0x1a7   :  { %4295 = vtanh.f32 %v2055_v38  ;;  %v2071_v47 = vmul.f32 0.5, %v1832_v40  ;;  %v2073_v49 = vmul.f32 0.5, %v1875_v44  ;;  %v4225_v35 = vld [vmem:[#allocation8 + $0x210] sm:$0xff]   ;;  %v4227_v37 = vld [vmem:[#allocation8 + $0x258] sm:$0xff]   ;;  %v4231_v41 = vld [vmem:[#allocation8 + $0x260] sm:$0xff]  }
 0x1a8   :  { %4297 = vtanh.f32 %v2057_v43  ;;  %v2072_v50 = vmul.f32 0.5, %v1834_v45  ;;  %v2074_v51 = vmul.f32 0.5, %v1877_v48  ;;  %v4226_v36 = vld [vmem:[#allocation8 + $0x290] sm:$0xff]   ;;  %v4228_v38 = vld [vmem:[#allocation8 + $0x2d8] sm:$0xff]   ;;  %v4232_v42 = vld [vmem:[#allocation8 + $0x2e0] sm:$0xff]  }
 0x1a9   :  { %4299 = vtanh.f32 %v2056_v56  ;;  %v4229_v39 = vld [vmem:[#allocation8 + $0x218] sm:$0xff]   ;;  %v4233_v43 = vld [vmem:[#allocation8 + $0x220] sm:$0xff]   ;;  %v4235_v44 = vld [vmem:[#allocation8 + $0x268] sm:$0xff]  }
 0x1aa   :  { %4301 = vtanh.f32 %v2058_v31  ;;  %v4230_v40 = vld [vmem:[#allocation8 + $0x298] sm:$0xff]   ;;  %v4234_v56 = vld [vmem:[#allocation8 + $0x2a0] sm:$0xff]   ;;  %v4236_v45 = vld [vmem:[#allocation8 + $0x2e8] sm:$0xff]  }
 0x1ab   :  { %4303 = vtanh.f32 %v2071_v47  ;;  %v4237_v46 = vld [vmem:[#allocation8 + $0x228] sm:$0xff]   ;;  %v4239_v47 = vld [vmem:[#allocation8 + $0x270] sm:$0xff]  }
 0x1ac   :  { %4305 = vtanh.f32 %v2073_v49  ;;  %v4238_v31 = vld [vmem:[#allocation8 + $0x2a8] sm:$0xff]   ;;  %v4240_v48 = vld [vmem:[#allocation8 + $0x2f0] sm:$0xff]  }
 0x1ad   :  { %4307 = vtanh.f32 %v2072_v50  ;;  %v4241_v49 = vld [vmem:[#allocation8 + $0x230] sm:$0xff]  }
 0x1ae   :  { %4309 = vtanh.f32 %v2074_v51  ;;  %v4242_v50 = vld [vmem:[#allocation8 + $0x2b0] sm:$0xff]   ;;  %v4243_v51 = vld [vmem:[#allocation8 + $0x278] sm:$0xff]  }
 0x1b1   :  { %v4296_v52 = vpop.eup %4295 }
 0x1b2   :  { %v4298_v53 = vpop.eup %4297  ;;  %v2119_v54 = vmul.f32 0.5, %v4296_v52  ;;  %v4244_v52 = vld [vmem:[#allocation8 + $0x2f8] sm:$0xff]  }
 0x1b3   :  { %v4300_v55 = vpop.eup %4299  ;;  %v2121_v57 = vmul.f32 0.5, %v4298_v53  ;;  %v4245_v53 = vld [vmem:[#allocation8 + $0x238] sm:$0xff]  }
 0x1b4   :  { %v4302_v58 = vpop.eup %4301  ;;  %v2151_v62 = vadd.f32 0.5, %v2119_v54  ;;  %v2120_v63 = vmul.f32 0.5, %v4300_v55  ;;  %v4246_v54 = vld [vmem:[#allocation8 + $0x2b8] sm:$0xff]   ;;  %v4247_v55 = vld [vmem:[#allocation8 + $0x340] sm:$0xff]  }
 0x1b5   :  { %v4304_v59 = vpop.eup %4303  ;;  %v2122_v60 = vmul.f32 0.5, %v4302_v58  ;;  %v2153_v2 = vadd.f32 0.5, %v2121_v57  ;;  %v4248_v57 = vld [vmem:[#allocation8 + $0x3c0] sm:$0xff]   ;;  %v4620_v58 = vld [vmem:[#allocation7 + $0x8] sm:$0xff] }
 0x1b6   :  { %v4306_v61 = vpop.eup %4305  ;;  %v2135_v0 = vmul.f32 0.5, %v4304_v59  ;;  %v2152_v11 = vadd.f32 0.5, %v2120_v63  ;;  %v372_v59 = vrot.slane %v4620_v58, %v339_v30 }
 0x1b7   :  { %v4308_v1 = vpop.eup %4307  ;;  %v2137_v3 = vmul.f32 0.5, %v4306_v61  ;;  %v2154_v7 = vadd.f32 0.5, %v2122_v60  ;;  %v380_v60 = vrot.slane %v4620_v58, %v347_v32  ;;  %v376_v61 = vrot.slane %v4620_v58, %v343_v33 }
 0x1b8   :  { %v4310_v4 = vpop.eup %4309  ;;  %v2167_v5 = vadd.f32 0.5, %v2135_v0  ;;  %v2136_v6 = vmul.f32 0.5, %v4308_v1 }
 0x1b9   :  { %v2169_v8 = vadd.f32 0.5, %v2137_v3  ;;  %v2138_v9 = vmul.f32 0.5, %v4310_v4 }
 0x1ba   :  { %v2183_v12 = vpack.c.bf16 %v2167_v5, %v2151_v62  ;;  %v2168_v13 = vadd.f32 0.5, %v2136_v6  ;;  %v384_v62 = vrot.slane %v4620_v58, %v351_v10 }
 0x1bb   :  { %v2185_v14 = vpack.c.bf16 %v2169_v8, %v2153_v2  ;;  %v2170_v15 = vadd.f32 0.5, %v2138_v9 }
 0x1bc   :  { %v2184_v16 = vpack.c.bf16 %v2168_v13, %v2152_v11 }
 0x1bd   :  { %v2186_v22 = vpack.c.bf16 %v2170_v15, %v2154_v7 }
 0x1be   :  { %3340 = vmatprep.mubr.bf16.mxu0 %v2184_v16 }
 0x1bf   :  { %3381 = vmatprep.mubr.bf16.mxu1 %v2186_v22  ;;  %3341 = vmatmul.mubr.bf16.vlgmr.msra.gmra.mrb[20].mxu0 %v2183_v12 }
 0x1c0   :  { %3382 = vmatmul.mubr.bf16.vlgmr.msra.gmra.mrb[20].mxu1 %v2185_v14  ;;  %4051 = vmatpush3.bf16.msra.mxu0 %v4217_v21 }
 0x1c1   :  { %4073 = vmatpush3.bf16.msra.mxu1 %v4218_v24  ;;  %4052 = vmatprep.subr.bf16.mxu0 %v4219_v25 }
 0x1c2   :  { %4074 = vmatprep.subr.bf16.mxu1 %v4220_v23 }
 0x1c4   :  { %4053 = vmatpush3.bf16.msra.mxu0 %v4221_v27 }
 0x1c5   :  { %4075 = vmatpush3.bf16.msra.mxu1 %v4222_v28  ;;  %4054 = vmatprep.subr.bf16.mxu0 %v4223_v29 }
 0x1c6   :  { %4076 = vmatprep.subr.bf16.mxu1 %v4224_v34 }
 0x1c8   :  { %4055 = vmatpush3.bf16.msra.mxu0 %v4225_v35 }
 0x1c9   :  { %4077 = vmatpush3.bf16.msra.mxu1 %v4226_v36  ;;  %4056 = vmatprep.subr.bf16.mxu0 %v4227_v37 }
 0x1ca   :  { %4078 = vmatprep.subr.bf16.mxu1 %v4228_v38 }
 0x1cc   :  { %4057 = vmatpush3.bf16.msra.mxu0 %v4229_v39 }
 0x1cd   :  { %4079 = vmatpush3.bf16.msra.mxu1 %v4230_v40  ;;  %4058 = vmatprep.subr.bf16.mxu0 %v4231_v41 }
 0x1ce   :  { %4080 = vmatprep.subr.bf16.mxu1 %v4232_v42 }
 0x1d0   :  { %4059 = vmatpush3.bf16.msra.mxu0 %v4233_v43 }
 0x1d1   :  { %4081 = vmatpush3.bf16.msra.mxu1 %v4234_v56  ;;  %4060 = vmatprep.subr.bf16.mxu0 %v4235_v44 }
 0x1d2   :  { %4082 = vmatprep.subr.bf16.mxu1 %v4236_v45 }
 0x1d4   :  { %4061 = vmatpush3.bf16.msra.mxu0 %v4237_v46 }
 0x1d5   :  { %4083 = vmatpush3.bf16.msra.mxu1 %v4238_v31  ;;  %4062 = vmatprep.subr.bf16.mxu0 %v4239_v47 }
 0x1d6   :  { %4084 = vmatprep.subr.bf16.mxu1 %v4240_v48 }
 0x1d8   :  { %4063 = vmatpush3.bf16.msra.mxu0 %v4241_v49 }
 0x1d9   :  { %4085 = vmatpush3.bf16.msra.mxu1 %v4242_v50  ;;  %4064 = vmatprep.subr.bf16.mxu0 %v4243_v51 }
 0x1da   :  { %4086 = vmatprep.subr.bf16.mxu1 %v4244_v52 }
 0x1dc   :  { %4065 = vmatpush3.bf16.msra.mxu0 %v4245_v53 }
 0x1dd   :  { %4087 = vmatpush3.bf16.msra.mxu1 %v4246_v54  ;;  %4094 = vmatprep.subr.bf16.mxu0 %v4247_v55  ;;  %v4249_v54 = vld [vmem:[#allocation8 + $0x300] sm:$0xff]  }
 0x1de   :  { %4116 = vmatprep.subr.bf16.mxu1 %v4248_v57  ;;  %v4250_v57 = vld [vmem:[#allocation8 + $0x380] sm:$0xff]  }
 0x1e2   :  { %v1913_v63 = vpop.f32.mrb[8].mxu0  ;;  %v1956_v1 = vpop.f32.mrb[8].mxu1 }
 0x1e3   :  { %v1914_v0 = vadd.f32 %v1913_v63, %v372_v59  ;;  %v1915_v2 = vpop.f32.mrb[9].mxu0  ;;  %v1957_v3 = vadd.f32 %v1956_v1, %v380_v60  ;;  %v1958_v5 = vpop.f32.mrb[9].mxu1  ;;  %v4255_v63 = vld [vmem:[#allocation8 + $0x350] sm:$0xff]  }
 0x1e4   :  { %v1916_v4 = vadd.f32 %v1915_v2, %v376_v61  ;;  %v1917_v30 = vpop.f32.mrb[10].mxu0  ;;  %v1959_v7 = vadd.f32 %v1958_v5, %v384_v62  ;;  %v1960_v32 = vpop.f32.mrb[10].mxu1  ;;  %v4257_v1 = vld [vmem:[#allocation8 + $0x310] sm:$0xff]   ;;  %v4261_v5 = vld [vmem:[#allocation8 + $0x318] sm:$0xff]  }
 0x1e5   :  { %v2059_v6 = vmul.f32 0.5, %v1914_v0  ;;  %v1918_v8 = vadd.f32 %v1917_v30, %v372_v59  ;;  %v1919_v9 = vpop.f32.mrb[11].mxu0  ;;  %v2061_v11 = vmul.f32 0.5, %v1957_v3  ;;  %v1961_v33 = vadd.f32 %v1960_v32, %v380_v60  ;;  %v1962_v14 = vpop.f32.mrb[11].mxu1  ;;  %v4251_v59 = vld [vmem:[#allocation8 + $0x348] sm:$0xff]   ;;  %v4256_v0 = vld [vmem:[#allocation8 + $0x3d0] sm:$0xff]  }
 0x1e6   :  { %v2060_v12 = vmul.f32 0.5, %v1916_v4  ;;  %v1920_v13 = vadd.f32 %v1919_v9, %v376_v61  ;;  %v2062_v10 = vmul.f32 0.5, %v1959_v7  ;;  %v1963_v16 = vadd.f32 %v1962_v14, %v384_v62  ;;  %v4252_v60 = vld [vmem:[#allocation8 + $0x3c8] sm:$0xff]   ;;  %v4258_v2 = vld [vmem:[#allocation8 + $0x390] sm:$0xff]   ;;  %v4259_v3 = vld [vmem:[#allocation8 + $0x358] sm:$0xff]  }
 0x1e7   :  { %4311 = vtanh.f32 %v2059_v6  ;;  %v2075_v15 = vmul.f32 0.5, %v1918_v8  ;;  %v2077_v21 = vmul.f32 0.5, %v1961_v33  ;;  %v4253_v61 = vld [vmem:[#allocation8 + $0x308] sm:$0xff]   ;;  %v4260_v4 = vld [vmem:[#allocation8 + $0x3d8] sm:$0xff]   ;;  %v4263_v6 = vld [vmem:[#allocation8 + $0x360] sm:$0xff]  }
 0x1e8   :  { %4313 = vtanh.f32 %v2061_v11  ;;  %v2076_v22 = vmul.f32 0.5, %v1920_v13  ;;  %v2078_v24 = vmul.f32 0.5, %v1963_v16  ;;  %v4254_v62 = vld [vmem:[#allocation8 + $0x388] sm:$0xff]   ;;  %v4262_v30 = vld [vmem:[#allocation8 + $0x398] sm:$0xff]   ;;  %v4264_v7 = vld [vmem:[#allocation8 + $0x3e0] sm:$0xff]  }
 0x1e9   :  { %4315 = vtanh.f32 %v2060_v12  ;;  %v4265_v8 = vld [vmem:[#allocation8 + $0x320] sm:$0xff]   ;;  %v4267_v9 = vld [vmem:[#allocation8 + $0x368] sm:$0xff]   ;;  %v4271_v13 = vld [vmem:[#allocation8 + $0x370] sm:$0xff]  }
 0x1ea   :  { %4317 = vtanh.f32 %v2062_v10  ;;  %v4266_v32 = vld [vmem:[#allocation8 + $0x3a0] sm:$0xff]   ;;  %v4268_v11 = vld [vmem:[#allocation8 + $0x3e8] sm:$0xff]   ;;  %v4272_v14 = vld [vmem:[#allocation8 + $0x3f0] sm:$0xff]  }
 0x1eb   :  { %4319 = vtanh.f32 %v2075_v15  ;;  %v4269_v12 = vld [vmem:[#allocation8 + $0x328] sm:$0xff]   ;;  %v4273_v10 = vld [vmem:[#allocation8 + $0x330] sm:$0xff]   ;;  %v4275_v16 = vld [vmem:[#allocation8 + $0x378] sm:$0xff]  }
 0x1ec   :  { %4321 = vtanh.f32 %v2077_v21  ;;  %v4270_v33 = vld [vmem:[#allocation8 + $0x3a8] sm:$0xff]   ;;  %v4274_v15 = vld [vmem:[#allocation8 + $0x3b0] sm:$0xff]   ;;  %v4276_v21 = vld [vmem:[#allocation8 + $0x3f8] sm:$0xff]  }
 0x1ed   :  { %4323 = vtanh.f32 %v2076_v22  ;;  %v4277_v22 = vld [vmem:[#allocation8 + $0x338] sm:$0xff]  }
 0x1ee   :  { %4325 = vtanh.f32 %v2078_v24  ;;  %v4278_v24 = vld [vmem:[#allocation8 + $0x3b8] sm:$0xff]  }
 0x1f1   :  { %v4312_v25 = vpop.eup %4311 }
 0x1f2   :  { %v4314_v23 = vpop.eup %4313  ;;  %v2123_v27 = vmul.f32 0.5, %v4312_v25  ;;  %v388_v25 = vrot.slane %v4620_v58, %v355_v17 }
 0x1f3   :  { %v4316_v28 = vpop.eup %4315  ;;  %v2125_v29 = vmul.f32 0.5, %v4314_v23  ;;  %v396_v23 = vrot.slane %v4620_v58, %v363_v18 }
 0x1f4   :  { %v4318_v34 = vpop.eup %4317  ;;  %v2155_v38 = vadd.f32 0.5, %v2123_v27  ;;  %v2124_v39 = vmul.f32 0.5, %v4316_v28  ;;  %v392_v27 = vrot.slane %v4620_v58, %v359_v19  ;;  %v400_v28 = vrot.slane %v4620_v58, %v367_v20 }
 0x1f5   :  { %v4320_v35 = vpop.eup %4319  ;;  %v2126_v36 = vmul.f32 0.5, %v4318_v34  ;;  %v2157_v42 = vadd.f32 0.5, %v2125_v29 }
 0x1f6   :  { %v4322_v37 = vpop.eup %4321  ;;  %v2139_v40 = vmul.f32 0.5, %v4320_v35  ;;  %v2156_v48 = vadd.f32 0.5, %v2124_v39 }
 0x1f7   :  { %v4324_v41 = vpop.eup %4323  ;;  %v2141_v43 = vmul.f32 0.5, %v4322_v37  ;;  %v2158_v46 = vadd.f32 0.5, %v2126_v36 }
 0x1f8   :  { %v4326_v56 = vpop.eup %4325  ;;  %v2171_v44 = vadd.f32 0.5, %v2139_v40  ;;  %v2140_v45 = vmul.f32 0.5, %v4324_v41 }
 0x1f9   :  { %v2173_v31 = vadd.f32 0.5, %v2141_v43  ;;  %v2142_v47 = vmul.f32 0.5, %v4326_v56 }
 0x1fa   :  { %v2187_v49 = vpack.c.bf16 %v2171_v44, %v2155_v38  ;;  %v2172_v50 = vadd.f32 0.5, %v2140_v45 }
 0x1fb   :  { %v2189_v51 = vpack.c.bf16 %v2173_v31, %v2157_v42  ;;  %v2174_v52 = vadd.f32 0.5, %v2142_v47 }
 0x1fc   :  { %v2188_v53 = vpack.c.bf16 %v2172_v50, %v2156_v48 }
 0x1fd   :  { %v2190_v55 = vpack.c.bf16 %v2174_v52, %v2158_v46 }
 0x1fe   :  { %3422 = vmatprep.mubr.bf16.mxu0 %v2188_v53 }
 0x1ff   :  { %3463 = vmatprep.mubr.bf16.mxu1 %v2190_v55  ;;  %3423 = vmatmul.mubr.bf16.vlgmr.msra.gmra.mrb[24].mxu0 %v2187_v49 }
 0x200   :  { %3464 = vmatmul.mubr.bf16.vlgmr.msra.gmra.mrb[24].mxu1 %v2189_v51  ;;  %4095 = vmatpush3.bf16.msra.mxu0 %v4249_v54 }
 0x201   :  { %4117 = vmatpush3.bf16.msra.mxu1 %v4250_v57  ;;  %4096 = vmatprep.subr.bf16.mxu0 %v4251_v59 }
 0x202   :  { %4118 = vmatprep.subr.bf16.mxu1 %v4252_v60 }
 0x204   :  { %4097 = vmatpush3.bf16.msra.mxu0 %v4253_v61 }
 0x205   :  { %4119 = vmatpush3.bf16.msra.mxu1 %v4254_v62  ;;  %4098 = vmatprep.subr.bf16.mxu0 %v4255_v63 }
 0x206   :  { %4120 = vmatprep.subr.bf16.mxu1 %v4256_v0 }
 0x208   :  { %4099 = vmatpush3.bf16.msra.mxu0 %v4257_v1 }
 0x209   :  { %4121 = vmatpush3.bf16.msra.mxu1 %v4258_v2  ;;  %4100 = vmatprep.subr.bf16.mxu0 %v4259_v3 }
 0x20a   :  { %4122 = vmatprep.subr.bf16.mxu1 %v4260_v4 }
 0x20c   :  { %4101 = vmatpush3.bf16.msra.mxu0 %v4261_v5 }
 0x20d   :  { %4123 = vmatpush3.bf16.msra.mxu1 %v4262_v30  ;;  %4102 = vmatprep.subr.bf16.mxu0 %v4263_v6 }
 0x20e   :  { %4124 = vmatprep.subr.bf16.mxu1 %v4264_v7 }
 0x210   :  { %4103 = vmatpush3.bf16.msra.mxu0 %v4265_v8 }
 0x211   :  { %4125 = vmatpush3.bf16.msra.mxu1 %v4266_v32  ;;  %4104 = vmatprep.subr.bf16.mxu0 %v4267_v9 }
 0x212   :  { %4126 = vmatprep.subr.bf16.mxu1 %v4268_v11 }
 0x214   :  { %4105 = vmatpush3.bf16.msra.mxu0 %v4269_v12 }
 0x215   :  { %4127 = vmatpush3.bf16.msra.mxu1 %v4270_v33  ;;  %4106 = vmatprep.subr.bf16.mxu0 %v4271_v13 }
 0x216   :  { %4128 = vmatprep.subr.bf16.mxu1 %v4272_v14 }
 0x218   :  { %4107 = vmatpush3.bf16.msra.mxu0 %v4273_v10  ;;  %v3833_v10 = vld [vmem:[%s4668_s4] ss:$0 sm:$0xff]  ;;  %s4472_s4 = smov [#allocation10]  }
 0x219   :  { %4129 = vmatpush3.bf16.msra.mxu1 %v4274_v15  ;;  %4108 = vmatprep.subr.bf16.mxu0 %v4275_v16  ;;  %s3561_s20 = sshll.u32 %s4472_s4, 4  ;;  %s3562_s20 = int_to_ptr.vmem [resolvable:$true] %s3561_s20 }
 0x21a   :  { %4130 = vmatprep.subr.bf16.mxu1 %v4276_v21  ;;  %s4433_s21 = scalar_lea.vmem %s3562_s20, 256  ;;  %p4438_p5 = scmp.lt.s32.totalorder %s3562_s20, %s3562_s20 }
 0x21b   :  { %p4434_p4 = scmp.ne.s32.totalorder %s3562_s20, %s4433_s21  ;;  %p4439_p6 = scmp.lt.s32.totalorder %s4433_s21, %s4433_s21 }
 0x21c   :  { %4109 = vmatpush3.bf16.msra.mxu0 %v4277_v22 }
 0x21d   :  { %4131 = vmatpush3.bf16.msra.mxu1 %v4278_v24  ;;  %p4440_p7 = por %p4439_p6, %p4438_p5 }
 0x21f   :  { %p4441_p8 = pnand %p4440_p7, %p4434_p4 }
 0x222   :  { %v1999_v29 = vpop.f32.mrb[12].mxu0  ;;  %v2042_v35 = vpop.f32.mrb[12].mxu1 }
 0x223   :  { %v2000_v34 = vadd.f32 %v1999_v29, %v388_v25  ;;  %v2001_v36 = vpop.f32.mrb[13].mxu0  ;;  %v2043_v37 = vadd.f32 %v2042_v35, %v396_v23  ;;  %v2044_v39 = vpop.f32.mrb[13].mxu1 }
 0x224   :  { %v2002_v38 = vadd.f32 %v2001_v36, %v392_v27  ;;  %v2003_v17 = vpop.f32.mrb[14].mxu0  ;;  %v2045_v41 = vadd.f32 %v2044_v39, %v400_v28  ;;  %v2046_v18 = vpop.f32.mrb[14].mxu1 }
 0x225   :  { %v2063_v40 = vmul.f32 0.5, %v2000_v34  ;;  %v2004_v42 = vadd.f32 %v2003_v17, %v388_v25  ;;  %v2005_v43 = vpop.f32.mrb[15].mxu0  ;;  %v2065_v56 = vmul.f32 0.5, %v2043_v37  ;;  %v2047_v19 = vadd.f32 %v2046_v18, %v396_v23  ;;  %v2048_v26 = vpop.f32.mrb[15].mxu1 }
 0x226   :  { %v2064_v44 = vmul.f32 0.5, %v2002_v38  ;;  %v2006_v45 = vadd.f32 %v2005_v43, %v392_v27  ;;  %v2066_v20 = vmul.f32 0.5, %v2045_v41  ;;  %v2049_v46 = vadd.f32 %v2048_v26, %v400_v28 }
 0x227   :  { %4327 = vtanh.f32 %v2063_v40  ;;  %v2079_v58 = vmul.f32 0.5, %v2004_v42  ;;  %v2081_v31 = vmul.f32 0.5, %v2047_v19 }
 0x228   :  { %4329 = vtanh.f32 %v2065_v56  ;;  %v2080_v47 = vmul.f32 0.5, %v2006_v45  ;;  %v2082_v48 = vmul.f32 0.5, %v2049_v46 }
 0x229   :  { %4331 = vtanh.f32 %v2064_v44 }
 0x22a   :  { %4333 = vtanh.f32 %v2066_v20 }
 0x22b   :  { %4335 = vtanh.f32 %v2079_v58 }
 0x22c   :  { %4337 = vtanh.f32 %v2081_v31 }
 0x22d   :  { %4339 = vtanh.f32 %v2080_v47 }
 0x22e   :  { %4341 = vtanh.f32 %v2082_v48 }
 0x231   :  { %v4328_v49 = vpop.eup %4327 }
 0x232   :  { %v4330_v50 = vpop.eup %4329  ;;  %v2127_v54 = vmul.f32 0.5, %v4328_v49 }
 0x233   :  { %v4332_v51 = vpop.eup %4331  ;;  %v2129_v52 = vmul.f32 0.5, %v4330_v50 }
 0x234   :  { %v4334_v53 = vpop.eup %4333  ;;  %v2128_v60 = vmul.f32 0.5, %v4332_v51  ;;  %v2159_v2 = vadd.f32 0.5, %v2127_v54 }
 0x235   :  { %v4336_v55 = vpop.eup %4335  ;;  %v2130_v57 = vmul.f32 0.5, %v4334_v53  ;;  %v2161_v63 = vadd.f32 0.5, %v2129_v52 }
 0x236   :  { %v4338_v59 = vpop.eup %4337  ;;  %v2143_v61 = vmul.f32 0.5, %v4336_v55  ;;  %v2160_v7 = vadd.f32 0.5, %v2128_v60 }
 0x237   :  { %v4340_v62 = vpop.eup %4339  ;;  %v2145_v0 = vmul.f32 0.5, %v4338_v59  ;;  %v2162_v5 = vadd.f32 0.5, %v2130_v57 }
 0x238   :  { %v4342_v1 = vpop.eup %4341  ;;  %v2175_v3 = vadd.f32 0.5, %v2143_v61  ;;  %v2144_v4 = vmul.f32 0.5, %v4340_v62 }
 0x239   :  { %v2177_v30 = vadd.f32 0.5, %v2145_v0  ;;  %v2146_v6 = vmul.f32 0.5, %v4342_v1 }
 0x23a   :  { %v2191_v8 = vpack.c.bf16 %v2175_v3, %v2159_v2  ;;  %v2176_v32 = vadd.f32 0.5, %v2144_v4 }
 0x23b   :  { %v2193_v9 = vpack.c.bf16 %v2177_v30, %v2161_v63  ;;  %v2178_v11 = vadd.f32 0.5, %v2146_v6 }
 0x23c   :  { %v2192_v12 = vpack.c.bf16 %v2176_v32, %v2160_v7 }
 0x23d   :  { %v2194_v33 = vpack.c.bf16 %v2178_v11, %v2162_v5 }
 0x23e   :  { %3504 = vmatprep.mubr.bf16.mxu0 %v2192_v12 }
 0x23f   :  { %3545 = vmatprep.mubr.bf16.mxu1 %v2194_v33  ;;  %3505 = vmatmul.mubr.bf16.vlgmr.msra.gmra.mrb[28].mxu0 %v2191_v8 }
 0x240   :  { %3546 = vmatmul.mubr.bf16.vlgmr.msra.gmra.mrb[28].mxu1 %v2193_v9 }
 0x252   :  { %v3978_v13 = vpop.f32.mrb[16].mxu0 }
 0x253   :  { %v4000_v14 = vpop.f32.mrb[16].mxu1  ;;  %v3979_v15 = vpop.f32.mrb[17].mxu0 }
 0x254   :  { %v3980_v16 = vadd.f32 %v3979_v15, %v3978_v13  ;;  %v4001_v21 = vpop.f32.mrb[17].mxu1  ;;  %v3981_v22 = vpop.f32.mrb[18].mxu0 }
 0x255   :  { %v4002_v24 = vadd.f32 %v4001_v21, %v4000_v14  ;;  %v4003_v25 = vpop.f32.mrb[18].mxu1  ;;  %v3982_v23 = vpop.f32.mrb[19].mxu0 }
 0x256   :  { %v3261_v27 = vadd.f32 %v3980_v16, %v3833_v10  ;;  %v3983_v28 = vadd.f32 %v3982_v23, %v3981_v22  ;;  %v4004_v29 = vpop.f32.mrb[19].mxu1 }
 0x257   :  { %v4005_v34 = vadd.f32 %v4004_v29, %v4003_v25 }
 0x258   :  { %v3302_v35 = vadd.f32 %v4002_v24, %v3261_v27  ;;  %v3264_v36 = vadd.f32 %v3983_v28, %v3833_v10 }
 0x25a   :  { %v3305_v37 = vadd.f32 %v4005_v34, %v3264_v36 }
 0x292   :  { %v4022_v38 = vpop.f32.mrb[20].mxu0 }
 0x293   :  { %v4044_v39 = vpop.f32.mrb[20].mxu1  ;;  %v4023_v17 = vpop.f32.mrb[21].mxu0 }
 0x294   :  { %v4024_v40 = vadd.f32 %v4023_v17, %v4022_v38  ;;  %v4045_v41 = vpop.f32.mrb[21].mxu1  ;;  %v4025_v42 = vpop.f32.mrb[22].mxu0 }
 0x295   :  { %v4046_v18 = vadd.f32 %v4045_v41, %v4044_v39  ;;  %v4047_v43 = vpop.f32.mrb[22].mxu1  ;;  %v4026_v56 = vpop.f32.mrb[23].mxu0 }
 0x296   :  { %v3343_v44 = vadd.f32 %v4024_v40, %v3302_v35  ;;  %v4027_v19 = vadd.f32 %v4026_v56, %v4025_v42  ;;  %v4048_v45 = vpop.f32.mrb[23].mxu1 }
 0x297   :  { %v4049_v26 = vadd.f32 %v4048_v45, %v4047_v43 }
 0x298   :  { %v3384_v20 = vadd.f32 %v4046_v18, %v3343_v44  ;;  %v3346_v58 = vadd.f32 %v4027_v19, %v3305_v37 }
 0x29a   :  { %v3387_v46 = vadd.f32 %v4049_v26, %v3346_v58 }
 0x2d2   :  { %v4066_v31 = vpop.f32.mrb[24].mxu0 }
 0x2d3   :  { %v4088_v47 = vpop.f32.mrb[24].mxu1  ;;  %v4067_v48 = vpop.f32.mrb[25].mxu0 }
 0x2d4   :  { %v4068_v49 = vadd.f32 %v4067_v48, %v4066_v31  ;;  %v4089_v50 = vpop.f32.mrb[25].mxu1  ;;  %v4069_v51 = vpop.f32.mrb[26].mxu0 }
 0x2d5   :  { %v4090_v52 = vadd.f32 %v4089_v50, %v4088_v47  ;;  %v4091_v53 = vpop.f32.mrb[26].mxu1  ;;  %v4070_v54 = vpop.f32.mrb[27].mxu0 }
 0x2d6   :  { %v3425_v55 = vadd.f32 %v4068_v49, %v3384_v20  ;;  %v4071_v57 = vadd.f32 %v4070_v54, %v4069_v51  ;;  %v4092_v59 = vpop.f32.mrb[27].mxu1 }
 0x2d7   :  { %v4093_v60 = vadd.f32 %v4092_v59, %v4091_v53 }
 0x2d8   :  { %v3466_v61 = vadd.f32 %v4090_v52, %v3425_v55  ;;  %v3428_v62 = vadd.f32 %v4071_v57, %v3387_v46 }
 0x2da   :  { %v3469_v63 = vadd.f32 %v4093_v60, %v3428_v62 }
 0x312   :  { %v4110_v0 = vpop.f32.mrb[28].mxu0 }
 0x313   :  { %v4132_v1 = vpop.f32.mrb[28].mxu1  ;;  %v4111_v2 = vpop.f32.mrb[29].mxu0 }
 0x314   :  { %v4112_v3 = vadd.f32 %v4111_v2, %v4110_v0  ;;  %v4133_v4 = vpop.f32.mrb[29].mxu1  ;;  %v4113_v5 = vpop.f32.mrb[30].mxu0 }
 0x315   :  { %v4134_v30 = vadd.f32 %v4133_v4, %v4132_v1  ;;  %v4135_v6 = vpop.f32.mrb[30].mxu1  ;;  %v4114_v7 = vpop.f32.mrb[31].mxu0 }
 0x316   :  { %v3507_v8 = vadd.f32 %v4112_v3, %v3466_v61  ;;  %v4115_v32 = vadd.f32 %v4114_v7, %v4113_v5  ;;  %v4136_v9 = vpop.f32.mrb[31].mxu1 }
 0x317   :  { %v4137_v11 = vadd.f32 %v4136_v9, %v4135_v6 }
 0x318   :  { %v3548_v12 = vadd.f32 %v4134_v30, %v3507_v8  ;;  %v3510_v33 = vadd.f32 %v4115_v32, %v3469_v63 }
 0x31a   :  { %3554 = vst [vmem:[#allocation10] sm:$0xff] %v3548_v12  ;;  %v3551_v13 = vadd.f32 %v4137_v11, %v3510_v33 }
 0x31c   :  { %3555 = vst [vmem:[#allocation10 + $0x8] sm:$0xff] %v3551_v13 }
 0x31d   :  { %4444 = shalt.err (!%p4441_p8)
}
 0x31e   :  { %s4445_s24 = scalar_lea.hbm %s4669_s5, 256 }
 0x31f   :  { %p4446_p9 = scmp.ne.s32.totalorder %s4669_s5, %s4445_s24  ;;  %p4449_p10 = scmp.lt.u32.totalorder %s4445_s24, %s4669_s5 }
 0x321   :  { %p4451_p11 = pnand %p4449_p10, %p4446_p9 }
 0x323   :  { %4454 = shalt.err (!%p4451_p11)
}
 0x324   :  { %3567 = dma.vmem_to_hbm [thread:$0]  %s3562_s20, 256, %s4669_s5, [#allocation4], %s4467_s1, %s4467_s1, %s4468_s17  }
 0x325   :  { %4461 = dma.done.wait [#allocation4], 256  }
 0x326   :  { %4462 = vsyncadd [#allocation4], 4294967040 }
 0x327   :  { %3571 = vsyncpa [#allocation3], 1 }
 0x328   :  { %3572 = vsyncpa [#allocation6], 1 }
 0x329   :  { %3573 = vsyncpa [#allocation9], 1 }
 0x32a   :  { %3574 = vsyncpa [#allocation4], 1 }

// kernel: tpu_custom_call.1
= control target key start
LH: loop header
LB: loop body
LE: loop exit
PB: predicated region body
PF: predicated region fallthrough
CT: control target
= control target key end

     0   :  { %10 = vsyncpa [#allocation3], 0  ;;  %s4664_s0 = inlined_call_operand.hbm [shape: bf16[16,256], index: 0, kind: input, shape index: {}]   ;;  %s4665_s1 = inlined_call_operand.hbm [shape: bf16[256,2048], index: 1, kind: input, shape index: {}]   ;;  %s4666_s2 = inlined_call_operand.hbm [shape: f32[1,2048], index: 2, kind: input, shape index: {}]   ;;  %s4667_s3 = inlined_call_operand.hbm [shape: bf16[2048,128], index: 3, kind: input, shape index: {}]   ;;  %s4668_s4 = inlined_call_operand.vmem [shape: f32[1,128], index: 4, kind: input, shape index: {}]   ;;  %s4669_s5 = inlined_call_operand.hbm [shape: f32[16,128], index: 5, kind: output, shape index: {}]  }
   0x1   :  { %11 = vsyncpa [#allocation6], 0 }
   0x2   :  { %12 = vsyncpa [#allocation9], 0 }
   0x3   :  { %13 = vsyncpa [#allocation4], 0  ;;  %s4463_s18 = smov [#allocation5]   ;;  %s4345_s22 = scalar_lea.hbm %s4665_s1, 32768 }
   0x4   :  { %s31_s19 = sshll.u32 %s4463_s18, 4  ;;  %p4346_p0 = scmp.ne.s32.totalorder %s4665_s1, %s4345_s22  ;;  %s32_s19 = int_to_ptr.vmem [resolvable:$true] %s31_s19 }
   0x5   :  { %p4349_p1 = scmp.lt.u32.totalorder %s4345_s22, %s4665_s1 }
   0x7   :  { %p4351_p2 = pnand %p4349_p1, %p4346_p0 }
   0x9   :  { %4354 = shalt.err (!%p4351_p2)
}
   0xa   :  { %s4355_s27 = scalar_lea.vmem %s32_s19, 32768  ;;  %p4360_p4 = scmp.lt.s32.totalorder %s32_s19, %s32_s19 }
   0xb   :  { %p4356_p3 = scmp.ne.s32.totalorder %s32_s19, %s4355_s27  ;;  %p4361_p5 = scmp.lt.s32.totalorder %s4355_s27, %s4355_s27 }
   0xd   :  { %p4362_p6 = por %p4361_p5, %p4360_p4 }
   0xf   :  { %p4363_p7 = pnand %p4362_p6, %p4356_p3 }
  0x11   :  { %4366 = shalt.err (!%p4363_p7)
}
  0x12   :  { %s4464_s28 = smov 1024   ;;  %s4465_s29 = smov 64  }
  0x13   :  { %37 = dma.hbm_to_vmem [thread:$0]  %s4665_s1, 32768, %s32_s19, [#allocation6], %s4464_s28, %s4464_s28, %s4465_s29  }
  0x14   :  { %s4466_s7 = smov [#allocation2]   ;;  %s4367_s11 = scalar_lea.hbm %s4664_s0, 256 }
  0x15   :  { %s19_s8 = sshll.u32 %s4466_s7, 4  ;;  %p4368_p8 = scmp.ne.s32.totalorder %s4664_s0, %s4367_s11  ;;  %s20_s8 = int_to_ptr.vmem [resolvable:$true] %s19_s8 }
  0x16   :  { %p4371_p9 = scmp.lt.u32.totalorder %s4367_s11, %s4664_s0 }
  0x18   :  { %p4373_p10 = pnand %p4371_p9, %p4368_p8 }
  0x1a   :  { %4376 = shalt.err (!%p4373_p10)
}
  0x1b   :  { %s4377_s16 = scalar_lea.vmem %s20_s8, 256  ;;  %p4382_p12 = scmp.lt.s32.totalorder %s20_s8, %s20_s8 }
  0x1c   :  { %p4378_p11 = scmp.ne.s32.totalorder %s20_s8, %s4377_s16  ;;  %p4383_p13 = scmp.lt.s32.totalorder %s4377_s16, %s4377_s16 }
  0x1e   :  { %p4384_p0 = por %p4383_p13, %p4382_p12 }
  0x20   :  { %p4385_p1 = pnand %p4384_p0, %p4378_p11 }
  0x22   :  { %4388 = shalt.err (!%p4385_p1)
}
  0x23   :  { %s4467_s1 = smov 128   ;;  %s4468_s17 = smov 8  }
  0x24   :  { %25 = dma.hbm_to_vmem [thread:$0]  %s4664_s0, 256, %s20_s8, [#allocation3], %s4467_s1, %s4467_s1, %s4468_s17  }
  0x25   :  { %s4469_s20 = smov [#allocation7]   ;;  %s4470_s22 = smov [#allocation8]  }
  0x26   :  { %s44_s21 = sshll.u32 %s4469_s20, 4  ;;  %s53_s23 = sshll.u32 %s4470_s22, 4  ;;  %s45_s21 = int_to_ptr.vmem [resolvable:$true] %s44_s21  ;;  %s4531_s23 = int_to_ptr.vmem [resolvable:$true] %s53_s23 }
  0x27   :  { %s4389_s26 = scalar_lea.hbm %s4666_s2, 256 }
  0x28   :  { %p4390_p2 = scmp.ne.s32.totalorder %s4666_s2, %s4389_s26  ;;  %p4393_p3 = scmp.lt.u32.totalorder %s4389_s26, %s4666_s2 }
  0x2a   :  { %p4395_p4 = pnand %p4393_p3, %p4390_p2 }
  0x2c   :  { %4398 = shalt.err (!%p4395_p4)
}
  0x2d   :  { %s4399_s0 = scalar_lea.vmem %s45_s21, 256  ;;  %p4404_p6 = scmp.lt.s32.totalorder %s45_s21, %s45_s21 }
  0x2e   :  { %p4400_p5 = scmp.ne.s32.totalorder %s45_s21, %s4399_s0  ;;  %p4405_p7 = scmp.lt.s32.totalorder %s4399_s0, %s4399_s0 }
  0x30   :  { %p4406_p8 = por %p4405_p7, %p4404_p6 }
  0x32   :  { %p4407_p9 = pnand %p4406_p8, %p4400_p5 }
  0x34   :  { %4410 = shalt.err (!%p4407_p9)
}
  0x35   :  { %47 = dma.hbm_to_vmem [thread:$0]  %s4666_s2, 256, %s45_s21, [#allocation6]  }
  0x36   :  { %s4411_s11 = scalar_lea.hbm %s4667_s3, 16384 }
  0x37   :  { %p4412_p10 = scmp.ne.s32.totalorder %s4667_s3, %s4411_s11  ;;  %p4415_p11 = scmp.lt.u32.totalorder %s4411_s11, %s4667_s3 }
  0x39   :  { %p4417_p12 = pnand %p4415_p11, %p4412_p10 }
  0x3b   :  { %4420 = shalt.err (!%p4417_p12)
}
  0x3c   :  { %s4421_s16 = scalar_lea.vmem %s4531_s23, 16384  ;;  %p4426_p0 = scmp.lt.s32.totalorder %s4531_s23, %s4531_s23 }
  0x3d   :  { %p4422_p13 = scmp.ne.s32.totalorder %s4531_s23, %s4421_s16  ;;  %p4427_p1 = scmp.lt.s32.totalorder %s4421_s16, %s4421_s16 }
  0x3f   :  { %p4428_p2 = por %p4427_p1, %p4426_p0 }
  0x41   :  { %p4429_p3 = pnand %p4428_p2, %p4422_p13 }
  0x43   :  { %4432 = shalt.err (!%p4429_p3)
}
  0x44   :  { %s4471_s2 = smov 4  }
  0x45   :  { %59 = dma.hbm_to_vmem [thread:$0]  %s4667_s3, 16384, %s4531_s23, [#allocation9], %s4465_s29, %s4465_s29, %s4471_s2  }
  0x46   :  { %4455 = dma.done.wait [#allocation3], 256  }
  0x47   :  { %4456 = vsyncadd [#allocation3], 4294967040 }
  0x48   :  { %4457 = dma.done.wait [#allocation6], 33024  }
  0x49   :  { %4458 = vsyncadd [#allocation6], 4294934272 }
  0x4a   :  { %4459 = dma.done.wait [#allocation9], 16384  }
  0x4b   :  { %4460 = vsyncadd [#allocation9], 4294950912  ;;  %v77_v0 = vld [vmem:[#allocation5] sm:$0xff]  ;;  %v78_v2 = vld [vmem:[#allocation5 + $0x8] sm:$0xff] }
  0x4c   :  { %v85_v1 = vld [vmem:[#allocation5 + $0x40] sm:$0xff]  ;;  %v86_v4 = vld [vmem:[#allocation5 + $0x48] sm:$0xff]  ;;  %v4564_v56 = vld [vmem:[#allocation2 + $0x4] ss:$8 sps:$4 sm:$0xff]  }
  0x4d   :  { %v3578_v3 = vcombine.high %v77_v0, %v85_v1  ;;  %v3577_v5 = vcombine.low %v77_v0, %v85_v1  ;;  %v93_v6 = vld [vmem:[#allocation5 + $0x80] sm:$0xff]  ;;  %v3580_v8 = vcombine.high %v78_v2, %v86_v4  ;;  %v3579_v9 = vcombine.low %v78_v2, %v86_v4  ;;  %v94_v11 = vld [vmem:[#allocation5 + $0x88] sm:$0xff]  ;;  %1739 = vmatprep.mubr.bf16.mxu0 %v4564_v56 }
  0x4e   :  { %v101_v7 = vld [vmem:[#allocation5 + $0xc0] sm:$0xff]  ;;  %v102_v12 = vld [vmem:[#allocation5 + $0xc8] sm:$0xff]  ;;  %1782 = vmatprep.mubr.bf16.mxu1 %v4564_v56 }
  0x4f   :  { %v3594_v10 = vcombine.high %v93_v6, %v101_v7  ;;  %v109_v13 = vld [vmem:[#allocation5 + $0x100] sm:$0xff]  ;;  %1707 = vmatprep.subr.bf16.mxu0 %v3578_v3  ;;  %v3596_v14 = vcombine.high %v94_v11, %v102_v12  ;;  %v110_v16 = vld [vmem:[#allocation5 + $0x108] sm:$0xff]  ;;  %1750 = vmatprep.subr.bf16.mxu1 %v3580_v8  ;;  %v3593_v18 = vcombine.low %v93_v6, %v101_v7 }
  0x50   :  { %v117_v15 = vld [vmem:[#allocation5 + $0x140] sm:$0xff]  ;;  %v118_v17 = vld [vmem:[#allocation5 + $0x148] sm:$0xff]  ;;  %1708 = vmatpush1.bf16.msra.mxu0 %v3577_v5  ;;  %1751 = vmatpush1.bf16.msra.mxu1 %v3579_v9  ;;  %v3595_v19 = vcombine.low %v94_v11, %v102_v12 }
  0x51   :  { %1709 = vmatprep.subr.bf16.mxu0 %v3594_v10  ;;  %v3610_v20 = vcombine.high %v109_v13, %v117_v15  ;;  %1752 = vmatprep.subr.bf16.mxu1 %v3596_v14  ;;  %v3612_v21 = vcombine.high %v110_v16, %v118_v17  ;;  %v125_v22 = vld [vmem:[#allocation5 + $0x180] sm:$0xff]  ;;  %v126_v24 = vld [vmem:[#allocation5 + $0x188] sm:$0xff]  ;;  %v3609_v26 = vcombine.low %v109_v13, %v117_v15 }
  0x52   :  { %v133_v23 = vld [vmem:[#allocation5 + $0x1c0] sm:$0xff]  ;;  %v134_v25 = vld [vmem:[#allocation5 + $0x1c8] sm:$0xff]  ;;  %v3611_v27 = vcombine.low %v110_v16, %v118_v17 }
  0x53   :  { %v3626_v28 = vcombine.high %v125_v22, %v133_v23  ;;  %v3628_v29 = vcombine.high %v126_v24, %v134_v25  ;;  %v141_v30 = vld [vmem:[#allocation5 + $0x200] sm:$0xff]  ;;  %v142_v32 = vld [vmem:[#allocation5 + $0x208] sm:$0xff]  ;;  %v3625_v34 = vcombine.low %v125_v22, %v133_v23  ;;  %v3627_v35 = vcombine.low %v126_v24, %v134_v25 }
  0x54   :  { %1710 = vmatpush1.bf16.msra.mxu0 %v3593_v18  ;;  %1753 = vmatpush1.bf16.msra.mxu1 %v3595_v19  ;;  %v149_v31 = vld [vmem:[#allocation5 + $0x240] sm:$0xff]  ;;  %v150_v33 = vld [vmem:[#allocation5 + $0x248] sm:$0xff] }
  0x55   :  { %1711 = vmatprep.subr.bf16.mxu0 %v3610_v20  ;;  %1754 = vmatprep.subr.bf16.mxu1 %v3612_v21  ;;  %v3642_v36 = vcombine.high %v141_v30, %v149_v31  ;;  %v3644_v37 = vcombine.high %v142_v32, %v150_v33  ;;  %v157_v38 = vld [vmem:[#allocation5 + $0x280] sm:$0xff]  ;;  %v158_v40 = vld [vmem:[#allocation5 + $0x288] sm:$0xff]  ;;  %v3641_v42 = vcombine.low %v141_v30, %v149_v31 }
  0x56   :  { %v165_v39 = vld [vmem:[#allocation5 + $0x2c0] sm:$0xff]  ;;  %v166_v41 = vld [vmem:[#allocation5 + $0x2c8] sm:$0xff]  ;;  %v3643_v43 = vcombine.low %v142_v32, %v150_v33 }
  0x57   :  { %v3658_v44 = vcombine.high %v157_v38, %v165_v39  ;;  %v3660_v45 = vcombine.high %v158_v40, %v166_v41  ;;  %v173_v46 = vld [vmem:[#allocation5 + $0x300] sm:$0xff]  ;;  %v174_v48 = vld [vmem:[#allocation5 + $0x308] sm:$0xff]  ;;  %v3657_v50 = vcombine.low %v157_v38, %v165_v39  ;;  %v3659_v51 = vcombine.low %v158_v40, %v166_v41 }
  0x58   :  { %1712 = vmatpush1.bf16.msra.mxu0 %v3609_v26  ;;  %1755 = vmatpush1.bf16.msra.mxu1 %v3611_v27  ;;  %v181_v47 = vld [vmem:[#allocation5 + $0x340] sm:$0xff]  ;;  %v182_v49 = vld [vmem:[#allocation5 + $0x348] sm:$0xff] }
  0x59   :  { %1713 = vmatprep.subr.bf16.mxu0 %v3626_v28  ;;  %1756 = vmatprep.subr.bf16.mxu1 %v3628_v29  ;;  %v3674_v52 = vcombine.high %v173_v46, %v181_v47  ;;  %v3676_v53 = vcombine.high %v174_v48, %v182_v49  ;;  %v189_v54 = vld [vmem:[#allocation5 + $0x380] sm:$0xff]  ;;  %v190_v57 = vld [vmem:[#allocation5 + $0x388] sm:$0xff]  ;;  %v3673_v59 = vcombine.low %v173_v46, %v181_v47 }
  0x5a   :  { %v197_v55 = vld [vmem:[#allocation5 + $0x3c0] sm:$0xff]  ;;  %v198_v58 = vld [vmem:[#allocation5 + $0x3c8] sm:$0xff]  ;;  %v3675_v60 = vcombine.low %v174_v48, %v182_v49 }
  0x5b   :  { %v3690_v61 = vcombine.high %v189_v54, %v197_v55  ;;  %v3692_v62 = vcombine.high %v190_v57, %v198_v58  ;;  %v205_v63 = vld [vmem:[#allocation5 + $0x400] sm:$0xff]  ;;  %v206_v1 = vld [vmem:[#allocation5 + $0x408] sm:$0xff]  ;;  %v3689_v3 = vcombine.low %v189_v54, %v197_v55  ;;  %v3691_v4 = vcombine.low %v190_v57, %v198_v58 }
  0x5c   :  { %1714 = vmatpush1.bf16.msra.mxu0 %v3625_v34  ;;  %1757 = vmatpush1.bf16.msra.mxu1 %v3627_v35  ;;  %v213_v0 = vld [vmem:[#allocation5 + $0x440] sm:$0xff]  ;;  %v214_v2 = vld [vmem:[#allocation5 + $0x448] sm:$0xff] }
  0x5d   :  { %1715 = vmatprep.subr.bf16.mxu0 %v3642_v36  ;;  %1758 = vmatprep.subr.bf16.mxu1 %v3644_v37  ;;  %v3706_v5 = vcombine.high %v205_v63, %v213_v0  ;;  %v3708_v6 = vcombine.high %v206_v1, %v214_v2  ;;  %v221_v7 = vld [vmem:[#allocation5 + $0x480] sm:$0xff]  ;;  %v222_v9 = vld [vmem:[#allocation5 + $0x488] sm:$0xff]  ;;  %v3705_v11 = vcombine.low %v205_v63, %v213_v0  ;;  %v79_v0 = vld [vmem:[#allocation5 + $0x10] sm:$0xff] }
  0x5e   :  { %v229_v8 = vld [vmem:[#allocation5 + $0x4c0] sm:$0xff]  ;;  %v230_v10 = vld [vmem:[#allocation5 + $0x4c8] sm:$0xff]  ;;  %v3707_v12 = vcombine.low %v206_v1, %v214_v2  ;;  %v87_v1 = vld [vmem:[#allocation5 + $0x50] sm:$0xff] }
  0x5f   :  { %v3722_v13 = vcombine.high %v221_v7, %v229_v8  ;;  %v3724_v14 = vcombine.high %v222_v9, %v230_v10  ;;  %v237_v15 = vld [vmem:[#allocation5 + $0x500] sm:$0xff]  ;;  %v238_v17 = vld [vmem:[#allocation5 + $0x508] sm:$0xff]  ;;  %v3721_v19 = vcombine.low %v221_v7, %v229_v8  ;;  %v3723_v20 = vcombine.low %v222_v9, %v230_v10  ;;  %v80_v2 = vld [vmem:[#allocation5 + $0x18] sm:$0xff] }
  0x60   :  { %1716 = vmatpush1.bf16.msra.mxu0 %v3641_v42  ;;  %1759 = vmatpush1.bf16.msra.mxu1 %v3643_v43  ;;  %v245_v16 = vld [vmem:[#allocation5 + $0x540] sm:$0xff]  ;;  %v246_v18 = vld [vmem:[#allocation5 + $0x548] sm:$0xff]  ;;  %v95_v8 = vld [vmem:[#allocation5 + $0x90] sm:$0xff] }
  0x61   :  { %1717 = vmatprep.subr.bf16.mxu0 %v3658_v44  ;;  %1760 = vmatprep.subr.bf16.mxu1 %v3660_v45  ;;  %v3738_v21 = vcombine.high %v237_v15, %v245_v16  ;;  %v3740_v22 = vcombine.high %v238_v17, %v246_v18  ;;  %v253_v23 = vld [vmem:[#allocation5 + $0x580] sm:$0xff]  ;;  %v254_v25 = vld [vmem:[#allocation5 + $0x588] sm:$0xff]  ;;  %v3737_v27 = vcombine.low %v237_v15, %v245_v16  ;;  %v103_v9 = vld [vmem:[#allocation5 + $0xd0] sm:$0xff] }
  0x62   :  { %v261_v24 = vld [vmem:[#allocation5 + $0x5c0] sm:$0xff]  ;;  %v262_v26 = vld [vmem:[#allocation5 + $0x5c8] sm:$0xff]  ;;  %v3739_v28 = vcombine.low %v238_v17, %v246_v18  ;;  %v4568_v10 = vld [vmem:[#allocation2] ss:$8 sps:$4 sm:$0xff]   ;;  %v3598_v15 = vcombine.high %v95_v8, %v103_v9 }
  0x63   :  { %v3754_v29 = vcombine.high %v253_v23, %v261_v24  ;;  %v3756_v30 = vcombine.high %v254_v25, %v262_v26  ;;  %v269_v31 = vld [vmem:[#allocation5 + $0x600] sm:$0xff]  ;;  %v270_v33 = vld [vmem:[#allocation5 + $0x608] sm:$0xff]  ;;  %v3753_v35 = vcombine.low %v253_v23, %v261_v24  ;;  %v3755_v36 = vcombine.low %v254_v25, %v262_v26  ;;  %v111_v16 = vld [vmem:[#allocation5 + $0x110] sm:$0xff] }
  0x64   :  { %1718 = vmatpush1.bf16.msra.mxu0 %v3657_v50  ;;  %1761 = vmatpush1.bf16.msra.mxu1 %v3659_v51  ;;  %v277_v32 = vld [vmem:[#allocation5 + $0x640] sm:$0xff]  ;;  %v278_v34 = vld [vmem:[#allocation5 + $0x648] sm:$0xff]  ;;  %v119_v17 = vld [vmem:[#allocation5 + $0x150] sm:$0xff] }
  0x65   :  { %1719 = vmatprep.subr.bf16.mxu0 %v3674_v52  ;;  %1762 = vmatprep.subr.bf16.mxu1 %v3676_v53  ;;  %v3770_v37 = vcombine.high %v269_v31, %v277_v32  ;;  %v3772_v38 = vcombine.high %v270_v33, %v278_v34  ;;  %v285_v39 = vld [vmem:[#allocation5 + $0x680] sm:$0xff]  ;;  %v286_v41 = vld [vmem:[#allocation5 + $0x688] sm:$0xff]  ;;  %v3769_v43 = vcombine.low %v269_v31, %v277_v32  ;;  %v127_v24 = vld [vmem:[#allocation5 + $0x190] sm:$0xff] }
  0x66   :  { %v293_v40 = vld [vmem:[#allocation5 + $0x6c0] sm:$0xff]  ;;  %v294_v42 = vld [vmem:[#allocation5 + $0x6c8] sm:$0xff]  ;;  %v3771_v44 = vcombine.low %v270_v33, %v278_v34  ;;  %v3614_v23 = vcombine.high %v111_v16, %v119_v17  ;;  %v135_v25 = vld [vmem:[#allocation5 + $0x1d0] sm:$0xff] }
  0x67   :  { %v3786_v45 = vcombine.high %v285_v39, %v293_v40  ;;  %v3788_v46 = vcombine.high %v286_v41, %v294_v42  ;;  %v301_v47 = vld [vmem:[#allocation5 + $0x700] sm:$0xff]  ;;  %v302_v49 = vld [vmem:[#allocation5 + $0x708] sm:$0xff]  ;;  %v3785_v51 = vcombine.low %v285_v39, %v293_v40  ;;  %v3787_v52 = vcombine.low %v286_v41, %v294_v42  ;;  %v128_v26 = vld [vmem:[#allocation5 + $0x198] sm:$0xff] }
  0x68   :  { %1720 = vmatpush1.bf16.msra.mxu0 %v3673_v59  ;;  %1763 = vmatpush1.bf16.msra.mxu1 %v3675_v60  ;;  %v309_v48 = vld [vmem:[#allocation5 + $0x740] sm:$0xff]  ;;  %v310_v50 = vld [vmem:[#allocation5 + $0x748] sm:$0xff]  ;;  %v3630_v31 = vcombine.high %v127_v24, %v135_v25  ;;  %v143_v32 = vld [vmem:[#allocation5 + $0x210] sm:$0xff] }
  0x69   :  { %1721 = vmatprep.subr.bf16.mxu0 %v3690_v61  ;;  %1764 = vmatprep.subr.bf16.mxu1 %v3692_v62  ;;  %v3802_v53 = vcombine.high %v301_v47, %v309_v48  ;;  %v3804_v54 = vcombine.high %v302_v49, %v310_v50  ;;  %v317_v55 = vld [vmem:[#allocation5 + $0x780] sm:$0xff]  ;;  %v318_v58 = vld [vmem:[#allocation5 + $0x788] sm:$0xff]  ;;  %v3801_v60 = vcombine.low %v301_v47, %v309_v48  ;;  %v151_v33 = vld [vmem:[#allocation5 + $0x250] sm:$0xff] }
  0x6a   :  { %v325_v57 = vld [vmem:[#allocation5 + $0x7c0] sm:$0xff]  ;;  %v326_v59 = vld [vmem:[#allocation5 + $0x7c8] sm:$0xff]  ;;  %v3803_v61 = vcombine.low %v302_v49, %v310_v50  ;;  %v144_v34 = vld [vmem:[#allocation5 + $0x218] sm:$0xff]  ;;  %v3646_v39 = vcombine.high %v143_v32, %v151_v33 }
  0x6b   :  { %v3818_v62 = vcombine.high %v317_v55, %v325_v57  ;;  %v3820_v63 = vcombine.high %v318_v58, %v326_v59  ;;  %v159_v40 = vld [vmem:[#allocation5 + $0x290] sm:$0xff]  ;;  %v160_v42 = vld [vmem:[#allocation5 + $0x298] sm:$0xff] }
  0x6c   :  { %1722 = vmatpush1.bf16.msra.mxu0 %v3689_v3  ;;  %1765 = vmatpush1.bf16.msra.mxu1 %v3691_v4  ;;  %v88_v3 = vld [vmem:[#allocation5 + $0x58] sm:$0xff]  ;;  %v3817_v4 = vcombine.low %v317_v55, %v325_v57  ;;  %v167_v41 = vld [vmem:[#allocation5 + $0x2d0] sm:$0xff] }
  0x6d   :  { %1723 = vmatprep.subr.bf16.mxu0 %v3706_v5  ;;  %1766 = vmatprep.subr.bf16.mxu1 %v3708_v6  ;;  %v3819_v5 = vcombine.low %v318_v58, %v326_v59  ;;  %v3582_v6 = vcombine.high %v79_v0, %v87_v1  ;;  %v3584_v7 = vcombine.high %v80_v2, %v88_v3  ;;  %v175_v48 = vld [vmem:[#allocation5 + $0x310] sm:$0xff]  ;;  %v176_v50 = vld [vmem:[#allocation5 + $0x318] sm:$0xff] }
  0x6e   :  { %v3662_v47 = vcombine.high %v159_v40, %v167_v41  ;;  %v183_v49 = vld [vmem:[#allocation5 + $0x350] sm:$0xff]  ;;  %v192_v59 = vld [vmem:[#allocation5 + $0x398] sm:$0xff] }
  0x6f   :  { %v3678_v55 = vcombine.high %v175_v48, %v183_v49  ;;  %v191_v57 = vld [vmem:[#allocation5 + $0x390] sm:$0xff] }
  0x70   :  { %1724 = vmatpush1.bf16.msra.mxu0 %v3705_v11  ;;  %1767 = vmatpush1.bf16.msra.mxu1 %v3707_v12  ;;  %v96_v11 = vld [vmem:[#allocation5 + $0x98] sm:$0xff]  ;;  %v199_v58 = vld [vmem:[#allocation5 + $0x3d0] sm:$0xff] }
  0x71   :  { %1725 = vmatprep.subr.bf16.mxu0 %v3722_v13  ;;  %1768 = vmatprep.subr.bf16.mxu1 %v3724_v14  ;;  %v104_v12 = vld [vmem:[#allocation5 + $0xd8] sm:$0xff]  ;;  %v3581_v13 = vcombine.low %v79_v0, %v87_v1  ;;  %v3583_v14 = vcombine.low %v80_v2, %v88_v3  ;;  %v3694_v0 = vcombine.high %v191_v57, %v199_v58  ;;  %v207_v1 = vld [vmem:[#allocation5 + $0x410] sm:$0xff] }
  0x72   :  { %v3600_v18 = vcombine.high %v96_v11, %v104_v12  ;;  %v215_v2 = vld [vmem:[#allocation5 + $0x450] sm:$0xff]  ;;  %v208_v3 = vld [vmem:[#allocation5 + $0x418] sm:$0xff] }
  0x74   :  { %1726 = vmatpush1.bf16.msra.mxu0 %v3721_v19  ;;  %1769 = vmatpush1.bf16.msra.mxu1 %v3723_v20  ;;  %v112_v19 = vld [vmem:[#allocation5 + $0x118] sm:$0xff] }
  0x75   :  { %1727 = vmatprep.subr.bf16.mxu0 %v3738_v21  ;;  %1770 = vmatprep.subr.bf16.mxu1 %v3740_v22  ;;  %v120_v20 = vld [vmem:[#allocation5 + $0x158] sm:$0xff]  ;;  %v3597_v21 = vcombine.low %v95_v8, %v103_v9  ;;  %v3599_v22 = vcombine.low %v96_v11, %v104_v12  ;;  %v3710_v8 = vcombine.high %v207_v1, %v215_v2  ;;  %v223_v9 = vld [vmem:[#allocation5 + $0x490] sm:$0xff] }
  0x76   :  { %v231_v11 = vld [vmem:[#allocation5 + $0x4d0] sm:$0xff]  ;;  %v224_v12 = vld [vmem:[#allocation5 + $0x498] sm:$0xff] }
  0x78   :  { %1728 = vmatpush1.bf16.msra.mxu0 %v3737_v27  ;;  %1771 = vmatpush1.bf16.msra.mxu1 %v3739_v28  ;;  %v3616_v27 = vcombine.high %v112_v19, %v120_v20  ;;  %v136_v28 = vld [vmem:[#allocation5 + $0x1d8] sm:$0xff] }
  0x79   :  { %1729 = vmatprep.subr.bf16.mxu0 %v3754_v29  ;;  %1772 = vmatprep.subr.bf16.mxu1 %v3756_v30  ;;  %v3613_v29 = vcombine.low %v111_v16, %v119_v17  ;;  %v3615_v30 = vcombine.low %v112_v19, %v120_v20  ;;  %v3726_v17 = vcombine.high %v223_v9, %v231_v11  ;;  %v247_v19 = vld [vmem:[#allocation5 + $0x550] sm:$0xff]  ;;  %v240_v20 = vld [vmem:[#allocation5 + $0x518] sm:$0xff] }
  0x7c   :  { %1730 = vmatpush1.bf16.msra.mxu0 %v3753_v35  ;;  %1773 = vmatpush1.bf16.msra.mxu1 %v3755_v36  ;;  %v3632_v35 = vcombine.high %v128_v26, %v136_v28  ;;  %v152_v36 = vld [vmem:[#allocation5 + $0x258] sm:$0xff] }
  0x7d   :  { %1731 = vmatprep.subr.bf16.mxu0 %v3770_v37  ;;  %1774 = vmatprep.subr.bf16.mxu1 %v3772_v38  ;;  %v3629_v37 = vcombine.low %v127_v24, %v135_v25  ;;  %v3631_v38 = vcombine.low %v128_v26, %v136_v28  ;;  %v255_v26 = vld [vmem:[#allocation5 + $0x590] sm:$0xff]  ;;  %v256_v28 = vld [vmem:[#allocation5 + $0x598] sm:$0xff] }
  0x80   :  { %1732 = vmatpush1.bf16.msra.mxu0 %v3769_v43  ;;  %1775 = vmatpush1.bf16.msra.mxu1 %v3771_v44  ;;  %v3648_v43 = vcombine.high %v144_v34, %v152_v36  ;;  %v168_v44 = vld [vmem:[#allocation5 + $0x2d8] sm:$0xff] }
  0x81   :  { %1733 = vmatprep.subr.bf16.mxu0 %v3786_v45  ;;  %1776 = vmatprep.subr.bf16.mxu1 %v3788_v46  ;;  %v3645_v45 = vcombine.low %v143_v32, %v151_v33  ;;  %v3647_v46 = vcombine.low %v144_v34, %v152_v36  ;;  %v271_v34 = vld [vmem:[#allocation5 + $0x610] sm:$0xff]  ;;  %v272_v36 = vld [vmem:[#allocation5 + $0x618] sm:$0xff] }
  0x84   :  { %1734 = vmatpush1.bf16.msra.mxu0 %v3785_v51  ;;  %1777 = vmatpush1.bf16.msra.mxu1 %v3787_v52  ;;  %v3664_v51 = vcombine.high %v160_v42, %v168_v44  ;;  %v184_v52 = vld [vmem:[#allocation5 + $0x358] sm:$0xff] }
  0x85   :  { %1735 = vmatprep.subr.bf16.mxu0 %v3802_v53  ;;  %1778 = vmatprep.subr.bf16.mxu1 %v3804_v54  ;;  %v3661_v53 = vcombine.low %v159_v40, %v167_v41  ;;  %v3663_v54 = vcombine.low %v160_v42, %v168_v44  ;;  %v287_v42 = vld [vmem:[#allocation5 + $0x690] sm:$0xff]  ;;  %v288_v44 = vld [vmem:[#allocation5 + $0x698] sm:$0xff] }
  0x88   :  { %1736 = vmatpush1.bf16.msra.mxu0 %v3801_v60  ;;  %1779 = vmatpush1.bf16.msra.mxu1 %v3803_v61  ;;  %v3680_v60 = vcombine.high %v176_v50, %v184_v52  ;;  %v200_v61 = vld [vmem:[#allocation5 + $0x3d8] sm:$0xff] }
  0x89   :  { %1737 = vmatprep.subr.bf16.mxu0 %v3818_v62  ;;  %1780 = vmatprep.subr.bf16.mxu1 %v3820_v63  ;;  %v3677_v62 = vcombine.low %v175_v48, %v183_v49  ;;  %v3679_v63 = vcombine.low %v176_v50, %v184_v52  ;;  %v303_v50 = vld [vmem:[#allocation5 + $0x710] sm:$0xff]  ;;  %v304_v52 = vld [vmem:[#allocation5 + $0x718] sm:$0xff] }
  0x8c   :  { %1738 = vmatpush1.bf16.msra.mxu0 %v3817_v4  ;;  %1781 = vmatpush1.bf16.msra.mxu1 %v3819_v5  ;;  %v3696_v4 = vcombine.high %v192_v59, %v200_v61  ;;  %v216_v5 = vld [vmem:[#allocation5 + $0x458] sm:$0xff] }
  0x8d   :  { %1793 = vmatprep.subr.bf16.mxu0 %v3582_v6  ;;  %1836 = vmatprep.subr.bf16.mxu1 %v3584_v7  ;;  %v3693_v6 = vcombine.low %v191_v57, %v199_v58  ;;  %v3695_v7 = vcombine.low %v192_v59, %v200_v61  ;;  %v3711_v16 = vcombine.low %v208_v3, %v216_v5  ;;  %v319_v59 = vld [vmem:[#allocation5 + $0x790] sm:$0xff]  ;;  %v320_v61 = vld [vmem:[#allocation5 + $0x798] sm:$0xff] }
  0x8f   :  { %1740 = vmatmul.mubr.bf16.vlgmr.msra.gmra.mrb[0].mxu0 %v4568_v10  ;;  %1783 = vmatmul.mubr.bf16.vlgmr.msra.gmra.mrb[0].mxu1 %v4568_v10 }
  0x90   :  { %1794 = vmatpush1.bf16.msra.mxu0 %v3581_v13  ;;  %1837 = vmatpush1.bf16.msra.mxu1 %v3583_v14  ;;  %v3712_v13 = vcombine.high %v208_v3, %v216_v5  ;;  %v232_v14 = vld [vmem:[#allocation5 + $0x4d8] sm:$0xff]  ;;  %v81_v3 = vld [vmem:[#allocation5 + $0x20] sm:$0xff]  ;;  %v82_v5 = vld [vmem:[#allocation5 + $0x28] sm:$0xff] }
  0x91   :  { %1795 = vmatprep.subr.bf16.mxu0 %v3598_v15  ;;  %1838 = vmatprep.subr.bf16.mxu1 %v3600_v18  ;;  %v3709_v15 = vcombine.low %v207_v1, %v215_v2  ;;  %v239_v18 = vld [vmem:[#allocation5 + $0x510] sm:$0xff]  ;;  %v3727_v24 = vcombine.low %v224_v12, %v232_v14 }
  0x92   :  { %1825 = vmatprep.mubr.bf16.mxu0 %v4564_v56  ;;  %1868 = vmatprep.mubr.bf16.mxu1 %v4564_v56  ;;  %v3742_v25 = vcombine.high %v239_v18, %v247_v19 }
  0x94   :  { %1796 = vmatpush1.bf16.msra.mxu0 %v3597_v21  ;;  %1839 = vmatpush1.bf16.msra.mxu1 %v3599_v22  ;;  %v3728_v21 = vcombine.high %v224_v12, %v232_v14  ;;  %v248_v22 = vld [vmem:[#allocation5 + $0x558] sm:$0xff]  ;;  %v97_v12 = vld [vmem:[#allocation5 + $0xa0] sm:$0xff]  ;;  %v98_v14 = vld [vmem:[#allocation5 + $0xa8] sm:$0xff] }
  0x95   :  { %1797 = vmatprep.subr.bf16.mxu0 %v3614_v23  ;;  %1840 = vmatprep.subr.bf16.mxu1 %v3616_v27  ;;  %v3725_v23 = vcombine.low %v223_v9, %v231_v11  ;;  %v263_v27 = vld [vmem:[#allocation5 + $0x5d0] sm:$0xff]  ;;  %v3743_v32 = vcombine.low %v240_v20, %v248_v22 }
  0x96   :  { %v3758_v33 = vcombine.high %v255_v26, %v263_v27 }
  0x98   :  { %1798 = vmatpush1.bf16.msra.mxu0 %v3613_v29  ;;  %1841 = vmatpush1.bf16.msra.mxu1 %v3615_v30  ;;  %v3744_v29 = vcombine.high %v240_v20, %v248_v22  ;;  %v264_v30 = vld [vmem:[#allocation5 + $0x5d8] sm:$0xff]  ;;  %v114_v22 = vld [vmem:[#allocation5 + $0x128] sm:$0xff] }
  0x99   :  { %1799 = vmatprep.subr.bf16.mxu0 %v3630_v31  ;;  %1842 = vmatprep.subr.bf16.mxu1 %v3632_v35  ;;  %v3741_v31 = vcombine.low %v239_v18, %v247_v19  ;;  %v279_v35 = vld [vmem:[#allocation5 + $0x650] sm:$0xff]  ;;  %v3759_v40 = vcombine.low %v256_v28, %v264_v30  ;;  %v113_v18 = vld [vmem:[#allocation5 + $0x120] sm:$0xff] }
  0x9a   :  { %v3774_v41 = vcombine.high %v271_v34, %v279_v35  ;;  %v121_v19 = vld [vmem:[#allocation5 + $0x160] sm:$0xff] }
  0x9c   :  { %1800 = vmatpush1.bf16.msra.mxu0 %v3629_v37  ;;  %1843 = vmatpush1.bf16.msra.mxu1 %v3631_v38  ;;  %v3760_v37 = vcombine.high %v256_v28, %v264_v30  ;;  %v280_v38 = vld [vmem:[#allocation5 + $0x658] sm:$0xff]  ;;  %v129_v28 = vld [vmem:[#allocation5 + $0x1a0] sm:$0xff]  ;;  %v130_v30 = vld [vmem:[#allocation5 + $0x1a8] sm:$0xff] }
  0x9d   :  { %1801 = vmatprep.subr.bf16.mxu0 %v3646_v39  ;;  %1844 = vmatprep.subr.bf16.mxu1 %v3648_v43  ;;  %v3757_v39 = vcombine.low %v255_v26, %v263_v27  ;;  %v295_v43 = vld [vmem:[#allocation5 + $0x6d0] sm:$0xff]  ;;  %v3775_v48 = vcombine.low %v272_v36, %v280_v38  ;;  %v3618_v27 = vcombine.high %v113_v18, %v121_v19 }
  0x9e   :  { %v3790_v49 = vcombine.high %v287_v42, %v295_v43 }
  0xa0   :  { %1802 = vmatpush1.bf16.msra.mxu0 %v3645_v45  ;;  %1845 = vmatpush1.bf16.msra.mxu1 %v3647_v46  ;;  %v3776_v45 = vcombine.high %v272_v36, %v280_v38  ;;  %v296_v46 = vld [vmem:[#allocation5 + $0x6d8] sm:$0xff] }
  0xa1   :  { %1803 = vmatprep.subr.bf16.mxu0 %v3662_v47  ;;  %1846 = vmatprep.subr.bf16.mxu1 %v3664_v51  ;;  %v3773_v47 = vcombine.low %v271_v34, %v279_v35  ;;  %v311_v51 = vld [vmem:[#allocation5 + $0x750] sm:$0xff]  ;;  %v3791_v57 = vcombine.low %v288_v44, %v296_v46  ;;  %v145_v34 = vld [vmem:[#allocation5 + $0x220] sm:$0xff] }
  0xa2   :  { %v3806_v58 = vcombine.high %v303_v50, %v311_v51 }
  0xa4   :  { %1804 = vmatpush1.bf16.msra.mxu0 %v3661_v53  ;;  %1847 = vmatpush1.bf16.msra.mxu1 %v3663_v54  ;;  %v3792_v53 = vcombine.high %v288_v44, %v296_v46  ;;  %v312_v54 = vld [vmem:[#allocation5 + $0x758] sm:$0xff]  ;;  %v162_v44 = vld [vmem:[#allocation5 + $0x2a8] sm:$0xff] }
  0xa5   :  { %1805 = vmatprep.subr.bf16.mxu0 %v3678_v55  ;;  %1848 = vmatprep.subr.bf16.mxu1 %v3680_v60  ;;  %v3789_v55 = vcombine.low %v287_v42, %v295_v43  ;;  %v327_v60 = vld [vmem:[#allocation5 + $0x7d0] sm:$0xff]  ;;  %v3807_v1 = vcombine.low %v304_v52, %v312_v54  ;;  %v169_v42 = vld [vmem:[#allocation5 + $0x2e0] sm:$0xff] }
  0xa6   :  { %v3822_v2 = vcombine.high %v319_v59, %v327_v60 }
  0xa8   :  { %1806 = vmatpush1.bf16.msra.mxu0 %v3677_v62  ;;  %1849 = vmatpush1.bf16.msra.mxu1 %v3679_v63  ;;  %v3808_v62 = vcombine.high %v304_v52, %v312_v54  ;;  %v328_v63 = vld [vmem:[#allocation5 + $0x7d8] sm:$0xff]  ;;  %v178_v52 = vld [vmem:[#allocation5 + $0x328] sm:$0xff] }
  0xa9   :  { %1807 = vmatprep.subr.bf16.mxu0 %v3694_v0  ;;  %1850 = vmatprep.subr.bf16.mxu1 %v3696_v4  ;;  %v3805_v0 = vcombine.low %v303_v50, %v311_v51  ;;  %v89_v4 = vld [vmem:[#allocation5 + $0x60] sm:$0xff]  ;;  %v3823_v9 = vcombine.low %v320_v61, %v328_v63 }
  0xaa   :  { %v3586_v11 = vcombine.high %v81_v3, %v89_v4 }
  0xac   :  { %1808 = vmatpush1.bf16.msra.mxu0 %v3693_v6  ;;  %1851 = vmatpush1.bf16.msra.mxu1 %v3695_v7  ;;  %v3824_v6 = vcombine.high %v320_v61, %v328_v63  ;;  %v90_v7 = vld [vmem:[#allocation5 + $0x68] sm:$0xff] }
  0xad   :  { %1809 = vmatprep.subr.bf16.mxu0 %v3710_v8  ;;  %1852 = vmatprep.subr.bf16.mxu1 %v3712_v13  ;;  %v3821_v8 = vcombine.low %v319_v59, %v327_v60  ;;  %v105_v13 = vld [vmem:[#allocation5 + $0xe0] sm:$0xff]  ;;  %v3587_v20 = vcombine.low %v82_v5, %v90_v7  ;;  %v194_v61 = vld [vmem:[#allocation5 + $0x3a8] sm:$0xff] }
  0xae   :  { %v202_v63 = vld [vmem:[#allocation5 + $0x3e8] sm:$0xff] }
  0xb0   :  { %1810 = vmatpush1.bf16.msra.mxu0 %v3709_v15  ;;  %1853 = vmatpush1.bf16.msra.mxu1 %v3711_v16  ;;  %v3588_v15 = vcombine.high %v82_v5, %v90_v7  ;;  %v106_v16 = vld [vmem:[#allocation5 + $0xe8] sm:$0xff]  ;;  %v3700_v5 = vcombine.high %v194_v61, %v202_v63 }
  0xb1   :  { %1811 = vmatprep.subr.bf16.mxu0 %v3726_v17  ;;  %1854 = vmatprep.subr.bf16.mxu1 %v3728_v21  ;;  %v3585_v17 = vcombine.low %v81_v3, %v89_v4  ;;  %v3602_v21 = vcombine.high %v97_v12, %v105_v13  ;;  %v3603_v26 = vcombine.low %v98_v14, %v106_v16  ;;  %v218_v7 = vld [vmem:[#allocation5 + $0x468] sm:$0xff] }
  0xb4   :  { %1812 = vmatpush1.bf16.msra.mxu0 %v3725_v23  ;;  %1855 = vmatpush1.bf16.msra.mxu1 %v3727_v24  ;;  %v122_v23 = vld [vmem:[#allocation5 + $0x168] sm:$0xff]  ;;  %v3604_v24 = vcombine.high %v98_v14, %v106_v16  ;;  %v233_v14 = vld [vmem:[#allocation5 + $0x4e0] sm:$0xff] }
  0xb5   :  { %1813 = vmatprep.subr.bf16.mxu0 %v3742_v25  ;;  %1856 = vmatprep.subr.bf16.mxu1 %v3744_v29  ;;  %v3601_v25 = vcombine.low %v97_v12, %v105_v13  ;;  %v137_v29 = vld [vmem:[#allocation5 + $0x1e0] sm:$0xff]  ;;  %v3619_v35 = vcombine.low %v114_v22, %v122_v23  ;;  %v234_v16 = vld [vmem:[#allocation5 + $0x4e8] sm:$0xff] }
  0xb6   :  { %v3634_v36 = vcombine.high %v129_v28, %v137_v29  ;;  %v225_v13 = vld [vmem:[#allocation5 + $0x4a0] sm:$0xff] }
  0xb8   :  { %1814 = vmatpush1.bf16.msra.mxu0 %v3741_v31  ;;  %1857 = vmatpush1.bf16.msra.mxu1 %v3743_v32  ;;  %v3620_v31 = vcombine.high %v114_v22, %v122_v23  ;;  %v138_v32 = vld [vmem:[#allocation5 + $0x1e8] sm:$0xff]  ;;  %v249_v22 = vld [vmem:[#allocation5 + $0x560] sm:$0xff] }
  0xb9   :  { %1815 = vmatprep.subr.bf16.mxu0 %v3758_v33  ;;  %1858 = vmatprep.subr.bf16.mxu1 %v3760_v37  ;;  %v3617_v33 = vcombine.low %v113_v18, %v121_v19  ;;  %v146_v37 = vld [vmem:[#allocation5 + $0x228] sm:$0xff]  ;;  %v3636_v38 = vcombine.high %v130_v30, %v138_v32  ;;  %v3635_v43 = vcombine.low %v130_v30, %v138_v32  ;;  %v265_v30 = vld [vmem:[#allocation5 + $0x5e0] sm:$0xff] }
  0xba   :  { %v3730_v19 = vcombine.high %v225_v13, %v233_v14  ;;  %v242_v23 = vld [vmem:[#allocation5 + $0x528] sm:$0xff] }
  0xbb   :  { %v266_v32 = vld [vmem:[#allocation5 + $0x5e8] sm:$0xff] }
  0xbc   :  { %1816 = vmatpush1.bf16.msra.mxu0 %v3757_v39  ;;  %1859 = vmatpush1.bf16.msra.mxu1 %v3759_v40  ;;  %v154_v39 = vld [vmem:[#allocation5 + $0x268] sm:$0xff]  ;;  %v3633_v40 = vcombine.low %v129_v28, %v137_v29  ;;  %v257_v29 = vld [vmem:[#allocation5 + $0x5a0] sm:$0xff] }
  0xbd   :  { %1817 = vmatprep.subr.bf16.mxu0 %v3774_v41  ;;  %1860 = vmatprep.subr.bf16.mxu1 %v3776_v45  ;;  %v161_v41 = vld [vmem:[#allocation5 + $0x2a0] sm:$0xff]  ;;  %v170_v45 = vld [vmem:[#allocation5 + $0x2e8] sm:$0xff]  ;;  %v3652_v46 = vcombine.high %v146_v37, %v154_v39  ;;  %v3651_v50 = vcombine.low %v146_v37, %v154_v39 }
  0xbe   :  { %v3666_v51 = vcombine.high %v161_v41, %v169_v42  ;;  %v3668_v54 = vcombine.high %v162_v44, %v170_v45  ;;  %v3667_v59 = vcombine.low %v162_v44, %v170_v45  ;;  %v281_v37 = vld [vmem:[#allocation5 + $0x660] sm:$0xff]  ;;  %v282_v39 = vld [vmem:[#allocation5 + $0x668] sm:$0xff] }
  0xbf   :  { %v297_v44 = vld [vmem:[#allocation5 + $0x6e0] sm:$0xff]  ;;  %v290_v45 = vld [vmem:[#allocation5 + $0x6a8] sm:$0xff] }
  0xc0   :  { %1818 = vmatpush1.bf16.msra.mxu0 %v3773_v47  ;;  %1861 = vmatpush1.bf16.msra.mxu1 %v3775_v48  ;;  %v177_v48 = vld [vmem:[#allocation5 + $0x320] sm:$0xff] }
  0xc1   :  { %1819 = vmatprep.subr.bf16.mxu0 %v3790_v49  ;;  %1862 = vmatprep.subr.bf16.mxu1 %v3792_v53  ;;  %v185_v49 = vld [vmem:[#allocation5 + $0x360] sm:$0xff]  ;;  %v186_v53 = vld [vmem:[#allocation5 + $0x368] sm:$0xff] }
  0xc2   :  { %v3682_v60 = vcombine.high %v177_v48, %v185_v49  ;;  %v3683_v3 = vcombine.low %v178_v52, %v186_v53 }
  0xc4   :  { %1820 = vmatpush1.bf16.msra.mxu0 %v3789_v55  ;;  %1863 = vmatpush1.bf16.msra.mxu1 %v3791_v57  ;;  %v3665_v55 = vcombine.low %v161_v41, %v169_v42  ;;  %v193_v57 = vld [vmem:[#allocation5 + $0x3a0] sm:$0xff] }
  0xc5   :  { %1821 = vmatprep.subr.bf16.mxu0 %v3806_v58  ;;  %1864 = vmatprep.subr.bf16.mxu1 %v3808_v62  ;;  %v201_v58 = vld [vmem:[#allocation5 + $0x3e0] sm:$0xff]  ;;  %v3684_v62 = vcombine.high %v178_v52, %v186_v53  ;;  %v306_v52 = vld [vmem:[#allocation5 + $0x728] sm:$0xff] }
  0xc6   :  { %v3698_v4 = vcombine.high %v193_v57, %v201_v58  ;;  %v314_v53 = vld [vmem:[#allocation5 + $0x768] sm:$0xff] }
  0xc8   :  { %1822 = vmatpush1.bf16.msra.mxu0 %v3805_v0  ;;  %1865 = vmatpush1.bf16.msra.mxu1 %v3807_v1  ;;  %v3681_v0 = vcombine.low %v177_v48, %v185_v49  ;;  %v209_v1 = vld [vmem:[#allocation5 + $0x420] sm:$0xff] }
  0xc9   :  { %1823 = vmatprep.subr.bf16.mxu0 %v3822_v2  ;;  %1866 = vmatprep.subr.bf16.mxu1 %v3824_v6  ;;  %v217_v2 = vld [vmem:[#allocation5 + $0x460] sm:$0xff]  ;;  %v210_v6 = vld [vmem:[#allocation5 + $0x428] sm:$0xff] }
  0xca   :  { %v3716_v12 = vcombine.high %v210_v6, %v218_v7  ;;  %v3715_v18 = vcombine.low %v210_v6, %v218_v7  ;;  %v305_v48 = vld [vmem:[#allocation5 + $0x720] sm:$0xff]  ;;  %v84_v6 = vld [vmem:[#allocation5 + $0x38] sm:$0xff] }
  0xcb   :  { %v313_v49 = vld [vmem:[#allocation5 + $0x760] sm:$0xff]  ;;  %v92_v7 = vld [vmem:[#allocation5 + $0x78] sm:$0xff] }
  0xcc   :  { %1824 = vmatpush1.bf16.msra.mxu0 %v3821_v8  ;;  %1867 = vmatpush1.bf16.msra.mxu1 %v3823_v9  ;;  %v3697_v8 = vcombine.low %v193_v57, %v201_v58  ;;  %v3699_v9 = vcombine.low %v194_v61, %v202_v63  ;;  %v3810_v58 = vcombine.high %v305_v48, %v313_v49  ;;  %v322_v61 = vld [vmem:[#allocation5 + $0x7a8] sm:$0xff] }
  0xcd   :  { %1879 = vmatprep.subr.bf16.mxu0 %v3586_v11  ;;  %1922 = vmatprep.subr.bf16.mxu1 %v3588_v15  ;;  %v3714_v11 = vcombine.high %v209_v1, %v217_v2  ;;  %v226_v15 = vld [vmem:[#allocation5 + $0x4a8] sm:$0xff] }
  0xce   :  { %v330_v63 = vld [vmem:[#allocation5 + $0x7e8] sm:$0xff] }
  0xcf   :  { %1826 = vmatmul.mubr.bf16.vlgmr.msra.gmra.mrb[4].mxu0 %v4568_v10  ;;  %1869 = vmatmul.mubr.bf16.vlgmr.msra.gmra.mrb[4].mxu1 %v4568_v10  ;;  %v153_v10 = vld [vmem:[#allocation5 + $0x260] sm:$0xff] }
  0xd0   :  { %1880 = vmatpush1.bf16.msra.mxu0 %v3585_v17  ;;  %1923 = vmatpush1.bf16.msra.mxu1 %v3587_v20  ;;  %v3649_v47 = vcombine.low %v145_v34, %v153_v10  ;;  %v3713_v17 = vcombine.low %v209_v1, %v217_v2  ;;  %v3732_v20 = vcombine.high %v226_v15, %v234_v16  ;;  %v83_v1 = vld [vmem:[#allocation5 + $0x30] sm:$0xff] }
  0xd1   :  { %1881 = vmatprep.subr.bf16.mxu0 %v3602_v21  ;;  %1924 = vmatprep.subr.bf16.mxu1 %v3604_v24  ;;  %v241_v21 = vld [vmem:[#allocation5 + $0x520] sm:$0xff]  ;;  %v250_v24 = vld [vmem:[#allocation5 + $0x568] sm:$0xff]  ;;  %v3811_v2 = vcombine.low %v306_v52, %v314_v53 }
  0xd2   :  { %1911 = vmatprep.mubr.bf16.mxu0 %v4564_v56  ;;  %1954 = vmatprep.mubr.bf16.mxu1 %v4564_v56  ;;  %v3650_v56 = vcombine.high %v145_v34, %v153_v10  ;;  %v3748_v28 = vcombine.high %v242_v23, %v250_v24  ;;  %v3747_v34 = vcombine.low %v242_v23, %v250_v24  ;;  %v4578_v23 = vld [vmem:[#allocation2] ss:$8 sps:$4 sm:$0xff]  }
  0xd3   :  { %v3762_v10 = vcombine.high %v257_v29, %v265_v30  ;;  %v116_v24 = vld [vmem:[#allocation5 + $0x138] sm:$0xff] }
  0xd4   :  { %1882 = vmatpush1.bf16.msra.mxu0 %v3601_v25  ;;  %1925 = vmatpush1.bf16.msra.mxu1 %v3603_v26  ;;  %v3729_v25 = vcombine.low %v225_v13, %v233_v14  ;;  %v3731_v26 = vcombine.low %v226_v15, %v234_v16  ;;  %v99_v13 = vld [vmem:[#allocation5 + $0xb0] sm:$0xff]  ;;  %v100_v15 = vld [vmem:[#allocation5 + $0xb8] sm:$0xff] }
  0xd5   :  { %1883 = vmatprep.subr.bf16.mxu0 %v3618_v27  ;;  %1926 = vmatprep.subr.bf16.mxu1 %v3620_v31  ;;  %v3746_v27 = vcombine.high %v241_v21, %v249_v22  ;;  %v258_v31 = vld [vmem:[#allocation5 + $0x5a8] sm:$0xff]  ;;  %v107_v14 = vld [vmem:[#allocation5 + $0xf0] sm:$0xff]  ;;  %v108_v16 = vld [vmem:[#allocation5 + $0xf8] sm:$0xff] }
  0xd6   :  { %v3763_v41 = vcombine.low %v258_v31, %v266_v32 }
  0xd8   :  { %1884 = vmatpush1.bf16.msra.mxu0 %v3617_v33  ;;  %1927 = vmatpush1.bf16.msra.mxu1 %v3619_v35  ;;  %v3745_v33 = vcombine.low %v241_v21, %v249_v22  ;;  %v3764_v35 = vcombine.high %v258_v31, %v266_v32  ;;  %v115_v21 = vld [vmem:[#allocation5 + $0x130] sm:$0xff] }
  0xd9   :  { %1885 = vmatprep.subr.bf16.mxu0 %v3634_v36  ;;  %1928 = vmatprep.subr.bf16.mxu1 %v3636_v38  ;;  %v273_v36 = vld [vmem:[#allocation5 + $0x620] sm:$0xff]  ;;  %v274_v38 = vld [vmem:[#allocation5 + $0x628] sm:$0xff]  ;;  %v123_v22 = vld [vmem:[#allocation5 + $0x170] sm:$0xff] }
  0xda   :  { %v3778_v42 = vcombine.high %v273_v36, %v281_v37  ;;  %v139_v31 = vld [vmem:[#allocation5 + $0x1f0] sm:$0xff] }
  0xdb   :  { %v4344_v32 = vld [vmem:[#allocation2 + $0x4] ss:$8 sps:$4 sm:$0xff]  }
  0xdc   :  { %1886 = vmatpush1.bf16.msra.mxu0 %v3633_v40  ;;  %1929 = vmatpush1.bf16.msra.mxu1 %v3635_v43  ;;  %v3761_v40 = vcombine.low %v257_v29, %v265_v30  ;;  %v3780_v43 = vcombine.high %v274_v38, %v282_v39  ;;  %v131_v30 = vld [vmem:[#allocation5 + $0x1b0] sm:$0xff] }
  0xdd   :  { %1887 = vmatprep.subr.bf16.mxu0 %v3650_v56  ;;  %1930 = vmatprep.subr.bf16.mxu1 %v3652_v46  ;;  %v289_v56 = vld [vmem:[#allocation5 + $0x6a0] sm:$0xff]  ;;  %v298_v46 = vld [vmem:[#allocation5 + $0x6e8] sm:$0xff] }
  0xde   :  { %v3795_v57 = vcombine.low %v290_v45, %v298_v46 }
  0xe0   :  { %1888 = vmatpush1.bf16.msra.mxu0 %v3649_v47  ;;  %1931 = vmatpush1.bf16.msra.mxu1 %v3651_v50  ;;  %v3777_v47 = vcombine.low %v273_v36, %v281_v37  ;;  %v3779_v50 = vcombine.low %v274_v38, %v282_v39  ;;  %v3638_v36 = vcombine.high %v131_v30, %v139_v31  ;;  %v147_v38 = vld [vmem:[#allocation5 + $0x230] sm:$0xff] }
  0xe1   :  { %1889 = vmatprep.subr.bf16.mxu0 %v3666_v51  ;;  %1932 = vmatprep.subr.bf16.mxu1 %v3668_v54  ;;  %v3794_v51 = vcombine.high %v289_v56, %v297_v44  ;;  %v3796_v54 = vcombine.high %v290_v45, %v298_v46  ;;  %v155_v39 = vld [vmem:[#allocation5 + $0x270] sm:$0xff] }
  0xe2   :  { %v163_v45 = vld [vmem:[#allocation5 + $0x2b0] sm:$0xff] }
  0xe3   :  { %v171_v46 = vld [vmem:[#allocation5 + $0x2f0] sm:$0xff] }
  0xe4   :  { %1890 = vmatpush1.bf16.msra.mxu0 %v3665_v55  ;;  %1933 = vmatpush1.bf16.msra.mxu1 %v3667_v59  ;;  %v3793_v55 = vcombine.low %v289_v56, %v297_v44  ;;  %v321_v59 = vld [vmem:[#allocation5 + $0x7a0] sm:$0xff]  ;;  %v3654_v56 = vcombine.high %v147_v38, %v155_v39 }
  0xe5   :  { %1891 = vmatprep.subr.bf16.mxu0 %v3682_v60  ;;  %1934 = vmatprep.subr.bf16.mxu1 %v3684_v62  ;;  %v329_v60 = vld [vmem:[#allocation5 + $0x7e0] sm:$0xff]  ;;  %v3812_v62 = vcombine.high %v306_v52, %v314_v53  ;;  %v179_v53 = vld [vmem:[#allocation5 + $0x330] sm:$0xff] }
  0xe8   :  { %1892 = vmatpush1.bf16.msra.mxu0 %v3681_v0  ;;  %1935 = vmatpush1.bf16.msra.mxu1 %v3683_v3  ;;  %v3809_v0 = vcombine.low %v305_v48, %v313_v49  ;;  %v3826_v3 = vcombine.high %v321_v59, %v329_v60  ;;  %v172_v48 = vld [vmem:[#allocation5 + $0x2f8] sm:$0xff]  ;;  %v3653_v49 = vcombine.low %v147_v38, %v155_v39  ;;  %v275_v39 = vld [vmem:[#allocation5 + $0x630] sm:$0xff] }
  0xe9   :  { %1893 = vmatprep.subr.bf16.mxu0 %v3698_v4  ;;  %1936 = vmatprep.subr.bf16.mxu1 %v3700_v5  ;;  %v91_v4 = vld [vmem:[#allocation5 + $0x70] sm:$0xff]  ;;  %v3828_v5 = vcombine.high %v322_v61, %v330_v63 }
  0xec   :  { %1894 = vmatpush1.bf16.msra.mxu0 %v3697_v8  ;;  %1937 = vmatpush1.bf16.msra.mxu1 %v3699_v9  ;;  %v3825_v8 = vcombine.low %v321_v59, %v329_v60  ;;  %v3827_v9 = vcombine.low %v322_v61, %v330_v63  ;;  %v203_v63 = vld [vmem:[#allocation5 + $0x3f0] sm:$0xff] }
  0xed   :  { %1895 = vmatprep.subr.bf16.mxu0 %v3714_v11  ;;  %1938 = vmatprep.subr.bf16.mxu1 %v3716_v12  ;;  %v3590_v11 = vcombine.high %v83_v1, %v91_v4  ;;  %v3592_v12 = vcombine.high %v84_v6, %v92_v7 }
  0xf0   :  { %1896 = vmatpush1.bf16.msra.mxu0 %v3713_v17  ;;  %1939 = vmatpush1.bf16.msra.mxu1 %v3715_v18  ;;  %v3589_v17 = vcombine.low %v83_v1, %v91_v4  ;;  %v3591_v18 = vcombine.low %v84_v6, %v92_v7  ;;  %v204_v1 = vld [vmem:[#allocation5 + $0x3f8] sm:$0xff]  ;;  %v211_v6 = vld [vmem:[#allocation5 + $0x430] sm:$0xff] }
  0xf1   :  { %1897 = vmatprep.subr.bf16.mxu0 %v3730_v19  ;;  %1940 = vmatprep.subr.bf16.mxu1 %v3732_v20  ;;  %v3606_v19 = vcombine.high %v99_v13, %v107_v14  ;;  %v3608_v20 = vcombine.high %v100_v15, %v108_v16  ;;  %v219_v7 = vld [vmem:[#allocation5 + $0x470] sm:$0xff] }
  0xf4   :  { %1898 = vmatpush1.bf16.msra.mxu0 %v3729_v25  ;;  %1941 = vmatpush1.bf16.msra.mxu1 %v3731_v26  ;;  %v124_v25 = vld [vmem:[#allocation5 + $0x178] sm:$0xff]  ;;  %v3605_v26 = vcombine.low %v99_v13, %v107_v14  ;;  %v3718_v13 = vcombine.high %v211_v6, %v219_v7 }
  0xf5   :  { %1899 = vmatprep.subr.bf16.mxu0 %v3746_v27  ;;  %1942 = vmatprep.subr.bf16.mxu1 %v3748_v28  ;;  %v3607_v27 = vcombine.low %v100_v15, %v108_v16  ;;  %v3622_v28 = vcombine.high %v115_v21, %v123_v22  ;;  %v3624_v29 = vcombine.high %v116_v24, %v124_v25  ;;  %v227_v15 = vld [vmem:[#allocation5 + $0x4b0] sm:$0xff] }
  0xf6   :  { %v235_v16 = vld [vmem:[#allocation5 + $0x4f0] sm:$0xff] }
  0xf8   :  { %1900 = vmatpush1.bf16.msra.mxu0 %v3745_v33  ;;  %1943 = vmatpush1.bf16.msra.mxu1 %v3747_v34  ;;  %v132_v33 = vld [vmem:[#allocation5 + $0x1b8] sm:$0xff] }
  0xf9   :  { %1901 = vmatprep.subr.bf16.mxu0 %v3762_v10  ;;  %1944 = vmatprep.subr.bf16.mxu1 %v3764_v35  ;;  %v140_v34 = vld [vmem:[#allocation5 + $0x1f8] sm:$0xff]  ;;  %v3621_v10 = vcombine.low %v115_v21, %v123_v22  ;;  %v3623_v35 = vcombine.low %v116_v24, %v124_v25  ;;  %v3734_v21 = vcombine.high %v227_v15, %v235_v16  ;;  %v243_v24 = vld [vmem:[#allocation5 + $0x530] sm:$0xff] }
  0xfa   :  { %v3640_v37 = vcombine.high %v132_v33, %v140_v34  ;;  %v251_v25 = vld [vmem:[#allocation5 + $0x570] sm:$0xff] }
  0xfc   :  { %1902 = vmatpush1.bf16.msra.mxu0 %v3761_v40  ;;  %1945 = vmatpush1.bf16.msra.mxu1 %v3763_v41  ;;  %v148_v40 = vld [vmem:[#allocation5 + $0x238] sm:$0xff] }
  0xfd   :  { %1903 = vmatprep.subr.bf16.mxu0 %v3778_v42  ;;  %1946 = vmatprep.subr.bf16.mxu1 %v3780_v43  ;;  %v156_v41 = vld [vmem:[#allocation5 + $0x278] sm:$0xff]  ;;  %v3637_v42 = vcombine.low %v131_v30, %v139_v31  ;;  %v3639_v43 = vcombine.low %v132_v33, %v140_v34  ;;  %v3750_v30 = vcombine.high %v243_v24, %v251_v25  ;;  %v267_v33 = vld [vmem:[#allocation5 + $0x5f0] sm:$0xff] }
  0xfe   :  { %v3656_v44 = vcombine.high %v148_v40, %v156_v41  ;;  %v260_v34 = vld [vmem:[#allocation5 + $0x5b8] sm:$0xff] }
 0x100   :  { %1904 = vmatpush1.bf16.msra.mxu0 %v3777_v47  ;;  %1947 = vmatpush1.bf16.msra.mxu1 %v3779_v50  ;;  %v164_v47 = vld [vmem:[#allocation5 + $0x2b8] sm:$0xff]  ;;  %v3655_v50 = vcombine.low %v148_v40, %v156_v41  ;;  %v283_v40 = vld [vmem:[#allocation5 + $0x670] sm:$0xff] }
 0x101   :  { %1905 = vmatprep.subr.bf16.mxu0 %v3794_v51  ;;  %1948 = vmatprep.subr.bf16.mxu1 %v3796_v54  ;;  %v3670_v51 = vcombine.high %v163_v45, %v171_v46  ;;  %v3672_v52 = vcombine.high %v164_v47, %v172_v48  ;;  %v187_v54 = vld [vmem:[#allocation5 + $0x370] sm:$0xff]  ;;  %v3671_v59 = vcombine.low %v164_v47, %v172_v48  ;;  %v276_v41 = vld [vmem:[#allocation5 + $0x638] sm:$0xff] }
 0x102   :  { %v3686_v60 = vcombine.high %v179_v53, %v187_v54  ;;  %v299_v47 = vld [vmem:[#allocation5 + $0x6f0] sm:$0xff]  ;;  %v292_v48 = vld [vmem:[#allocation5 + $0x6b8] sm:$0xff] }
 0x104   :  { %1906 = vmatpush1.bf16.msra.mxu0 %v3793_v55  ;;  %1949 = vmatpush1.bf16.msra.mxu1 %v3795_v57  ;;  %v180_v55 = vld [vmem:[#allocation5 + $0x338] sm:$0xff] }
 0x105   :  { %1907 = vmatprep.subr.bf16.mxu0 %v3810_v58  ;;  %1950 = vmatprep.subr.bf16.mxu1 %v3812_v62  ;;  %v188_v57 = vld [vmem:[#allocation5 + $0x378] sm:$0xff]  ;;  %v3669_v58 = vcombine.low %v163_v45, %v171_v46  ;;  %v195_v62 = vld [vmem:[#allocation5 + $0x3b0] sm:$0xff] }
 0x106   :  { %v3688_v61 = vcombine.high %v180_v55, %v188_v57  ;;  %v3702_v4 = vcombine.high %v195_v62, %v203_v63  ;;  %v291_v46 = vld [vmem:[#allocation5 + $0x6b0] sm:$0xff] }
 0x108   :  { %1908 = vmatpush1.bf16.msra.mxu0 %v3809_v0  ;;  %1951 = vmatpush1.bf16.msra.mxu1 %v3811_v2  ;;  %v196_v0 = vld [vmem:[#allocation5 + $0x3b8] sm:$0xff]  ;;  %v3685_v2 = vcombine.low %v179_v53, %v187_v54  ;;  %v307_v54 = vld [vmem:[#allocation5 + $0x730] sm:$0xff] }
 0x109   :  { %1909 = vmatprep.subr.bf16.mxu0 %v3826_v3  ;;  %1952 = vmatprep.subr.bf16.mxu1 %v3828_v5  ;;  %v3687_v3 = vcombine.low %v180_v55, %v188_v57  ;;  %v3704_v5 = vcombine.high %v196_v0, %v204_v1  ;;  %v315_v55 = vld [vmem:[#allocation5 + $0x770] sm:$0xff]  ;;  %v308_v57 = vld [vmem:[#allocation5 + $0x738] sm:$0xff] }
 0x10c   :  { %1910 = vmatpush1.bf16.msra.mxu0 %v3825_v8  ;;  %1953 = vmatpush1.bf16.msra.mxu1 %v3827_v9  ;;  %v212_v8 = vld [vmem:[#allocation5 + $0x438] sm:$0xff] }
 0x10d   :  { %1965 = vmatprep.subr.bf16.mxu0 %v3590_v11  ;;  %2008 = vmatprep.subr.bf16.mxu1 %v3592_v12  ;;  %v220_v9 = vld [vmem:[#allocation5 + $0x478] sm:$0xff]  ;;  %v3701_v11 = vcombine.low %v195_v62, %v203_v63  ;;  %v3703_v12 = vcombine.low %v196_v0, %v204_v1  ;;  %v323_v63 = vld [vmem:[#allocation5 + $0x7b0] sm:$0xff] }
 0x10e   :  { %v3720_v14 = vcombine.high %v212_v8, %v220_v9  ;;  %v331_v0 = vld [vmem:[#allocation5 + $0x7f0] sm:$0xff]  ;;  %v324_v1 = vld [vmem:[#allocation5 + $0x7b8] sm:$0xff] }
 0x10f   :  { %1912 = vmatmul.mubr.bf16.vlgmr.msra.gmra.mrb[8].mxu0 %v4578_v23  ;;  %1955 = vmatmul.mubr.bf16.vlgmr.msra.gmra.mrb[8].mxu1 %v4578_v23 }
 0x110   :  { %1966 = vmatpush1.bf16.msra.mxu0 %v3589_v17  ;;  %2009 = vmatpush1.bf16.msra.mxu1 %v3591_v18  ;;  %v228_v17 = vld [vmem:[#allocation5 + $0x4b8] sm:$0xff] }
 0x111   :  { %1967 = vmatprep.subr.bf16.mxu0 %v3606_v19  ;;  %2010 = vmatprep.subr.bf16.mxu1 %v3608_v20  ;;  %v236_v18 = vld [vmem:[#allocation5 + $0x4f8] sm:$0xff]  ;;  %v3717_v19 = vcombine.low %v211_v6, %v219_v7  ;;  %v3719_v20 = vcombine.low %v212_v8, %v220_v9  ;;  %v3829_v7 = vcombine.low %v323_v63, %v331_v0  ;;  %v4151_v9 = vld [vmem:[#allocation8 + $0x40] sm:$0xff]  }
 0x112   :  { %1997 = vmatprep.mubr.bf16.mxu0 %v4344_v32  ;;  %2040 = vmatprep.mubr.bf16.mxu1 %v4344_v32  ;;  %v3736_v22 = vcombine.high %v228_v17, %v236_v18  ;;  %v259_v32 = vld [vmem:[#allocation5 + $0x5b0] sm:$0xff] }
 0x114   :  { %1968 = vmatpush1.bf16.msra.mxu0 %v3605_v26  ;;  %2011 = vmatpush1.bf16.msra.mxu1 %v3607_v27  ;;  %v244_v26 = vld [vmem:[#allocation5 + $0x538] sm:$0xff] }
 0x115   :  { %1969 = vmatprep.subr.bf16.mxu0 %v3622_v28  ;;  %2012 = vmatprep.subr.bf16.mxu1 %v3624_v29  ;;  %v252_v27 = vld [vmem:[#allocation5 + $0x578] sm:$0xff]  ;;  %v3733_v28 = vcombine.low %v227_v15, %v235_v16  ;;  %v3735_v29 = vcombine.low %v228_v17, %v236_v18  ;;  %v4159_v18 = vld [vmem:[#allocation8 + $0x50] sm:$0xff]  }
 0x116   :  { %v3752_v31 = vcombine.high %v244_v26, %v252_v27  ;;  %v4156_v15 = vld [vmem:[#allocation8 + $0xc8] sm:$0xff]  }
 0x117   :  { %v4157_v16 = vld [vmem:[#allocation8 + $0x8] sm:$0xff]  }
 0x118   :  { %1970 = vmatpush1.bf16.msra.mxu0 %v3621_v10  ;;  %2013 = vmatpush1.bf16.msra.mxu1 %v3623_v35  ;;  %v268_v10 = vld [vmem:[#allocation5 + $0x5f8] sm:$0xff]  ;;  %v3749_v35 = vcombine.low %v243_v24, %v251_v25  ;;  %v4163_v24 = vld [vmem:[#allocation8 + $0x58] sm:$0xff]  }
 0x119   :  { %1971 = vmatprep.subr.bf16.mxu0 %v3638_v36  ;;  %2014 = vmatprep.subr.bf16.mxu1 %v3640_v37  ;;  %v3751_v36 = vcombine.low %v244_v26, %v252_v27  ;;  %v3766_v37 = vcombine.high %v259_v32, %v267_v33  ;;  %v3768_v38 = vcombine.high %v260_v34, %v268_v10  ;;  %v4158_v17 = vld [vmem:[#allocation8 + $0x88] sm:$0xff]   ;;  %v4164_v25 = vld [vmem:[#allocation8 + $0xd8] sm:$0xff]  }
 0x11a   :  { %v4166_v27 = vld [vmem:[#allocation8 + $0x98] sm:$0xff]  }
 0x11c   :  { %1972 = vmatpush1.bf16.msra.mxu0 %v3637_v42  ;;  %2015 = vmatpush1.bf16.msra.mxu1 %v3639_v43  ;;  %v284_v42 = vld [vmem:[#allocation5 + $0x678] sm:$0xff]  ;;  %v3765_v43 = vcombine.low %v259_v32, %v267_v33 }
 0x11d   :  { %1973 = vmatprep.subr.bf16.mxu0 %v3654_v56  ;;  %2016 = vmatprep.subr.bf16.mxu1 %v3656_v44  ;;  %v3767_v56 = vcombine.low %v260_v34, %v268_v10  ;;  %v3782_v44 = vcombine.high %v275_v39, %v283_v40  ;;  %v3784_v45 = vcombine.high %v276_v41, %v284_v42  ;;  %v4169_v34 = vld [vmem:[#allocation8 + $0x20] sm:$0xff]  }
 0x120   :  { %1974 = vmatpush1.bf16.msra.mxu0 %v3653_v49  ;;  %2017 = vmatpush1.bf16.msra.mxu1 %v3655_v50  ;;  %v300_v49 = vld [vmem:[#allocation5 + $0x6f8] sm:$0xff]  ;;  %v3781_v50 = vcombine.low %v275_v39, %v283_v40 }
 0x121   :  { %1975 = vmatprep.subr.bf16.mxu0 %v3670_v51  ;;  %2018 = vmatprep.subr.bf16.mxu1 %v3672_v52  ;;  %v3783_v51 = vcombine.low %v276_v41, %v284_v42  ;;  %v3798_v52 = vcombine.high %v291_v46, %v299_v47  ;;  %v3800_v53 = vcombine.high %v292_v48, %v300_v49  ;;  %v4173_v41 = vld [vmem:[#allocation8 + $0x28] sm:$0xff]  }
 0x124   :  { %1976 = vmatpush1.bf16.msra.mxu0 %v3669_v58  ;;  %2019 = vmatpush1.bf16.msra.mxu1 %v3671_v59  ;;  %v316_v58 = vld [vmem:[#allocation5 + $0x778] sm:$0xff]  ;;  %v3797_v59 = vcombine.low %v291_v46, %v299_v47 }
 0x125   :  { %1977 = vmatprep.subr.bf16.mxu0 %v3686_v60  ;;  %2020 = vmatprep.subr.bf16.mxu1 %v3688_v61  ;;  %v3799_v60 = vcombine.low %v292_v48, %v300_v49  ;;  %v3814_v61 = vcombine.high %v307_v54, %v315_v55  ;;  %v3816_v62 = vcombine.high %v308_v57, %v316_v58 }
 0x128   :  { %1978 = vmatpush1.bf16.msra.mxu0 %v3685_v2  ;;  %2021 = vmatpush1.bf16.msra.mxu1 %v3687_v3  ;;  %v332_v2 = vld [vmem:[#allocation5 + $0x7f8] sm:$0xff]  ;;  %v3813_v3 = vcombine.low %v307_v54, %v315_v55 }
 0x129   :  { %1979 = vmatprep.subr.bf16.mxu0 %v3702_v4  ;;  %2022 = vmatprep.subr.bf16.mxu1 %v3704_v5  ;;  %v3815_v4 = vcombine.low %v308_v57, %v316_v58  ;;  %v3830_v5 = vcombine.high %v323_v63, %v331_v0  ;;  %v3832_v6 = vcombine.high %v324_v1, %v332_v2 }
 0x12a   :  { %v3831_v8 = vcombine.low %v324_v1, %v332_v2 }
 0x12c   :  { %1980 = vmatpush1.bf16.msra.mxu0 %v3701_v11  ;;  %2023 = vmatpush1.bf16.msra.mxu1 %v3703_v12  ;;  %v4152_v11 = vld [vmem:[#allocation8 + $0xc0] sm:$0xff]  }
 0x12d   :  { %1981 = vmatprep.subr.bf16.mxu0 %v3718_v13  ;;  %2024 = vmatprep.subr.bf16.mxu1 %v3720_v14  ;;  %v4153_v12 = vld [vmem:[#allocation8] sm:$0xff]   ;;  %v4155_v14 = vld [vmem:[#allocation8 + $0x48] sm:$0xff]  }
 0x12e   :  { %v4154_v13 = vld [vmem:[#allocation8 + $0x80] sm:$0xff]  }
 0x130   :  { %1982 = vmatpush1.bf16.msra.mxu0 %v3717_v19  ;;  %2025 = vmatpush1.bf16.msra.mxu1 %v3719_v20  ;;  %v4160_v19 = vld [vmem:[#allocation8 + $0xd0] sm:$0xff]   ;;  %v337_v20 = vlaneseq }
 0x131   :  { %1983 = vmatprep.subr.bf16.mxu0 %v3734_v21  ;;  %2026 = vmatprep.subr.bf16.mxu1 %v3736_v22  ;;  %v4161_v21 = vld [vmem:[#allocation8 + $0x10] sm:$0xff]  }
 0x132   :  { %v4162_v22 = vld [vmem:[#allocation8 + $0x90] sm:$0xff]   ;;  %v4584_v26 = vshrl.u32 %v337_v20, 7 }
 0x134   :  { %1984 = vmatpush1.bf16.msra.mxu0 %v3733_v28  ;;  %2027 = vmatpush1.bf16.msra.mxu1 %v3735_v29  ;;  %v4167_v28 = vld [vmem:[#allocation8 + $0x60] sm:$0xff]   ;;  %v347_v32 = vsub.s32 2, %v4584_v26  ;;  %v343_v33 = vsub.s32 1, %v4584_v26  ;;  %v351_v10 = vsub.s32 3, %v4584_v26 }
 0x135   :  { %1985 = vmatprep.subr.bf16.mxu0 %v3750_v30  ;;  %2028 = vmatprep.subr.bf16.mxu1 %v3752_v31  ;;  %v4168_v29 = vld [vmem:[#allocation8 + $0xe0] sm:$0xff]   ;;  %v339_v30 = vsub.s32 0, %v4584_v26  ;;  %v4587_v31 = vld [vmem:[#allocation7] sm:$0xff] }
 0x136   :  { %v348_v39 = vrot.slane %v4587_v31, %v347_v32  ;;  %v344_v40 = vrot.slane %v4587_v31, %v343_v33  ;;  %v352_v42 = vrot.slane %v4587_v31, %v351_v10 }
 0x138   :  { %1986 = vmatpush1.bf16.msra.mxu0 %v3749_v35  ;;  %2029 = vmatpush1.bf16.msra.mxu1 %v3751_v36  ;;  %v4170_v35 = vld [vmem:[#allocation8 + $0xa0] sm:$0xff]   ;;  %v4171_v36 = vld [vmem:[#allocation8 + $0x68] sm:$0xff]  }
 0x139   :  { %1987 = vmatprep.subr.bf16.mxu0 %v3766_v37  ;;  %2030 = vmatprep.subr.bf16.mxu1 %v3768_v38  ;;  %v4172_v37 = vld [vmem:[#allocation8 + $0xe8] sm:$0xff]   ;;  %v340_v38 = vrot.slane %v4587_v31, %v339_v30 }
 0x13c   :  { %1988 = vmatpush1.bf16.msra.mxu0 %v3765_v43  ;;  %2031 = vmatpush1.bf16.msra.mxu1 %v3767_v56  ;;  %v4174_v43 = vld [vmem:[#allocation8 + $0xa8] sm:$0xff]   ;;  %v4175_v56 = vld [vmem:[#allocation8 + $0x70] sm:$0xff]  }
 0x13d   :  { %1989 = vmatprep.subr.bf16.mxu0 %v3782_v44  ;;  %2032 = vmatprep.subr.bf16.mxu1 %v3784_v45  ;;  %v4176_v45 = vld [vmem:[#allocation8 + $0xf0] sm:$0xff]  }
 0x140   :  { %1990 = vmatpush1.bf16.msra.mxu0 %v3781_v50  ;;  %2033 = vmatpush1.bf16.msra.mxu1 %v3783_v51 }
 0x141   :  { %1991 = vmatprep.subr.bf16.mxu0 %v3798_v52  ;;  %2034 = vmatprep.subr.bf16.mxu1 %v3800_v53  ;;  %v4177_v53 = vld [vmem:[#allocation8 + $0x30] sm:$0xff]  }
 0x144   :  { %1992 = vmatpush1.bf16.msra.mxu0 %v3797_v59  ;;  %2035 = vmatpush1.bf16.msra.mxu1 %v3799_v60  ;;  %v4178_v60 = vld [vmem:[#allocation8 + $0xb0] sm:$0xff]  }
 0x145   :  { %1993 = vmatprep.subr.bf16.mxu0 %v3814_v61  ;;  %2036 = vmatprep.subr.bf16.mxu1 %v3816_v62  ;;  %v4179_v61 = vld [vmem:[#allocation8 + $0x78] sm:$0xff]  }
 0x148   :  { %1994 = vmatpush1.bf16.msra.mxu0 %v3813_v3  ;;  %2037 = vmatpush1.bf16.msra.mxu1 %v3815_v4  ;;  %v4180_v3 = vld [vmem:[#allocation8 + $0xf8] sm:$0xff]  }
 0x149   :  { %1995 = vmatprep.subr.bf16.mxu0 %v3830_v5  ;;  %2038 = vmatprep.subr.bf16.mxu1 %v3832_v6 }
 0x14c   :  { %1996 = vmatpush1.bf16.msra.mxu0 %v3829_v7  ;;  %2039 = vmatpush1.bf16.msra.mxu1 %v3831_v8  ;;  %v4181_v8 = vld [vmem:[#allocation8 + $0x38] sm:$0xff]  }
 0x14d   :  { %3962 = vmatprep.subr.bf16.mxu0 %v4151_v9  ;;  %3984 = vmatprep.subr.bf16.mxu1 %v4152_v11  ;;  %v4182_v11 = vld [vmem:[#allocation8 + $0xb8] sm:$0xff]  }
 0x14f   :  { %1998 = vmatmul.mubr.bf16.vlgmr.msra.gmra.mrb[12].mxu0 %v4578_v23  ;;  %2041 = vmatmul.mubr.bf16.vlgmr.msra.gmra.mrb[12].mxu1 %v4578_v23  ;;  %v4165_v23 = vld [vmem:[#allocation8 + $0x18] sm:$0xff]  }
 0x150   :  { %3963 = vmatpush3.bf16.msra.mxu0 %v4153_v12  ;;  %3985 = vmatpush3.bf16.msra.mxu1 %v4154_v13  ;;  %v4183_v12 = vld [vmem:[#allocation8 + $0x140] sm:$0xff]  }
 0x151   :  { %3964 = vmatprep.subr.bf16.mxu0 %v4155_v14  ;;  %3986 = vmatprep.subr.bf16.mxu1 %v4156_v15  ;;  %v4184_v14 = vld [vmem:[#allocation8 + $0x1c0] sm:$0xff]  }
 0x154   :  { %3965 = vmatpush3.bf16.msra.mxu0 %v4157_v16  ;;  %3987 = vmatpush3.bf16.msra.mxu1 %v4158_v17 }
 0x155   :  { %3966 = vmatprep.subr.bf16.mxu0 %v4159_v18  ;;  %3988 = vmatprep.subr.bf16.mxu1 %v4160_v19 }
 0x158   :  { %3967 = vmatpush3.bf16.msra.mxu0 %v4161_v21  ;;  %3989 = vmatpush3.bf16.msra.mxu1 %v4162_v22 }
 0x159   :  { %3968 = vmatprep.subr.bf16.mxu0 %v4163_v24  ;;  %3990 = vmatprep.subr.bf16.mxu1 %v4164_v25 }
 0x15c   :  { %3969 = vmatpush3.bf16.msra.mxu0 %v4165_v23  ;;  %3991 = vmatpush3.bf16.msra.mxu1 %v4166_v27 }
 0x15d   :  { %3970 = vmatprep.subr.bf16.mxu0 %v4167_v28  ;;  %3992 = vmatprep.subr.bf16.mxu1 %v4168_v29 }
 0x160   :  { %3971 = vmatpush3.bf16.msra.mxu0 %v4169_v34  ;;  %3993 = vmatpush3.bf16.msra.mxu1 %v4170_v35 }
 0x161   :  { %3972 = vmatprep.subr.bf16.mxu0 %v4171_v36  ;;  %3994 = vmatprep.subr.bf16.mxu1 %v4172_v37 }
 0x162   :  { %v1741_v44 = vpop.f32.mrb[0].mxu0  ;;  %v1784_v47 = vpop.f32.mrb[0].mxu1 }
 0x163   :  { %v1742_v46 = vadd.f32 %v1741_v44, %v340_v38  ;;  %v1743_v48 = vpop.f32.mrb[1].mxu0  ;;  %v1785_v49 = vadd.f32 %v1784_v47, %v348_v39  ;;  %v1786_v51 = vpop.f32.mrb[1].mxu1 }
 0x164   :  { %v1744_v50 = vadd.f32 %v1743_v48, %v344_v40  ;;  %v1745_v52 = vpop.f32.mrb[2].mxu0  ;;  %3973 = vmatpush3.bf16.msra.mxu0 %v4173_v41  ;;  %v1787_v55 = vadd.f32 %v1786_v51, %v352_v42  ;;  %v1788_v58 = vpop.f32.mrb[2].mxu1  ;;  %3995 = vmatpush3.bf16.msra.mxu1 %v4174_v43  ;;  %v4186_v48 = vld [vmem:[#allocation8 + $0x180] sm:$0xff]   ;;  %v4189_v51 = vld [vmem:[#allocation8 + $0x108] sm:$0xff]  }
 0x165   :  { %v2051_v54 = vmul.f32 0.5, %v1742_v46  ;;  %v1746_v57 = vadd.f32 %v1745_v52, %v340_v38  ;;  %v1747_v59 = vpop.f32.mrb[3].mxu0  ;;  %3974 = vmatprep.subr.bf16.mxu0 %v4175_v56  ;;  %v2053_v62 = vmul.f32 0.5, %v1785_v49  ;;  %v1789_v0 = vadd.f32 %v1788_v58, %v348_v39  ;;  %v1790_v2 = vpop.f32.mrb[3].mxu1  ;;  %3996 = vmatprep.subr.bf16.mxu1 %v4176_v45  ;;  %v4185_v46 = vld [vmem:[#allocation8 + $0x100] sm:$0xff]   ;;  %v4187_v49 = vld [vmem:[#allocation8 + $0x148] sm:$0xff]  }
 0x166   :  { %v2052_v63 = vmul.f32 0.5, %v1744_v50  ;;  %v1748_v1 = vadd.f32 %v1747_v59, %v344_v40  ;;  %v2054_v4 = vmul.f32 0.5, %v1787_v55  ;;  %v1791_v6 = vadd.f32 %v1790_v2, %v352_v42  ;;  %v4188_v50 = vld [vmem:[#allocation8 + $0x1c8] sm:$0xff]   ;;  %v4193_v55 = vld [vmem:[#allocation8 + $0x110] sm:$0xff]   ;;  %v4195_v58 = vld [vmem:[#allocation8 + $0x158] sm:$0xff]  }
 0x167   :  { %4279 = vtanh.f32 %v2051_v54  ;;  %v2067_v5 = vmul.f32 0.5, %v1746_v57  ;;  %v2069_v7 = vmul.f32 0.5, %v1789_v0  ;;  %v4190_v52 = vld [vmem:[#allocation8 + $0x188] sm:$0xff]   ;;  %v4192_v54 = vld [vmem:[#allocation8 + $0x1d0] sm:$0xff]   ;;  %v4196_v59 = vld [vmem:[#allocation8 + $0x1d8] sm:$0xff]  }
 0x168   :  { %4281 = vtanh.f32 %v2053_v62  ;;  %3975 = vmatpush3.bf16.msra.mxu0 %v4177_v53  ;;  %v2068_v9 = vmul.f32 0.5, %v1748_v1  ;;  %3997 = vmatpush3.bf16.msra.mxu1 %v4178_v60  ;;  %v2070_v13 = vmul.f32 0.5, %v1791_v6  ;;  %v4191_v53 = vld [vmem:[#allocation8 + $0x150] sm:$0xff]   ;;  %v4197_v60 = vld [vmem:[#allocation8 + $0x118] sm:$0xff]   ;;  %v4199_v62 = vld [vmem:[#allocation8 + $0x160] sm:$0xff]  }
 0x169   :  { %4283 = vtanh.f32 %v2052_v63  ;;  %3976 = vmatprep.subr.bf16.mxu0 %v4179_v61  ;;  %3998 = vmatprep.subr.bf16.mxu1 %v4180_v3  ;;  %v4194_v57 = vld [vmem:[#allocation8 + $0x190] sm:$0xff]   ;;  %v4198_v61 = vld [vmem:[#allocation8 + $0x198] sm:$0xff]   ;;  %v4200_v63 = vld [vmem:[#allocation8 + $0x1e0] sm:$0xff]  }
 0x16a   :  { %4285 = vtanh.f32 %v2054_v4  ;;  %v4201_v0 = vld [vmem:[#allocation8 + $0x120] sm:$0xff]   ;;  %v4203_v2 = vld [vmem:[#allocation8 + $0x168] sm:$0xff]   ;;  %v4207_v6 = vld [vmem:[#allocation8 + $0x170] sm:$0xff]  }
 0x16b   :  { %4287 = vtanh.f32 %v2067_v5  ;;  %v4202_v1 = vld [vmem:[#allocation8 + $0x1a0] sm:$0xff]   ;;  %v4204_v3 = vld [vmem:[#allocation8 + $0x1e8] sm:$0xff]  }
 0x16c   :  { %4289 = vtanh.f32 %v2069_v7  ;;  %3977 = vmatpush3.bf16.msra.mxu0 %v4181_v8  ;;  %3999 = vmatpush3.bf16.msra.mxu1 %v4182_v11  ;;  %v4205_v4 = vld [vmem:[#allocation8 + $0x128] sm:$0xff]   ;;  %v4208_v7 = vld [vmem:[#allocation8 + $0x1f0] sm:$0xff]   ;;  %v4211_v11 = vld [vmem:[#allocation8 + $0x178] sm:$0xff]  }
 0x16d   :  { %4291 = vtanh.f32 %v2068_v9  ;;  %4006 = vmatprep.subr.bf16.mxu0 %v4183_v12  ;;  %4028 = vmatprep.subr.bf16.mxu1 %v4184_v14  ;;  %v4206_v5 = vld [vmem:[#allocation8 + $0x1a8] sm:$0xff]   ;;  %v4209_v8 = vld [vmem:[#allocation8 + $0x130] sm:$0xff]   ;;  %v4212_v12 = vld [vmem:[#allocation8 + $0x1f8] sm:$0xff]  }
 0x16e   :  { %4293 = vtanh.f32 %v2070_v13  ;;  %v4210_v9 = vld [vmem:[#allocation8 + $0x1b0] sm:$0xff]   ;;  %v4213_v13 = vld [vmem:[#allocation8 + $0x138] sm:$0xff]  }
 0x16f   :  { %v4214_v14 = vld [vmem:[#allocation8 + $0x1b8] sm:$0xff]  }
 0x171   :  { %v4280_v15 = vpop.eup %4279 }
 0x172   :  { %v4282_v16 = vpop.eup %4281  ;;  %v2115_v17 = vmul.f32 0.5, %v4280_v15  ;;  %v4215_v15 = vld [vmem:[#allocation8 + $0x240] sm:$0xff]  }
 0x173   :  { %v4284_v18 = vpop.eup %4283  ;;  %v2117_v19 = vmul.f32 0.5, %v4282_v16  ;;  %v4216_v16 = vld [vmem:[#allocation8 + $0x2c0] sm:$0xff]  }
 0x174   :  { %v4286_v20 = vpop.eup %4285  ;;  %v2147_v25 = vadd.f32 0.5, %v2115_v17  ;;  %v2116_v23 = vmul.f32 0.5, %v4284_v18  ;;  %v355_v17 = vsub.s32 4, %v4584_v26  ;;  %v363_v18 = vsub.s32 6, %v4584_v26 }
 0x175   :  { %v4288_v21 = vpop.eup %4287  ;;  %v2118_v22 = vmul.f32 0.5, %v4286_v20  ;;  %v2149_v29 = vadd.f32 0.5, %v2117_v19  ;;  %v359_v19 = vsub.s32 5, %v4584_v26  ;;  %v367_v20 = vsub.s32 7, %v4584_v26 }
 0x176   :  { %v4290_v24 = vpop.eup %4289  ;;  %v2131_v27 = vmul.f32 0.5, %v4288_v21  ;;  %v2148_v41 = vadd.f32 0.5, %v2116_v23  ;;  %v356_v21 = vrot.slane %v4587_v31, %v355_v17 }
 0x177   :  { %v4292_v28 = vpop.eup %4291  ;;  %v2133_v34 = vmul.f32 0.5, %v4290_v24  ;;  %v2150_v38 = vadd.f32 0.5, %v2118_v22  ;;  %v364_v22 = vrot.slane %v4587_v31, %v363_v18  ;;  %v360_v24 = vrot.slane %v4587_v31, %v359_v19 }
 0x178   :  { %v4294_v35 = vpop.eup %4293  ;;  %v2163_v36 = vadd.f32 0.5, %v2131_v27  ;;  %v2132_v37 = vmul.f32 0.5, %v4292_v28 }
 0x179   :  { %v2165_v39 = vadd.f32 0.5, %v2133_v34  ;;  %v2134_v40 = vmul.f32 0.5, %v4294_v35 }
 0x17a   :  { %v2179_v42 = vpack.c.bf16 %v2163_v36, %v2147_v25  ;;  %v2164_v43 = vadd.f32 0.5, %v2132_v37  ;;  %v368_v25 = vrot.slane %v4587_v31, %v367_v20 }
 0x17b   :  { %v2181_v56 = vpack.c.bf16 %v2165_v39, %v2149_v29  ;;  %v2166_v44 = vadd.f32 0.5, %v2134_v40 }
 0x17c   :  { %v2180_v45 = vpack.c.bf16 %v2164_v43, %v2148_v41 }
 0x17d   :  { %v2182_v47 = vpack.c.bf16 %v2166_v44, %v2150_v38 }
 0x17e   :  { %3258 = vmatprep.mubr.bf16.mxu0 %v2180_v45 }
 0x17f   :  { %3299 = vmatprep.mubr.bf16.mxu1 %v2182_v47  ;;  %3259 = vmatmul.mubr.bf16.vlgmr.msra.gmra.mrb[16].mxu0 %v2179_v42 }
 0x180   :  { %3300 = vmatmul.mubr.bf16.vlgmr.msra.gmra.mrb[16].mxu1 %v2181_v56  ;;  %4007 = vmatpush3.bf16.msra.mxu0 %v4185_v46 }
 0x181   :  { %4029 = vmatpush3.bf16.msra.mxu1 %v4186_v48  ;;  %4008 = vmatprep.subr.bf16.mxu0 %v4187_v49 }
 0x182   :  { %4030 = vmatprep.subr.bf16.mxu1 %v4188_v50 }
 0x184   :  { %4009 = vmatpush3.bf16.msra.mxu0 %v4189_v51 }
 0x185   :  { %4031 = vmatpush3.bf16.msra.mxu1 %v4190_v52  ;;  %4010 = vmatprep.subr.bf16.mxu0 %v4191_v53 }
 0x186   :  { %4032 = vmatprep.subr.bf16.mxu1 %v4192_v54 }
 0x188   :  { %4011 = vmatpush3.bf16.msra.mxu0 %v4193_v55 }
 0x189   :  { %4033 = vmatpush3.bf16.msra.mxu1 %v4194_v57  ;;  %4012 = vmatprep.subr.bf16.mxu0 %v4195_v58 }
 0x18a   :  { %4034 = vmatprep.subr.bf16.mxu1 %v4196_v59 }
 0x18c   :  { %4013 = vmatpush3.bf16.msra.mxu0 %v4197_v60 }
 0x18d   :  { %4035 = vmatpush3.bf16.msra.mxu1 %v4198_v61  ;;  %4014 = vmatprep.subr.bf16.mxu0 %v4199_v62 }
 0x18e   :  { %4036 = vmatprep.subr.bf16.mxu1 %v4200_v63 }
 0x190   :  { %4015 = vmatpush3.bf16.msra.mxu0 %v4201_v0 }
 0x191   :  { %4037 = vmatpush3.bf16.msra.mxu1 %v4202_v1  ;;  %4016 = vmatprep.subr.bf16.mxu0 %v4203_v2 }
 0x192   :  { %4038 = vmatprep.subr.bf16.mxu1 %v4204_v3 }
 0x194   :  { %4017 = vmatpush3.bf16.msra.mxu0 %v4205_v4 }
 0x195   :  { %4039 = vmatpush3.bf16.msra.mxu1 %v4206_v5  ;;  %4018 = vmatprep.subr.bf16.mxu0 %v4207_v6 }
 0x196   :  { %4040 = vmatprep.subr.bf16.mxu1 %v4208_v7 }
 0x198   :  { %4019 = vmatpush3.bf16.msra.mxu0 %v4209_v8 }
 0x199   :  { %4041 = vmatpush3.bf16.msra.mxu1 %v4210_v9  ;;  %4020 = vmatprep.subr.bf16.mxu0 %v4211_v11 }
 0x19a   :  { %4042 = vmatprep.subr.bf16.mxu1 %v4212_v12 }
 0x19c   :  { %4021 = vmatpush3.bf16.msra.mxu0 %v4213_v13 }
 0x19d   :  { %4043 = vmatpush3.bf16.msra.mxu1 %v4214_v14  ;;  %4050 = vmatprep.subr.bf16.mxu0 %v4215_v15 }
 0x19e   :  { %4072 = vmatprep.subr.bf16.mxu1 %v4216_v16 }
 0x1a2   :  { %v1827_v23 = vpop.f32.mrb[4].mxu0  ;;  %v1870_v28 = vpop.f32.mrb[4].mxu1 }
 0x1a3   :  { %v1828_v27 = vadd.f32 %v1827_v23, %v356_v21  ;;  %v1829_v29 = vpop.f32.mrb[5].mxu0  ;;  %v1871_v34 = vadd.f32 %v1870_v28, %v364_v22  ;;  %v1872_v36 = vpop.f32.mrb[5].mxu1  ;;  %v4220_v23 = vld [vmem:[#allocation8 + $0x2c8] sm:$0xff]  }
 0x1a4   :  { %v1830_v35 = vadd.f32 %v1829_v29, %v360_v24  ;;  %v1831_v37 = vpop.f32.mrb[6].mxu0  ;;  %v1873_v39 = vadd.f32 %v1872_v36, %v368_v25  ;;  %v1874_v41 = vpop.f32.mrb[6].mxu1  ;;  %v4222_v28 = vld [vmem:[#allocation8 + $0x288] sm:$0xff]   ;;  %v4223_v29 = vld [vmem:[#allocation8 + $0x250] sm:$0xff]  }
 0x1a5   :  { %v2055_v38 = vmul.f32 0.5, %v1828_v27  ;;  %v1832_v40 = vadd.f32 %v1831_v37, %v356_v21  ;;  %v1833_v42 = vpop.f32.mrb[7].mxu0  ;;  %v2057_v43 = vmul.f32 0.5, %v1871_v34  ;;  %v1875_v44 = vadd.f32 %v1874_v41, %v364_v22  ;;  %v1876_v46 = vpop.f32.mrb[7].mxu1  ;;  %v4217_v21 = vld [vmem:[#allocation8 + $0x200] sm:$0xff]   ;;  %v4221_v27 = vld [vmem:[#allocation8 + $0x208] sm:$0xff]  }
 0x1a6   :  { %v2056_v56 = vmul.f32 0.5, %v1830_v35  ;;  %v1834_v45 = vadd.f32 %v1833_v42, %v360_v24  ;;  %v2058_v31 = vmul.f32 0.5, %v1873_v39  ;;  %v1877_v48 = vadd.f32 %v1876_v46, %v368_v25  ;;  %v4218_v24 = vld [vmem:[#allocation8 + $0x280] sm:$0xff]   ;;  %v4219_v25 = vld [vmem:[#allocation8 + $0x248] sm:$0xff]   ;;  %v4224_v34 = vld [vmem:[#allocation8 + $0x2d0] sm:$0xff]  }
 0x1a7   :  { %4295 = vtanh.f32 %v2055_v38  ;;  %v2071_v47 = vmul.f32 0.5, %v1832_v40  ;;  %v2073_v49 = vmul.f32 0.5, %v1875_v44  ;;  %v4225_v35 = vld [vmem:[#allocation8 + $0x210] sm:$0xff]   ;;  %v4227_v37 = vld [vmem:[#allocation8 + $0x258] sm:$0xff]   ;;  %v4231_v41 = vld [vmem:[#allocation8 + $0x260] sm:$0xff]  }
 0x1a8   :  { %4297 = vtanh.f32 %v2057_v43  ;;  %v2072_v50 = vmul.f32 0.5, %v1834_v45  ;;  %v2074_v51 = vmul.f32 0.5, %v1877_v48  ;;  %v4226_v36 = vld [vmem:[#allocation8 + $0x290] sm:$0xff]   ;;  %v4228_v38 = vld [vmem:[#allocation8 + $0x2d8] sm:$0xff]   ;;  %v4232_v42 = vld [vmem:[#allocation8 + $0x2e0] sm:$0xff]  }
 0x1a9   :  { %4299 = vtanh.f32 %v2056_v56  ;;  %v4229_v39 = vld [vmem:[#allocation8 + $0x218] sm:$0xff]   ;;  %v4233_v43 = vld [vmem:[#allocation8 + $0x220] sm:$0xff]   ;;  %v4235_v44 = vld [vmem:[#allocation8 + $0x268] sm:$0xff]  }
 0x1aa   :  { %4301 = vtanh.f32 %v2058_v31  ;;  %v4230_v40 = vld [vmem:[#allocation8 + $0x298] sm:$0xff]   ;;  %v4234_v56 = vld [vmem:[#allocation8 + $0x2a0] sm:$0xff]   ;;  %v4236_v45 = vld [vmem:[#allocation8 + $0x2e8] sm:$0xff]  }
 0x1ab   :  { %4303 = vtanh.f32 %v2071_v47  ;;  %v4237_v46 = vld [vmem:[#allocation8 + $0x228] sm:$0xff]   ;;  %v4239_v47 = vld [vmem:[#allocation8 + $0x270] sm:$0xff]  }
 0x1ac   :  { %4305 = vtanh.f32 %v2073_v49  ;;  %v4238_v31 = vld [vmem:[#allocation8 + $0x2a8] sm:$0xff]   ;;  %v4240_v48 = vld [vmem:[#allocation8 + $0x2f0] sm:$0xff]  }
 0x1ad   :  { %4307 = vtanh.f32 %v2072_v50  ;;  %v4241_v49 = vld [vmem:[#allocation8 + $0x230] sm:$0xff]  }
 0x1ae   :  { %4309 = vtanh.f32 %v2074_v51  ;;  %v4242_v50 = vld [vmem:[#allocation8 + $0x2b0] sm:$0xff]   ;;  %v4243_v51 = vld [vmem:[#allocation8 + $0x278] sm:$0xff]  }
 0x1b1   :  { %v4296_v52 = vpop.eup %4295 }
 0x1b2   :  { %v4298_v53 = vpop.eup %4297  ;;  %v2119_v54 = vmul.f32 0.5, %v4296_v52  ;;  %v4244_v52 = vld [vmem:[#allocation8 + $0x2f8] sm:$0xff]  }
 0x1b3   :  { %v4300_v55 = vpop.eup %4299  ;;  %v2121_v57 = vmul.f32 0.5, %v4298_v53  ;;  %v4245_v53 = vld [vmem:[#allocation8 + $0x238] sm:$0xff]  }
 0x1b4   :  { %v4302_v58 = vpop.eup %4301  ;;  %v2151_v62 = vadd.f32 0.5, %v2119_v54  ;;  %v2120_v63 = vmul.f32 0.5, %v4300_v55  ;;  %v4246_v54 = vld [vmem:[#allocation8 + $0x2b8] sm:$0xff]   ;;  %v4247_v55 = vld [vmem:[#allocation8 + $0x340] sm:$0xff]  }
 0x1b5   :  { %v4304_v59 = vpop.eup %4303  ;;  %v2122_v60 = vmul.f32 0.5, %v4302_v58  ;;  %v2153_v2 = vadd.f32 0.5, %v2121_v57  ;;  %v4248_v57 = vld [vmem:[#allocation8 + $0x3c0] sm:$0xff]   ;;  %v4620_v58 = vld [vmem:[#allocation7 + $0x8] sm:$0xff] }
 0x1b6   :  { %v4306_v61 = vpop.eup %4305  ;;  %v2135_v0 = vmul.f32 0.5, %v4304_v59  ;;  %v2152_v11 = vadd.f32 0.5, %v2120_v63  ;;  %v372_v59 = vrot.slane %v4620_v58, %v339_v30 }
 0x1b7   :  { %v4308_v1 = vpop.eup %4307  ;;  %v2137_v3 = vmul.f32 0.5, %v4306_v61  ;;  %v2154_v7 = vadd.f32 0.5, %v2122_v60  ;;  %v380_v60 = vrot.slane %v4620_v58, %v347_v32  ;;  %v376_v61 = vrot.slane %v4620_v58, %v343_v33 }
 0x1b8   :  { %v4310_v4 = vpop.eup %4309  ;;  %v2167_v5 = vadd.f32 0.5, %v2135_v0  ;;  %v2136_v6 = vmul.f32 0.5, %v4308_v1 }
 0x1b9   :  { %v2169_v8 = vadd.f32 0.5, %v2137_v3  ;;  %v2138_v9 = vmul.f32 0.5, %v4310_v4 }
 0x1ba   :  { %v2183_v12 = vpack.c.bf16 %v2167_v5, %v2151_v62  ;;  %v2168_v13 = vadd.f32 0.5, %v2136_v6  ;;  %v384_v62 = vrot.slane %v4620_v58, %v351_v10 }
 0x1bb   :  { %v2185_v14 = vpack.c.bf16 %v2169_v8, %v2153_v2  ;;  %v2170_v15 = vadd.f32 0.5, %v2138_v9 }
 0x1bc   :  { %v2184_v16 = vpack.c.bf16 %v2168_v13, %v2152_v11 }
 0x1bd   :  { %v2186_v22 = vpack.c.bf16 %v2170_v15, %v2154_v7 }
 0x1be   :  { %3340 = vmatprep.mubr.bf16.mxu0 %v2184_v16 }
 0x1bf   :  { %3381 = vmatprep.mubr.bf16.mxu1 %v2186_v22  ;;  %3341 = vmatmul.mubr.bf16.vlgmr.msra.gmra.mrb[20].mxu0 %v2183_v12 }
 0x1c0   :  { %3382 = vmatmul.mubr.bf16.vlgmr.msra.gmra.mrb[20].mxu1 %v2185_v14  ;;  %4051 = vmatpush3.bf16.msra.mxu0 %v4217_v21 }
 0x1c1   :  { %4073 = vmatpush3.bf16.msra.mxu1 %v4218_v24  ;;  %4052 = vmatprep.subr.bf16.mxu0 %v4219_v25 }
 0x1c2   :  { %4074 = vmatprep.subr.bf16.mxu1 %v4220_v23 }
 0x1c4   :  { %4053 = vmatpush3.bf16.msra.mxu0 %v4221_v27 }
 0x1c5   :  { %4075 = vmatpush3.bf16.msra.mxu1 %v4222_v28  ;;  %4054 = vmatprep.subr.bf16.mxu0 %v4223_v29 }
 0x1c6   :  { %4076 = vmatprep.subr.bf16.mxu1 %v4224_v34 }
 0x1c8   :  { %4055 = vmatpush3.bf16.msra.mxu0 %v4225_v35 }
 0x1c9   :  { %4077 = vmatpush3.bf16.msra.mxu1 %v4226_v36  ;;  %4056 = vmatprep.subr.bf16.mxu0 %v4227_v37 }
 0x1ca   :  { %4078 = vmatprep.subr.bf16.mxu1 %v4228_v38 }
 0x1cc   :  { %4057 = vmatpush3.bf16.msra.mxu0 %v4229_v39 }
 0x1cd   :  { %4079 = vmatpush3.bf16.msra.mxu1 %v4230_v40  ;;  %4058 = vmatprep.subr.bf16.mxu0 %v4231_v41 }
 0x1ce   :  { %4080 = vmatprep.subr.bf16.mxu1 %v4232_v42 }
 0x1d0   :  { %4059 = vmatpush3.bf16.msra.mxu0 %v4233_v43 }
 0x1d1   :  { %4081 = vmatpush3.bf16.msra.mxu1 %v4234_v56  ;;  %4060 = vmatprep.subr.bf16.mxu0 %v4235_v44 }
 0x1d2   :  { %4082 = vmatprep.subr.bf16.mxu1 %v4236_v45 }
 0x1d4   :  { %4061 = vmatpush3.bf16.msra.mxu0 %v4237_v46 }
 0x1d5   :  { %4083 = vmatpush3.bf16.msra.mxu1 %v4238_v31  ;;  %4062 = vmatprep.subr.bf16.mxu0 %v4239_v47 }
 0x1d6   :  { %4084 = vmatprep.subr.bf16.mxu1 %v4240_v48 }
 0x1d8   :  { %4063 = vmatpush3.bf16.msra.mxu0 %v4241_v49 }
 0x1d9   :  { %4085 = vmatpush3.bf16.msra.mxu1 %v4242_v50  ;;  %4064 = vmatprep.subr.bf16.mxu0 %v4243_v51 }
 0x1da   :  { %4086 = vmatprep.subr.bf16.mxu1 %v4244_v52 }
 0x1dc   :  { %4065 = vmatpush3.bf16.msra.mxu0 %v4245_v53 }
 0x1dd   :  { %4087 = vmatpush3.bf16.msra.mxu1 %v4246_v54  ;;  %4094 = vmatprep.subr.bf16.mxu0 %v4247_v55  ;;  %v4249_v54 = vld [vmem:[#allocation8 + $0x300] sm:$0xff]  }
 0x1de   :  { %4116 = vmatprep.subr.bf16.mxu1 %v4248_v57  ;;  %v4250_v57 = vld [vmem:[#allocation8 + $0x380] sm:$0xff]  }
 0x1e2   :  { %v1913_v63 = vpop.f32.mrb[8].mxu0  ;;  %v1956_v1 = vpop.f32.mrb[8].mxu1 }
 0x1e3   :  { %v1914_v0 = vadd.f32 %v1913_v63, %v372_v59  ;;  %v1915_v2 = vpop.f32.mrb[9].mxu0  ;;  %v1957_v3 = vadd.f32 %v1956_v1, %v380_v60  ;;  %v1958_v5 = vpop.f32.mrb[9].mxu1  ;;  %v4255_v63 = vld [vmem:[#allocation8 + $0x350] sm:$0xff]  }
 0x1e4   :  { %v1916_v4 = vadd.f32 %v1915_v2, %v376_v61  ;;  %v1917_v30 = vpop.f32.mrb[10].mxu0  ;;  %v1959_v7 = vadd.f32 %v1958_v5, %v384_v62  ;;  %v1960_v32 = vpop.f32.mrb[10].mxu1  ;;  %v4257_v1 = vld [vmem:[#allocation8 + $0x310] sm:$0xff]   ;;  %v4261_v5 = vld [vmem:[#allocation8 + $0x318] sm:$0xff]  }
 0x1e5   :  { %v2059_v6 = vmul.f32 0.5, %v1914_v0  ;;  %v1918_v8 = vadd.f32 %v1917_v30, %v372_v59  ;;  %v1919_v9 = vpop.f32.mrb[11].mxu0  ;;  %v2061_v11 = vmul.f32 0.5, %v1957_v3  ;;  %v1961_v33 = vadd.f32 %v1960_v32, %v380_v60  ;;  %v1962_v14 = vpop.f32.mrb[11].mxu1  ;;  %v4251_v59 = vld [vmem:[#allocation8 + $0x348] sm:$0xff]   ;;  %v4256_v0 = vld [vmem:[#allocation8 + $0x3d0] sm:$0xff]  }
 0x1e6   :  { %v2060_v12 = vmul.f32 0.5, %v1916_v4  ;;  %v1920_v13 = vadd.f32 %v1919_v9, %v376_v61  ;;  %v2062_v10 = vmul.f32 0.5, %v1959_v7  ;;  %v1963_v16 = vadd.f32 %v1962_v14, %v384_v62  ;;  %v4252_v60 = vld [vmem:[#allocation8 + $0x3c8] sm:$0xff]   ;;  %v4258_v2 = vld [vmem:[#allocation8 + $0x390] sm:$0xff]   ;;  %v4259_v3 = vld [vmem:[#allocation8 + $0x358] sm:$0xff]  }
 0x1e7   :  { %4311 = vtanh.f32 %v2059_v6  ;;  %v2075_v15 = vmul.f32 0.5, %v1918_v8  ;;  %v2077_v21 = vmul.f32 0.5, %v1961_v33  ;;  %v4253_v61 = vld [vmem:[#allocation8 + $0x308] sm:$0xff]   ;;  %v4260_v4 = vld [vmem:[#allocation8 + $0x3d8] sm:$0xff]   ;;  %v4263_v6 = vld [vmem:[#allocation8 + $0x360] sm:$0xff]  }
 0x1e8   :  { %4313 = vtanh.f32 %v2061_v11  ;;  %v2076_v22 = vmul.f32 0.5, %v1920_v13  ;;  %v2078_v24 = vmul.f32 0.5, %v1963_v16  ;;  %v4254_v62 = vld [vmem:[#allocation8 + $0x388] sm:$0xff]   ;;  %v4262_v30 = vld [vmem:[#allocation8 + $0x398] sm:$0xff]   ;;  %v4264_v7 = vld [vmem:[#allocation8 + $0x3e0] sm:$0xff]  }
 0x1e9   :  { %4315 = vtanh.f32 %v2060_v12  ;;  %v4265_v8 = vld [vmem:[#allocation8 + $0x320] sm:$0xff]   ;;  %v4267_v9 = vld [vmem:[#allocation8 + $0x368] sm:$0xff]   ;;  %v4271_v13 = vld [vmem:[#allocation8 + $0x370] sm:$0xff]  }
 0x1ea   :  { %4317 = vtanh.f32 %v2062_v10  ;;  %v4266_v32 = vld [vmem:[#allocation8 + $0x3a0] sm:$0xff]   ;;  %v4268_v11 = vld [vmem:[#allocation8 + $0x3e8] sm:$0xff]   ;;  %v4272_v14 = vld [vmem:[#allocation8 + $0x3f0] sm:$0xff]  }
 0x1eb   :  { %4319 = vtanh.f32 %v2075_v15  ;;  %v4269_v12 = vld [vmem:[#allocation8 + $0x328] sm:$0xff]   ;;  %v4273_v10 = vld [vmem:[#allocation8 + $0x330] sm:$0xff]   ;;  %v4275_v16 = vld [vmem:[#allocation8 + $0x378] sm:$0xff]  }
 0x1ec   :  { %4321 = vtanh.f32 %v2077_v21  ;;  %v4270_v33 = vld [vmem:[#allocation8 + $0x3a8] sm:$0xff]   ;;  %v4274_v15 = vld [vmem:[#allocation8 + $0x3b0] sm:$0xff]   ;;  %v4276_v21 = vld [vmem:[#allocation8 + $0x3f8] sm:$0xff]  }
 0x1ed   :  { %4323 = vtanh.f32 %v2076_v22  ;;  %v4277_v22 = vld [vmem:[#allocation8 + $0x338] sm:$0xff]  }
 0x1ee   :  { %4325 = vtanh.f32 %v2078_v24  ;;  %v4278_v24 = vld [vmem:[#allocation8 + $0x3b8] sm:$0xff]  }
 0x1f1   :  { %v4312_v25 = vpop.eup %4311 }
 0x1f2   :  { %v4314_v23 = vpop.eup %4313  ;;  %v2123_v27 = vmul.f32 0.5, %v4312_v25  ;;  %v388_v25 = vrot.slane %v4620_v58, %v355_v17 }
 0x1f3   :  { %v4316_v28 = vpop.eup %4315  ;;  %v2125_v29 = vmul.f32 0.5, %v4314_v23  ;;  %v396_v23 = vrot.slane %v4620_v58, %v363_v18 }
 0x1f4   :  { %v4318_v34 = vpop.eup %4317  ;;  %v2155_v38 = vadd.f32 0.5, %v2123_v27  ;;  %v2124_v39 = vmul.f32 0.5, %v4316_v28  ;;  %v392_v27 = vrot.slane %v4620_v58, %v359_v19  ;;  %v400_v28 = vrot.slane %v4620_v58, %v367_v20 }
 0x1f5   :  { %v4320_v35 = vpop.eup %4319  ;;  %v2126_v36 = vmul.f32 0.5, %v4318_v34  ;;  %v2157_v42 = vadd.f32 0.5, %v2125_v29 }
 0x1f6   :  { %v4322_v37 = vpop.eup %4321  ;;  %v2139_v40 = vmul.f32 0.5, %v4320_v35  ;;  %v2156_v48 = vadd.f32 0.5, %v2124_v39 }
 0x1f7   :  { %v4324_v41 = vpop.eup %4323  ;;  %v2141_v43 = vmul.f32 0.5, %v4322_v37  ;;  %v2158_v46 = vadd.f32 0.5, %v2126_v36 }
 0x1f8   :  { %v4326_v56 = vpop.eup %4325  ;;  %v2171_v44 = vadd.f32 0.5, %v2139_v40  ;;  %v2140_v45 = vmul.f32 0.5, %v4324_v41 }
 0x1f9   :  { %v2173_v31 = vadd.f32 0.5, %v2141_v43  ;;  %v2142_v47 = vmul.f32 0.5, %v4326_v56 }
 0x1fa   :  { %v2187_v49 = vpack.c.bf16 %v2171_v44, %v2155_v38  ;;  %v2172_v50 = vadd.f32 0.5, %v2140_v45 }
 0x1fb   :  { %v2189_v51 = vpack.c.bf16 %v2173_v31, %v2157_v42  ;;  %v2174_v52 = vadd.f32 0.5, %v2142_v47 }
 0x1fc   :  { %v2188_v53 = vpack.c.bf16 %v2172_v50, %v2156_v48 }
 0x1fd   :  { %v2190_v55 = vpack.c.bf16 %v2174_v52, %v2158_v46 }
 0x1fe   :  { %3422 = vmatprep.mubr.bf16.mxu0 %v2188_v53 }
 0x1ff   :  { %3463 = vmatprep.mubr.bf16.mxu1 %v2190_v55  ;;  %3423 = vmatmul.mubr.bf16.vlgmr.msra.gmra.mrb[24].mxu0 %v2187_v49 }
 0x200   :  { %3464 = vmatmul.mubr.bf16.vlgmr.msra.gmra.mrb[24].mxu1 %v2189_v51  ;;  %4095 = vmatpush3.bf16.msra.mxu0 %v4249_v54 }
 0x201   :  { %4117 = vmatpush3.bf16.msra.mxu1 %v4250_v57  ;;  %4096 = vmatprep.subr.bf16.mxu0 %v4251_v59 }
 0x202   :  { %4118 = vmatprep.subr.bf16.mxu1 %v4252_v60 }
 0x204   :  { %4097 = vmatpush3.bf16.msra.mxu0 %v4253_v61 }
 0x205   :  { %4119 = vmatpush3.bf16.msra.mxu1 %v4254_v62  ;;  %4098 = vmatprep.subr.bf16.mxu0 %v4255_v63 }
 0x206   :  { %4120 = vmatprep.subr.bf16.mxu1 %v4256_v0 }
 0x208   :  { %4099 = vmatpush3.bf16.msra.mxu0 %v4257_v1 }
 0x209   :  { %4121 = vmatpush3.bf16.msra.mxu1 %v4258_v2  ;;  %4100 = vmatprep.subr.bf16.mxu0 %v4259_v3 }
 0x20a   :  { %4122 = vmatprep.subr.bf16.mxu1 %v4260_v4 }
 0x20c   :  { %4101 = vmatpush3.bf16.msra.mxu0 %v4261_v5 }
 0x20d   :  { %4123 = vmatpush3.bf16.msra.mxu1 %v4262_v30  ;;  %4102 = vmatprep.subr.bf16.mxu0 %v4263_v6 }
 0x20e   :  { %4124 = vmatprep.subr.bf16.mxu1 %v4264_v7 }
 0x210   :  { %4103 = vmatpush3.bf16.msra.mxu0 %v4265_v8 }
 0x211   :  { %4125 = vmatpush3.bf16.msra.mxu1 %v4266_v32  ;;  %4104 = vmatprep.subr.bf16.mxu0 %v4267_v9 }
 0x212   :  { %4126 = vmatprep.subr.bf16.mxu1 %v4268_v11 }
 0x214   :  { %4105 = vmatpush3.bf16.msra.mxu0 %v4269_v12 }
 0x215   :  { %4127 = vmatpush3.bf16.msra.mxu1 %v4270_v33  ;;  %4106 = vmatprep.subr.bf16.mxu0 %v4271_v13 }
 0x216   :  { %4128 = vmatprep.subr.bf16.mxu1 %v4272_v14 }
 0x218   :  { %4107 = vmatpush3.bf16.msra.mxu0 %v4273_v10  ;;  %v3833_v10 = vld [vmem:[%s4668_s4] ss:$0 sm:$0xff]  ;;  %s4472_s4 = smov [#allocation10]  }
 0x219   :  { %4129 = vmatpush3.bf16.msra.mxu1 %v4274_v15  ;;  %4108 = vmatprep.subr.bf16.mxu0 %v4275_v16  ;;  %s3561_s20 = sshll.u32 %s4472_s4, 4  ;;  %s3562_s20 = int_to_ptr.vmem [resolvable:$true] %s3561_s20 }
 0x21a   :  { %4130 = vmatprep.subr.bf16.mxu1 %v4276_v21  ;;  %s4433_s21 = scalar_lea.vmem %s3562_s20, 256  ;;  %p4438_p5 = scmp.lt.s32.totalorder %s3562_s20, %s3562_s20 }
 0x21b   :  { %p4434_p4 = scmp.ne.s32.totalorder %s3562_s20, %s4433_s21  ;;  %p4439_p6 = scmp.lt.s32.totalorder %s4433_s21, %s4433_s21 }
 0x21c   :  { %4109 = vmatpush3.bf16.msra.mxu0 %v4277_v22 }
 0x21d   :  { %4131 = vmatpush3.bf16.msra.mxu1 %v4278_v24  ;;  %p4440_p7 = por %p4439_p6, %p4438_p5 }
 0x21f   :  { %p4441_p8 = pnand %p4440_p7, %p4434_p4 }
 0x222   :  { %v1999_v29 = vpop.f32.mrb[12].mxu0  ;;  %v2042_v35 = vpop.f32.mrb[12].mxu1 }
 0x223   :  { %v2000_v34 = vadd.f32 %v1999_v29, %v388_v25  ;;  %v2001_v36 = vpop.f32.mrb[13].mxu0  ;;  %v2043_v37 = vadd.f32 %v2042_v35, %v396_v23  ;;  %v2044_v39 = vpop.f32.mrb[13].mxu1 }
 0x224   :  { %v2002_v38 = vadd.f32 %v2001_v36, %v392_v27  ;;  %v2003_v17 = vpop.f32.mrb[14].mxu0  ;;  %v2045_v41 = vadd.f32 %v2044_v39, %v400_v28  ;;  %v2046_v18 = vpop.f32.mrb[14].mxu1 }
 0x225   :  { %v2063_v40 = vmul.f32 0.5, %v2000_v34  ;;  %v2004_v42 = vadd.f32 %v2003_v17, %v388_v25  ;;  %v2005_v43 = vpop.f32.mrb[15].mxu0  ;;  %v2065_v56 = vmul.f32 0.5, %v2043_v37  ;;  %v2047_v19 = vadd.f32 %v2046_v18, %v396_v23  ;;  %v2048_v26 = vpop.f32.mrb[15].mxu1 }
 0x226   :  { %v2064_v44 = vmul.f32 0.5, %v2002_v38  ;;  %v2006_v45 = vadd.f32 %v2005_v43, %v392_v27  ;;  %v2066_v20 = vmul.f32 0.5, %v2045_v41  ;;  %v2049_v46 = vadd.f32 %v2048_v26, %v400_v28 }
 0x227   :  { %4327 = vtanh.f32 %v2063_v40  ;;  %v2079_v58 = vmul.f32 0.5, %v2004_v42  ;;  %v2081_v31 = vmul.f32 0.5, %v2047_v19 }
 0x228   :  { %4329 = vtanh.f32 %v2065_v56  ;;  %v2080_v47 = vmul.f32 0.5, %v2006_v45  ;;  %v2082_v48 = vmul.f32 0.5, %v2049_v46 }
 0x229   :  { %4331 = vtanh.f32 %v2064_v44 }
 0x22a   :  { %4333 = vtanh.f32 %v2066_v20 }
 0x22b   :  { %4335 = vtanh.f32 %v2079_v58 }
 0x22c   :  { %4337 = vtanh.f32 %v2081_v31 }
 0x22d   :  { %4339 = vtanh.f32 %v2080_v47 }
 0x22e   :  { %4341 = vtanh.f32 %v2082_v48 }
 0x231   :  { %v4328_v49 = vpop.eup %4327 }
 0x232   :  { %v4330_v50 = vpop.eup %4329  ;;  %v2127_v54 = vmul.f32 0.5, %v4328_v49 }
 0x233   :  { %v4332_v51 = vpop.eup %4331  ;;  %v2129_v52 = vmul.f32 0.5, %v4330_v50 }
 0x234   :  { %v4334_v53 = vpop.eup %4333  ;;  %v2128_v60 = vmul.f32 0.5, %v4332_v51  ;;  %v2159_v2 = vadd.f32 0.5, %v2127_v54 }
 0x235   :  { %v4336_v55 = vpop.eup %4335  ;;  %v2130_v57 = vmul.f32 0.5, %v4334_v53  ;;  %v2161_v63 = vadd.f32 0.5, %v2129_v52 }
 0x236   :  { %v4338_v59 = vpop.eup %4337  ;;  %v2143_v61 = vmul.f32 0.5, %v4336_v55  ;;  %v2160_v7 = vadd.f32 0.5, %v2128_v60 }
 0x237   :  { %v4340_v62 = vpop.eup %4339  ;;  %v2145_v0 = vmul.f32 0.5, %v4338_v59  ;;  %v2162_v5 = vadd.f32 0.5, %v2130_v57 }
 0x238   :  { %v4342_v1 = vpop.eup %4341  ;;  %v2175_v3 = vadd.f32 0.5, %v2143_v61  ;;  %v2144_v4 = vmul.f32 0.5, %v4340_v62 }
 0x239   :  { %v2177_v30 = vadd.f32 0.5, %v2145_v0  ;;  %v2146_v6 = vmul.f32 0.5, %v4342_v1 }
 0x23a   :  { %v2191_v8 = vpack.c.bf16 %v2175_v3, %v2159_v2  ;;  %v2176_v32 = vadd.f32 0.5, %v2144_v4 }
 0x23b   :  { %v2193_v9 = vpack.c.bf16 %v2177_v30, %v2161_v63  ;;  %v2178_v11 = vadd.f32 0.5, %v2146_v6 }
 0x23c   :  { %v2192_v12 = vpack.c.bf16 %v2176_v32, %v2160_v7 }
 0x23d   :  { %v2194_v33 = vpack.c.bf16 %v2178_v11, %v2162_v5 }
 0x23e   :  { %3504 = vmatprep.mubr.bf16.mxu0 %v2192_v12 }
 0x23f   :  { %3545 = vmatprep.mubr.bf16.mxu1 %v2194_v33  ;;  %3505 = vmatmul.mubr.bf16.vlgmr.msra.gmra.mrb[28].mxu0 %v2191_v8 }
 0x240   :  { %3546 = vmatmul.mubr.bf16.vlgmr.msra.gmra.mrb[28].mxu1 %v2193_v9 }
 0x252   :  { %v3978_v13 = vpop.f32.mrb[16].mxu0 }
 0x253   :  { %v4000_v14 = vpop.f32.mrb[16].mxu1  ;;  %v3979_v15 = vpop.f32.mrb[17].mxu0 }
 0x254   :  { %v3980_v16 = vadd.f32 %v3979_v15, %v3978_v13  ;;  %v4001_v21 = vpop.f32.mrb[17].mxu1  ;;  %v3981_v22 = vpop.f32.mrb[18].mxu0 }
 0x255   :  { %v4002_v24 = vadd.f32 %v4001_v21, %v4000_v14  ;;  %v4003_v25 = vpop.f32.mrb[18].mxu1  ;;  %v3982_v23 = vpop.f32.mrb[19].mxu0 }
 0x256   :  { %v3261_v27 = vadd.f32 %v3980_v16, %v3833_v10  ;;  %v3983_v28 = vadd.f32 %v3982_v23, %v3981_v22  ;;  %v4004_v29 = vpop.f32.mrb[19].mxu1 }
 0x257   :  { %v4005_v34 = vadd.f32 %v4004_v29, %v4003_v25 }
 0x258   :  { %v3302_v35 = vadd.f32 %v4002_v24, %v3261_v27  ;;  %v3264_v36 = vadd.f32 %v3983_v28, %v3833_v10 }
 0x25a   :  { %v3305_v37 = vadd.f32 %v4005_v34, %v3264_v36 }
 0x292   :  { %v4022_v38 = vpop.f32.mrb[20].mxu0 }
 0x293   :  { %v4044_v39 = vpop.f32.mrb[20].mxu1  ;;  %v4023_v17 = vpop.f32.mrb[21].mxu0 }
 0x294   :  { %v4024_v40 = vadd.f32 %v4023_v17, %v4022_v38  ;;  %v4045_v41 = vpop.f32.mrb[21].mxu1  ;;  %v4025_v42 = vpop.f32.mrb[22].mxu0 }
 0x295   :  { %v4046_v18 = vadd.f32 %v4045_v41, %v4044_v39  ;;  %v4047_v43 = vpop.f32.mrb[22].mxu1  ;;  %v4026_v56 = vpop.f32.mrb[23].mxu0 }
 0x296   :  { %v3343_v44 = vadd.f32 %v4024_v40, %v3302_v35  ;;  %v4027_v19 = vadd.f32 %v4026_v56, %v4025_v42  ;;  %v4048_v45 = vpop.f32.mrb[23].mxu1 }
 0x297   :  { %v4049_v26 = vadd.f32 %v4048_v45, %v4047_v43 }
 0x298   :  { %v3384_v20 = vadd.f32 %v4046_v18, %v3343_v44  ;;  %v3346_v58 = vadd.f32 %v4027_v19, %v3305_v37 }
 0x29a   :  { %v3387_v46 = vadd.f32 %v4049_v26, %v3346_v58 }
 0x2d2   :  { %v4066_v31 = vpop.f32.mrb[24].mxu0 }
 0x2d3   :  { %v4088_v47 = vpop.f32.mrb[24].mxu1  ;;  %v4067_v48 = vpop.f32.mrb[25].mxu0 }
 0x2d4   :  { %v4068_v49 = vadd.f32 %v4067_v48, %v4066_v31  ;;  %v4089_v50 = vpop.f32.mrb[25].mxu1  ;;  %v4069_v51 = vpop.f32.mrb[26].mxu0 }
 0x2d5   :  { %v4090_v52 = vadd.f32 %v4089_v50, %v4088_v47  ;;  %v4091_v53 = vpop.f32.mrb[26].mxu1  ;;  %v4070_v54 = vpop.f32.mrb[27].mxu0 }
 0x2d6   :  { %v3425_v55 = vadd.f32 %v4068_v49, %v3384_v20  ;;  %v4071_v57 = vadd.f32 %v4070_v54, %v4069_v51  ;;  %v4092_v59 = vpop.f32.mrb[27].mxu1 }
 0x2d7   :  { %v4093_v60 = vadd.f32 %v4092_v59, %v4091_v53 }
 0x2d8   :  { %v3466_v61 = vadd.f32 %v4090_v52, %v3425_v55  ;;  %v3428_v62 = vadd.f32 %v4071_v57, %v3387_v46 }
 0x2da   :  { %v3469_v63 = vadd.f32 %v4093_v60, %v3428_v62 }
 0x312   :  { %v4110_v0 = vpop.f32.mrb[28].mxu0 }
 0x313   :  { %v4132_v1 = vpop.f32.mrb[28].mxu1  ;;  %v4111_v2 = vpop.f32.mrb[29].mxu0 }
 0x314   :  { %v4112_v3 = vadd.f32 %v4111_v2, %v4110_v0  ;;  %v4133_v4 = vpop.f32.mrb[29].mxu1  ;;  %v4113_v5 = vpop.f32.mrb[30].mxu0 }
 0x315   :  { %v4134_v30 = vadd.f32 %v4133_v4, %v4132_v1  ;;  %v4135_v6 = vpop.f32.mrb[30].mxu1  ;;  %v4114_v7 = vpop.f32.mrb[31].mxu0 }
 0x316   :  { %v3507_v8 = vadd.f32 %v4112_v3, %v3466_v61  ;;  %v4115_v32 = vadd.f32 %v4114_v7, %v4113_v5  ;;  %v4136_v9 = vpop.f32.mrb[31].mxu1 }
 0x317   :  { %v4137_v11 = vadd.f32 %v4136_v9, %v4135_v6 }
 0x318   :  { %v3548_v12 = vadd.f32 %v4134_v30, %v3507_v8  ;;  %v3510_v33 = vadd.f32 %v4115_v32, %v3469_v63 }
 0x31a   :  { %3554 = vst [vmem:[#allocation10] sm:$0xff] %v3548_v12  ;;  %v3551_v13 = vadd.f32 %v4137_v11, %v3510_v33 }
 0x31c   :  { %3555 = vst [vmem:[#allocation10 + $0x8] sm:$0xff] %v3551_v13 }
 0x31d   :  { %4444 = shalt.err (!%p4441_p8)
}
 0x31e   :  { %s4445_s24 = scalar_lea.hbm %s4669_s5, 256 }
 0x31f   :  { %p4446_p9 = scmp.ne.s32.totalorder %s4669_s5, %s4445_s24  ;;  %p4449_p10 = scmp.lt.u32.totalorder %s4445_s24, %s4669_s5 }
 0x321   :  { %p4451_p11 = pnand %p4449_p10, %p4446_p9 }
 0x323   :  { %4454 = shalt.err (!%p4451_p11)
}
 0x324   :  { %3567 = dma.vmem_to_hbm [thread:$0]  %s3562_s20, 256, %s4669_s5, [#allocation4], %s4467_s1, %s4467_s1, %s4468_s17  }
 0x325   :  { %4461 = dma.done.wait [#allocation4], 256  }
 0x326   :  { %4462 = vsyncadd [#allocation4], 4294967040 }
 0x327   :  { %3571 = vsyncpa [#allocation3], 1 }
 0x328   :  { %3572 = vsyncpa [#allocation6], 1 }
 0x329   :  { %3573 = vsyncpa [#allocation9], 1 }
 0x32a   :  { %3574 = vsyncpa [#allocation4], 1 }

</bundles_post_ra>
